<compile_context>
chip_gen: v6e
topology: v6e:2x2x1
jax: 0.10.0
libtpu: 0.0.40
codegen_flags: <defaults>
</compile_context>

<pallas_src>
import jax
import jax.numpy as jnp
import numpy as np
from jax import lax
from jax.experimental import pallas as pl
from jax.experimental.pallas import tpu as pltpu

HID = (128, 256, 256, 128)
INPUT_DIM = 3072          # 3 * 32 * 32
LN_EPS = 1e-5

# Packed-parameter ordering for the pallas_call
PARAM_ORDER = ("wx", "w128", "w256", "dw0", "dw1", "dw2", "wout",
               "v128", "v256", "bout")


def _round_up(a, m):
    return ((a + m - 1) // m) * m


# ----------------------------------------------------------------------------
# Shared math: works both on Pallas Refs (inside the kernel, lazy loads at the
# point of use) and on plain jnp arrays (pure-JAX reference).
# ----------------------------------------------------------------------------
def _mm(h_f32, w_bf16):
    """bf16 MXU matmul with f32 accumulation."""
    return jnp.dot(h_f32.astype(jnp.bfloat16), w_bf16,
                   preferred_element_type=jnp.float32)


def _ln(y, g, b):
    """LayerNorm, single-pass mean / mean-of-squares (biased var), eps=1e-5."""
    mu = jnp.mean(y, axis=-1, keepdims=True)
    ms = jnp.mean(y * y, axis=-1, keepdims=True)
    var = jnp.maximum(ms - mu * mu, 0.0)
    return (y - mu) * lax.rsqrt(var + LN_EPS) * g + b


def _resblock(h, wtab, i1, i2, vtab, vb):
    """ResBlock: x + relu(LN(Linear(LN(Linear(x)))))  -- lazy weight loads."""
    y = _mm(h, wtab[i1]) + vtab[vb + 0:vb + 1, :]
    y = _ln(y, vtab[vb + 1:vb + 2, :], vtab[vb + 2:vb + 3, :])
    y = _mm(y, wtab[i2]) + vtab[vb + 3:vb + 4, :]
    y = _ln(y, vtab[vb + 4:vb + 5, :], vtab[vb + 5:vb + 6, :])
    return h + jnp.maximum(y, 0.0)


def _forward(x, t, wx, w128, w256, dw0, dw1, dw2, wout, v128, v256, bout):
    # time embedding: Linear(1,128) -> ReLU -> Linear(128,128)
    tt = t[...]                                              # (TB, 1) f32
    te = jnp.maximum(tt * v128[0:1, :] + v128[1:2, :], 0.0)  # (TB, 128)
    te = _mm(te, w128[0]) + v128[2:3, :]

    # input_proj on concat([x, t_emb]) == x @ Wx + t_emb @ Wt + b, then ReLU
    h = _mm(x[...], wx[...]) + _mm(te, w128[1]) + v128[3:4, :]
    h = jnp.maximum(h, 0.0)

    # stage 0 (dim 128): 2 ResBlocks, then dim_layer 0 (128->256) + ReLU
    h = _resblock(h, w128, 2, 3, v128, 4)
    h = _resblock(h, w128, 4, 5, v128, 10)
    h = jnp.maximum(_mm(h, dw0[...]) + v256[24:25, :], 0.0)

    # stage 1 (dim 256): 2 ResBlocks, then dim_layer 1 (256->256) + ReLU
    h = _resblock(h, w256, 0, 1, v256, 0)
    h = _resblock(h, w256, 2, 3, v256, 6)
    h = jnp.maximum(_mm(h, dw1[...]) + v256[25:26, :], 0.0)

    # stage 2 (dim 256): 2 ResBlocks, then dim_layer 2 (256->128) + ReLU
    h = _resblock(h, w256, 4, 5, v256, 12)
    h = _resblock(h, w256, 6, 7, v256, 18)
    h = jnp.maximum(_mm(h, dw2[...]) + v128[28:29, :], 0.0)

    # stage 3 (dim 128): 2 ResBlocks (no dim_layer)
    h = _resblock(h, w128, 6, 7, v128, 16)
    h = _resblock(h, w128, 8, 9, v128, 22)

    # output_proj 128 -> 3072
    return _mm(h, wout[...]) + bout[...]


# ----------------------------------------------------------------------------
# Pallas kernel
# ----------------------------------------------------------------------------
def velocity_kernel(x_ref, t_ref, wx_ref, w128_ref, w256_ref,
                    dw0_ref, dw1_ref, dw2_ref, wout_ref,
                    v128_ref, v256_ref, bout_ref, out_ref):
    out_ref[...] = _forward(x_ref, t_ref, wx_ref, w128_ref, w256_ref,
                            dw0_ref, dw1_ref, dw2_ref, wout_ref,
                            v128_ref, v256_ref, bout_ref)


def _vmem_limit_bytes():
    cap = 64 * 1024 * 1024
    try:
        info = pltpu.get_tpu_info()
        cap = int(getattr(info, "vmem_capacity_bytes", cap)) or cap
    except Exception:
        pass
    # 3/4 of physical VMEM, capped at 100 MiB: ~96 MiB on v5e/v6e, 48 MiB on v7x
    return min((cap * 3) // 4, 100 * 1024 * 1024)


def resnet_velocity(x, t, params, *, batch_tile=256):
    """x: (B, 3, 32, 32) f32, t: (B,) f32, params: packed dict -> (B, 3, 32, 32)."""
    B = x.shape[0]
    x_flat = x.reshape(B, -1).astype(jnp.float32)
    t_col = t.reshape(-1, 1).astype(jnp.float32)

    # batch tile: multiple of 8 (sublane), capped at batch_tile; pad batch to it
    TB = batch_tile if B >= batch_tile else _round_up(B, 8)
    Bp = _round_up(B, TB)
    if Bp != B:
        x_flat = jnp.pad(x_flat, ((0, Bp - B), (0, 0)))
        t_col = jnp.pad(t_col, ((0, Bp - B), (0, 0)))

    ws = [params[k] for k in PARAM_ORDER]

    def const_spec(a):
        nd = a.ndim
        return pl.BlockSpec(a.shape, lambda i, _nd=nd: (0,) * _nd)

    in_specs = [
        pl.BlockSpec((TB, INPUT_DIM), lambda i: (i, 0)),   # x tile (streamed)
        pl.BlockSpec((TB, 1), lambda i: (i, 0)),           # t tile (streamed)
    ] + [const_spec(a) for a in ws]                        # weights: resident

    # advisory cost estimate (per padded row)
    flops_per_row = 2 * (2 * 128 * 128 + INPUT_DIM * 128 + 8 * 128 * 128
                         + 8 * 256 * 256 + 128 * 256 + 256 * 256 + 256 * 128
                         + 128 * INPUT_DIM)
    bytes_params = sum(int(np.prod(a.shape)) * a.dtype.itemsize for a in ws)
    bytes_accessed = bytes_params + (2 * Bp * INPUT_DIM + Bp) * 4
    cost = pl.CostEstimate(flops=flops_per_row * Bp,
                           transcendentals=16 * Bp,
                           bytes_accessed=bytes_accessed)

    out = pl.pallas_call(
        velocity_kernel,
        out_shape=jax.ShapeDtypeStruct((Bp, INPUT_DIM), jnp.float32),
        grid=(Bp // TB,),
        in_specs=in_specs,
        out_specs=pl.BlockSpec((TB, INPUT_DIM), lambda i: (i, 0)),
        compiler_params=pltpu.CompilerParams(
            dimension_semantics=("parallel",),
            vmem_limit_bytes=_vmem_limit_bytes(),
        ),
        cost_estimate=cost,
    )(x_flat, t_col, *ws)

    return out[:B].reshape(B, 3, 32, 32)


# ----------------------------------------------------------------------------
# Deterministic parameter construction (PyTorch-style uniform(+-1/sqrt(fan_in)))
# packed directly into the kernel layout.
# ----------------------------------------------------------------------------
def make_packed_params(key):
    keys = iter(jax.random.split(key, 64))

    def linear(fan_in, fan_out):
        kw, kb = jax.random.split(next(keys))
        bound = 1.0 / float(np.sqrt(fan_in))
        w = jax.random.uniform(kw, (fan_in, fan_out), jnp.float32, -bound, bound)
        b = jax.random.uniform(kb, (fan_out,), jnp.float32, -bound, bound)
        return w, b

    # time_embed
    tw1, tb1 = linear(1, HID[0])            # (1,128)
    tw2, tb2 = linear(HID[0], HID[0])       # (128,128)
    # input_proj on concat([x (3072), t_emb (128)]) -> split
    iw, ib = linear(INPUT_DIM + HID[0], HID[0])
    iwx, iwt = iw[:INPUT_DIM], iw[INPUT_DIM:]

    rb = {128: [], 256: []}                 # (w1, b1, w2, b2) per block, per dim
    dim_w, dim_b = [], []
    for i, d in enumerate(HID):
        for _ in range(2):
            w1, b1 = linear(d, d)
            w2, b2 = linear(d, d)
            rb[d].append((w1, b1, w2, b2))
        if i < len(HID) - 1:
            dw, db = linear(HID[i], HID[i + 1])
            dim_w.append(dw)
            dim_b.append(db)
    ow, ob = linear(HID[-1], INPUT_DIM)

    def rb_vecs(b1, b2, d):
        one = jnp.ones((d,), jnp.float32)
        zero = jnp.zeros((d,), jnp.float32)
        return [b1, one, zero, b2, one, zero]   # b1, g1, beta1, b2, g2, beta2

    # packed square-weight stacks
    w128_list = [tw2, iwt] + [m for (w1, _, w2, _) in rb[128] for m in (w1, w2)]
    w256_list = [m for (w1, _, w2, _) in rb[256] for m in (w1, w2)]

    # packed small-vector tables
    v128_rows = [tw1[0], tb1, tb2, ib]
    for (_, b1, _, b2) in rb[128]:
        v128_rows += rb_vecs(b1, b2, 128)
    v128_rows += [dim_b[2]]                     # dim_layer 2 bias (width 128)

    v256_rows = []
    for (_, b1, _, b2) in rb[256]:
        v256_rows += rb_vecs(b1, b2, 256)
    v256_rows += [dim_b[0], dim_b[1]]           # dim_layer 0/1 biases (width 256)

    bf16 = jnp.bfloat16
    return dict(
        wx=iwx.astype(bf16),                         # (3072, 128)
        w128=jnp.stack(w128_list).astype(bf16),      # (10, 128, 128)
        w256=jnp.stack(w256_list).astype(bf16),      # (8, 256, 256)
        dw0=dim_w[0].astype(bf16),                   # (128, 256)
        dw1=dim_w[1].astype(bf16),                   # (256, 256)
        dw2=dim_w[2].astype(bf16),                   # (256, 128)
        wout=ow.astype(bf16),                        # (128, 3072)
        v128=jnp.stack(v128_rows),                   # (29, 128) f32
        v256=jnp.stack(v256_rows),                   # (26, 256) f32
        bout=ob.reshape(1, INPUT_DIM),               # (1, 3072) f32
    )


# ----------------------------------------------------------------------------
# Pure-JAX reference (same mixed-precision policy as the kernel)
# ----------------------------------------------------------------------------
def reference_forward(x, t, params):
    B = x.shape[0]
    x_flat = x.reshape(B, -1).astype(jnp.float32)
    t_col = t.reshape(-1, 1).astype(jnp.float32)
    out = _forward(x_flat, t_col, *[params[k] for k in PARAM_ORDER])
    return out.reshape(B, 3, 32, 32)


if __name__ == "__main__":
    key = jax.random.PRNGKey(0)
    kx, kt, kp = jax.random.split(key, 3)

    B = 2
    x = jax.random.normal(kx, (B, 3, 32, 32), jnp.float32)
    t = jax.random.uniform(kt, (B,), jnp.float32)
    params = make_packed_params(kp)

    v = jax.block_until_ready(resnet_velocity(x, t, params))
    assert v.shape == (B, 3, 32, 32), v.shape

    v_ref = jax.block_until_ready(reference_forward(x, t, params))
    np.testing.assert_allclose(np.asarray(v), np.asarray(v_ref),
                               rtol=1e-2, atol=1e-2)
    print("KERNEL_OK")
</pallas_src>

<mosaic_0001>
module attributes {stable_mosaic.version = 11 : i64} {
  func.func @velocity_kernel(%arg0: i32, %arg1: memref<8x3072xf32, #tpu.memory_space<vmem>>, %arg2: memref<8x1xf32, #tpu.memory_space<vmem>>, %arg3: memref<3072x128xbf16, #tpu.memory_space<vmem>>, %arg4: memref<10x128x128xbf16, #tpu.memory_space<vmem>>, %arg5: memref<8x256x256xbf16, #tpu.memory_space<vmem>>, %arg6: memref<128x256xbf16, #tpu.memory_space<vmem>>, %arg7: memref<256x256xbf16, #tpu.memory_space<vmem>>, %arg8: memref<256x128xbf16, #tpu.memory_space<vmem>>, %arg9: memref<128x3072xbf16, #tpu.memory_space<vmem>>, %arg10: memref<29x128xf32, #tpu.memory_space<vmem>>, %arg11: memref<26x256xf32, #tpu.memory_space<vmem>>, %arg12: memref<1x3072xf32, #tpu.memory_space<vmem>>, %arg13: memref<8x3072xf32, #tpu.memory_space<vmem>>) attributes {dimension_semantics = [#tpu.dimension_semantics<parallel>], iteration_bounds = array<i64: 1>, scalar_prefetch = 0 : i64, scratch_operands = 0 : i64, tpu.core_type = #tpu.core_type<tc>, window_params = [{transform_indices = @transform_0, window_bounds = array<i64: 8, 3072>}, {transform_indices = @transform_1, window_bounds = array<i64: 8, 1>}, {pipeline_mode = #tpu.pipeline_mode<synchronous>, transform_indices = @transform_2, window_bounds = array<i64: 3072, 128>}, {pipeline_mode = #tpu.pipeline_mode<synchronous>, transform_indices = @transform_3, window_bounds = array<i64: 10, 128, 128>}, {pipeline_mode = #tpu.pipeline_mode<synchronous>, transform_indices = @transform_4, window_bounds = array<i64: 8, 256, 256>}, {pipeline_mode = #tpu.pipeline_mode<synchronous>, transform_indices = @transform_5, window_bounds = array<i64: 128, 256>}, {pipeline_mode = #tpu.pipeline_mode<synchronous>, transform_indices = @transform_6, window_bounds = array<i64: 256, 256>}, {pipeline_mode = #tpu.pipeline_mode<synchronous>, transform_indices = @transform_7, window_bounds = array<i64: 256, 128>}, {pipeline_mode = #tpu.pipeline_mode<synchronous>, transform_indices = @transform_8, window_bounds = array<i64: 128, 3072>}, {pipeline_mode = #tpu.pipeline_mode<synchronous>, transform_indices = @transform_9, window_bounds = array<i64: 29, 128>}, {pipeline_mode = #tpu.pipeline_mode<synchronous>, transform_indices = @transform_10, window_bounds = array<i64: 26, 256>}, {pipeline_mode = #tpu.pipeline_mode<synchronous>, transform_indices = @transform_11, window_bounds = array<i64: 1, 3072>}, {transform_indices = @transform_12, window_bounds = array<i64: 8, 3072>}]} {
    %c0 = arith.constant 0 : index
    %c0_0 = arith.constant 0 : index
    %0 = vector.load %arg2[%c0, %c0_0] : memref<8x1xf32, #tpu.memory_space<vmem>>, vector<8x1xf32>
    %c0_1 = arith.constant 0 : index
    %c0_2 = arith.constant 0 : index
    %1 = vector.load %arg10[%c0_1, %c0_2] : memref<29x128xf32, #tpu.memory_space<vmem>>, vector<1x128xf32>
    %2 = vector.broadcast %0 : vector<8x1xf32> to vector<8x128xf32>
    %3 = vector.broadcast %1 : vector<1x128xf32> to vector<8x128xf32>
    %4 = arith.mulf %2, %3 : vector<8x128xf32>
    %c1 = arith.constant 1 : index
    %c0_3 = arith.constant 0 : index
    %5 = vector.load %arg10[%c1, %c0_3] : memref<29x128xf32, #tpu.memory_space<vmem>>, vector<1x128xf32>
    %6 = vector.broadcast %5 : vector<1x128xf32> to vector<8x128xf32>
    %7 = arith.addf %4, %6 : vector<8x128xf32>
    %cst = arith.constant 0.000000e+00 : f32
    %8 = vector.broadcast %cst : f32 to vector<8x128xf32>
    %9 = arith.maximumf %7, %8 : vector<8x128xf32>
    %c0_4 = arith.constant 0 : index
    %c0_5 = arith.constant 0 : index
    %c0_6 = arith.constant 0 : index
    %10 = vector.load %arg4[%c0_4, %c0_5, %c0_6] : memref<10x128x128xbf16, #tpu.memory_space<vmem>>, vector<1x128x128xbf16>
    %11 = vector.shape_cast %10 : vector<1x128x128xbf16> to vector<128x128xbf16>
    %12 = arith.truncf %9 : vector<8x128xf32> to vector<8x128xbf16>
    %cst_7 = arith.constant dense<0.000000e+00> : vector<8x128xf32>
    %13 = tpu.matmul %12, %11, %cst_7 {dimension_numbers = #tpu.dot_dimension_numbers<[1], [0], [0], [1], [0, 0, 1, 1], [], []>} : vector<8x128xbf16>, vector<128x128xbf16>, vector<8x128xf32> -> vector<8x128xf32>
    %c2 = arith.constant 2 : index
    %c0_8 = arith.constant 0 : index
    %14 = vector.load %arg10[%c2, %c0_8] : memref<29x128xf32, #tpu.memory_space<vmem>>, vector<1x128xf32>
    %15 = vector.broadcast %14 : vector<1x128xf32> to vector<8x128xf32>
    %16 = arith.addf %13, %15 : vector<8x128xf32>
    %c0_9 = arith.constant 0 : index
    %c0_10 = arith.constant 0 : index
    %17 = vector.load %arg1[%c0_9, %c0_10] : memref<8x3072xf32, #tpu.memory_space<vmem>>, vector<8x3072xf32>
    %c0_11 = arith.constant 0 : index
    %c0_12 = arith.constant 0 : index
    %18 = vector.load %arg3[%c0_11, %c0_12] : memref<3072x128xbf16, #tpu.memory_space<vmem>>, vector<3072x128xbf16>
    %19 = arith.truncf %17 : vector<8x3072xf32> to vector<8x3072xbf16>
    %cst_13 = arith.constant dense<0.000000e+00> : vector<8x128xf32>
    %20 = tpu.matmul %19, %18, %cst_13 {dimension_numbers = #tpu.dot_dimension_numbers<[1], [0], [0], [1], [0, 0, 1, 1], [], []>} : vector<8x3072xbf16>, vector<3072x128xbf16>, vector<8x128xf32> -> vector<8x128xf32>
    %c1_14 = arith.constant 1 : index
    %c0_15 = arith.constant 0 : index
    %c0_16 = arith.constant 0 : index
    %21 = vector.load %arg4[%c1_14, %c0_15, %c0_16] : memref<10x128x128xbf16, #tpu.memory_space<vmem>>, vector<1x128x128xbf16>
    %22 = vector.shape_cast %21 : vector<1x128x128xbf16> to vector<128x128xbf16>
    %23 = arith.truncf %16 : vector<8x128xf32> to vector<8x128xbf16>
    %cst_17 = arith.constant dense<0.000000e+00> : vector<8x128xf32>
    %24 = tpu.matmul %23, %22, %cst_17 {dimension_numbers = #tpu.dot_dimension_numbers<[1], [0], [0], [1], [0, 0, 1, 1], [], []>} : vector<8x128xbf16>, vector<128x128xbf16>, vector<8x128xf32> -> vector<8x128xf32>
    %25 = arith.addf %20, %24 : vector<8x128xf32>
    %c3 = arith.constant 3 : index
    %c0_18 = arith.constant 0 : index
    %26 = vector.load %arg10[%c3, %c0_18] : memref<29x128xf32, #tpu.memory_space<vmem>>, vector<1x128xf32>
    %27 = vector.broadcast %26 : vector<1x128xf32> to vector<8x128xf32>
    %28 = arith.addf %25, %27 : vector<8x128xf32>
    %cst_19 = arith.constant 0.000000e+00 : f32
    %29 = vector.broadcast %cst_19 : f32 to vector<8x128xf32>
    %30 = arith.maximumf %28, %29 : vector<8x128xf32>
    %c2_20 = arith.constant 2 : index
    %c0_21 = arith.constant 0 : index
    %c0_22 = arith.constant 0 : index
    %31 = vector.load %arg4[%c2_20, %c0_21, %c0_22] : memref<10x128x128xbf16, #tpu.memory_space<vmem>>, vector<1x128x128xbf16>
    %32 = vector.shape_cast %31 : vector<1x128x128xbf16> to vector<128x128xbf16>
    %33 = arith.truncf %30 : vector<8x128xf32> to vector<8x128xbf16>
    %cst_23 = arith.constant dense<0.000000e+00> : vector<8x128xf32>
    %34 = tpu.matmul %33, %32, %cst_23 {dimension_numbers = #tpu.dot_dimension_numbers<[1], [0], [0], [1], [0, 0, 1, 1], [], []>} : vector<8x128xbf16>, vector<128x128xbf16>, vector<8x128xf32> -> vector<8x128xf32>
    %c4 = arith.constant 4 : index
    %c0_24 = arith.constant 0 : index
    %35 = vector.load %arg10[%c4, %c0_24] : memref<29x128xf32, #tpu.memory_space<vmem>>, vector<1x128xf32>
    %36 = vector.broadcast %35 : vector<1x128xf32> to vector<8x128xf32>
    %37 = arith.addf %34, %36 : vector<8x128xf32>
    %c5 = arith.constant 5 : index
    %c0_25 = arith.constant 0 : index
    %38 = vector.load %arg10[%c5, %c0_25] : memref<29x128xf32, #tpu.memory_space<vmem>>, vector<1x128xf32>
    %c6 = arith.constant 6 : index
    %c0_26 = arith.constant 0 : index
    %39 = vector.load %arg10[%c6, %c0_26] : memref<29x128xf32, #tpu.memory_space<vmem>>, vector<1x128xf32>
    %cst_27 = arith.constant dense<0.000000e+00> : vector<8xf32>
    %40 = vector.multi_reduction <add>, %37, %cst_27 [1] : vector<8x128xf32> to vector<8xf32>
    %41 = vector.shape_cast %40 : vector<8xf32> to vector<8x1xf32>
    %cst_28 = arith.constant 1.280000e+02 : f32
    %42 = vector.broadcast %cst_28 : f32 to vector<8x1xf32>
    %43 = arith.divf %41, %42 : vector<8x1xf32>
    %44 = arith.mulf %37, %37 : vector<8x128xf32>
    %cst_29 = arith.constant dense<0.000000e+00> : vector<8xf32>
    %45 = vector.multi_reduction <add>, %44, %cst_29 [1] : vector<8x128xf32> to vector<8xf32>
    %46 = vector.shape_cast %45 : vector<8xf32> to vector<8x1xf32>
    %cst_30 = arith.constant 1.280000e+02 : f32
    %47 = vector.broadcast %cst_30 : f32 to vector<8x1xf32>
    %48 = arith.divf %46, %47 : vector<8x1xf32>
    %49 = arith.mulf %43, %43 : vector<8x1xf32>
    %50 = arith.subf %48, %49 : vector<8x1xf32>
    %cst_31 = arith.constant 0.000000e+00 : f32
    %51 = vector.broadcast %cst_31 : f32 to vector<8x1xf32>
    %52 = arith.maximumf %50, %51 : vector<8x1xf32>
    %53 = vector.broadcast %43 : vector<8x1xf32> to vector<8x128xf32>
    %54 = arith.subf %37, %53 : vector<8x128xf32>
    %cst_32 = arith.constant 9.99999974E-6 : f32
    %55 = vector.broadcast %cst_32 : f32 to vector<8x1xf32>
    %56 = arith.addf %52, %55 : vector<8x1xf32>
    %57 = math.rsqrt %56 : vector<8x1xf32>
    %58 = vector.broadcast %57 : vector<8x1xf32> to vector<8x128xf32>
    %59 = arith.mulf %54, %58 : vector<8x128xf32>
    %60 = vector.broadcast %38 : vector<1x128xf32> to vector<8x128xf32>
    %61 = arith.mulf %59, %60 : vector<8x128xf32>
    %62 = vector.broadcast %39 : vector<1x128xf32> to vector<8x128xf32>
    %63 = arith.addf %61, %62 : vector<8x128xf32>
    %c3_33 = arith.constant 3 : index
    %c0_34 = arith.constant 0 : index
    %c0_35 = arith.constant 0 : index
    %64 = vector.load %arg4[%c3_33, %c0_34, %c0_35] : memref<10x128x128xbf16, #tpu.memory_space<vmem>>, vector<1x128x128xbf16>
    %65 = vector.shape_cast %64 : vector<1x128x128xbf16> to vector<128x128xbf16>
    %66 = arith.truncf %63 : vector<8x128xf32> to vector<8x128xbf16>
    %cst_36 = arith.constant dense<0.000000e+00> : vector<8x128xf32>
    %67 = tpu.matmul %66, %65, %cst_36 {dimension_numbers = #tpu.dot_dimension_numbers<[1], [0], [0], [1], [0, 0, 1, 1], [], []>} : vector<8x128xbf16>, vector<128x128xbf16>, vector<8x128xf32> -> vector<8x128xf32>
    %c7 = arith.constant 7 : index
    %c0_37 = arith.constant 0 : index
    %68 = vector.load %arg10[%c7, %c0_37] : memref<29x128xf32, #tpu.memory_space<vmem>>, vector<1x128xf32>
    %69 = vector.broadcast %68 : vector<1x128xf32> to vector<8x128xf32>
    %70 = arith.addf %67, %69 : vector<8x128xf32>
    %c8 = arith.constant 8 : index
    %c0_38 = arith.constant 0 : index
    %71 = vector.load %arg10[%c8, %c0_38] : memref<29x128xf32, #tpu.memory_space<vmem>>, vector<1x128xf32>
    %c9 = arith.constant 9 : index
    %c0_39 = arith.constant 0 : index
    %72 = vector.load %arg10[%c9, %c0_39] : memref<29x128xf32, #tpu.memory_space<vmem>>, vector<1x128xf32>
    %cst_40 = arith.constant dense<0.000000e+00> : vector<8xf32>
    %73 = vector.multi_reduction <add>, %70, %cst_40 [1] : vector<8x128xf32> to vector<8xf32>
    %74 = vector.shape_cast %73 : vector<8xf32> to vector<8x1xf32>
    %cst_41 = arith.constant 1.280000e+02 : f32
    %75 = vector.broadcast %cst_41 : f32 to vector<8x1xf32>
    %76 = arith.divf %74, %75 : vector<8x1xf32>
    %77 = arith.mulf %70, %70 : vector<8x128xf32>
    %cst_42 = arith.constant dense<0.000000e+00> : vector<8xf32>
    %78 = vector.multi_reduction <add>, %77, %cst_42 [1] : vector<8x128xf32> to vector<8xf32>
    %79 = vector.shape_cast %78 : vector<8xf32> to vector<8x1xf32>
    %cst_43 = arith.constant 1.280000e+02 : f32
    %80 = vector.broadcast %cst_43 : f32 to vector<8x1xf32>
    %81 = arith.divf %79, %80 : vector<8x1xf32>
    %82 = arith.mulf %76, %76 : vector<8x1xf32>
    %83 = arith.subf %81, %82 : vector<8x1xf32>
    %cst_44 = arith.constant 0.000000e+00 : f32
    %84 = vector.broadcast %cst_44 : f32 to vector<8x1xf32>
    %85 = arith.maximumf %83, %84 : vector<8x1xf32>
    %86 = vector.broadcast %76 : vector<8x1xf32> to vector<8x128xf32>
    %87 = arith.subf %70, %86 : vector<8x128xf32>
    %cst_45 = arith.constant 9.99999974E-6 : f32
    %88 = vector.broadcast %cst_45 : f32 to vector<8x1xf32>
    %89 = arith.addf %85, %88 : vector<8x1xf32>
    %90 = math.rsqrt %89 : vector<8x1xf32>
    %91 = vector.broadcast %90 : vector<8x1xf32> to vector<8x128xf32>
    %92 = arith.mulf %87, %91 : vector<8x128xf32>
    %93 = vector.broadcast %71 : vector<1x128xf32> to vector<8x128xf32>
    %94 = arith.mulf %92, %93 : vector<8x128xf32>
    %95 = vector.broadcast %72 : vector<1x128xf32> to vector<8x128xf32>
    %96 = arith.addf %94, %95 : vector<8x128xf32>
    %cst_46 = arith.constant 0.000000e+00 : f32
    %97 = vector.broadcast %cst_46 : f32 to vector<8x128xf32>
    %98 = arith.maximumf %96, %97 : vector<8x128xf32>
    %99 = arith.addf %30, %98 : vector<8x128xf32>
    %c4_47 = arith.constant 4 : index
    %c0_48 = arith.constant 0 : index
    %c0_49 = arith.constant 0 : index
    %100 = vector.load %arg4[%c4_47, %c0_48, %c0_49] : memref<10x128x128xbf16, #tpu.memory_space<vmem>>, vector<1x128x128xbf16>
    %101 = vector.shape_cast %100 : vector<1x128x128xbf16> to vector<128x128xbf16>
    %102 = arith.truncf %99 : vector<8x128xf32> to vector<8x128xbf16>
    %cst_50 = arith.constant dense<0.000000e+00> : vector<8x128xf32>
    %103 = tpu.matmul %102, %101, %cst_50 {dimension_numbers = #tpu.dot_dimension_numbers<[1], [0], [0], [1], [0, 0, 1, 1], [], []>} : vector<8x128xbf16>, vector<128x128xbf16>, vector<8x128xf32> -> vector<8x128xf32>
    %c10 = arith.constant 10 : index
    %c0_51 = arith.constant 0 : index
    %104 = vector.load %arg10[%c10, %c0_51] : memref<29x128xf32, #tpu.memory_space<vmem>>, vector<1x128xf32>
    %105 = vector.broadcast %104 : vector<1x128xf32> to vector<8x128xf32>
    %106 = arith.addf %103, %105 : vector<8x128xf32>
    %c11 = arith.constant 11 : index
    %c0_52 = arith.constant 0 : index
    %107 = vector.load %arg10[%c11, %c0_52] : memref<29x128xf32, #tpu.memory_space<vmem>>, vector<1x128xf32>
    %c12 = arith.constant 12 : index
    %c0_53 = arith.constant 0 : index
    %108 = vector.load %arg10[%c12, %c0_53] : memref<29x128xf32, #tpu.memory_space<vmem>>, vector<1x128xf32>
    %cst_54 = arith.constant dense<0.000000e+00> : vector<8xf32>
    %109 = vector.multi_reduction <add>, %106, %cst_54 [1] : vector<8x128xf32> to vector<8xf32>
    %110 = vector.shape_cast %109 : vector<8xf32> to vector<8x1xf32>
    %cst_55 = arith.constant 1.280000e+02 : f32
    %111 = vector.broadcast %cst_55 : f32 to vector<8x1xf32>
    %112 = arith.divf %110, %111 : vector<8x1xf32>
    %113 = arith.mulf %106, %106 : vector<8x128xf32>
    %cst_56 = arith.constant dense<0.000000e+00> : vector<8xf32>
    %114 = vector.multi_reduction <add>, %113, %cst_56 [1] : vector<8x128xf32> to vector<8xf32>
    %115 = vector.shape_cast %114 : vector<8xf32> to vector<8x1xf32>
    %cst_57 = arith.constant 1.280000e+02 : f32
    %116 = vector.broadcast %cst_57 : f32 to vector<8x1xf32>
    %117 = arith.divf %115, %116 : vector<8x1xf32>
    %118 = arith.mulf %112, %112 : vector<8x1xf32>
    %119 = arith.subf %117, %118 : vector<8x1xf32>
    %cst_58 = arith.constant 0.000000e+00 : f32
    %120 = vector.broadcast %cst_58 : f32 to vector<8x1xf32>
    %121 = arith.maximumf %119, %120 : vector<8x1xf32>
    %122 = vector.broadcast %112 : vector<8x1xf32> to vector<8x128xf32>
    %123 = arith.subf %106, %122 : vector<8x128xf32>
    %cst_59 = arith.constant 9.99999974E-6 : f32
    %124 = vector.broadcast %cst_59 : f32 to vector<8x1xf32>
    %125 = arith.addf %121, %124 : vector<8x1xf32>
    %126 = math.rsqrt %125 : vector<8x1xf32>
    %127 = vector.broadcast %126 : vector<8x1xf32> to vector<8x128xf32>
    %128 = arith.mulf %123, %127 : vector<8x128xf32>
    %129 = vector.broadcast %107 : vector<1x128xf32> to vector<8x128xf32>
    %130 = arith.mulf %128, %129 : vector<8x128xf32>
    %131 = vector.broadcast %108 : vector<1x128xf32> to vector<8x128xf32>
    %132 = arith.addf %130, %131 : vector<8x128xf32>
    %c5_60 = arith.constant 5 : index
    %c0_61 = arith.constant 0 : index
    %c0_62 = arith.constant 0 : index
    %133 = vector.load %arg4[%c5_60, %c0_61, %c0_62] : memref<10x128x128xbf16, #tpu.memory_space<vmem>>, vector<1x128x128xbf16>
    %134 = vector.shape_cast %133 : vector<1x128x128xbf16> to vector<128x128xbf16>
    %135 = arith.truncf %132 : vector<8x128xf32> to vector<8x128xbf16>
    %cst_63 = arith.constant dense<0.000000e+00> : vector<8x128xf32>
    %136 = tpu.matmul %135, %134, %cst_63 {dimension_numbers = #tpu.dot_dimension_numbers<[1], [0], [0], [1], [0, 0, 1, 1], [], []>} : vector<8x128xbf16>, vector<128x128xbf16>, vector<8x128xf32> -> vector<8x128xf32>
    %c13 = arith.constant 13 : index
    %c0_64 = arith.constant 0 : index
    %137 = vector.load %arg10[%c13, %c0_64] : memref<29x128xf32, #tpu.memory_space<vmem>>, vector<1x128xf32>
    %138 = vector.broadcast %137 : vector<1x128xf32> to vector<8x128xf32>
    %139 = arith.addf %136, %138 : vector<8x128xf32>
    %c14 = arith.constant 14 : index
    %c0_65 = arith.constant 0 : index
    %140 = vector.load %arg10[%c14, %c0_65] : memref<29x128xf32, #tpu.memory_space<vmem>>, vector<1x128xf32>
    %c15 = arith.constant 15 : index
    %c0_66 = arith.constant 0 : index
    %141 = vector.load %arg10[%c15, %c0_66] : memref<29x128xf32, #tpu.memory_space<vmem>>, vector<1x128xf32>
    %cst_67 = arith.constant dense<0.000000e+00> : vector<8xf32>
    %142 = vector.multi_reduction <add>, %139, %cst_67 [1] : vector<8x128xf32> to vector<8xf32>
    %143 = vector.shape_cast %142 : vector<8xf32> to vector<8x1xf32>
    %cst_68 = arith.constant 1.280000e+02 : f32
    %144 = vector.broadcast %cst_68 : f32 to vector<8x1xf32>
    %145 = arith.divf %143, %144 : vector<8x1xf32>
    %146 = arith.mulf %139, %139 : vector<8x128xf32>
    %cst_69 = arith.constant dense<0.000000e+00> : vector<8xf32>
    %147 = vector.multi_reduction <add>, %146, %cst_69 [1] : vector<8x128xf32> to vector<8xf32>
    %148 = vector.shape_cast %147 : vector<8xf32> to vector<8x1xf32>
    %cst_70 = arith.constant 1.280000e+02 : f32
    %149 = vector.broadcast %cst_70 : f32 to vector<8x1xf32>
    %150 = arith.divf %148, %149 : vector<8x1xf32>
    %151 = arith.mulf %145, %145 : vector<8x1xf32>
    %152 = arith.subf %150, %151 : vector<8x1xf32>
    %cst_71 = arith.constant 0.000000e+00 : f32
    %153 = vector.broadcast %cst_71 : f32 to vector<8x1xf32>
    %154 = arith.maximumf %152, %153 : vector<8x1xf32>
    %155 = vector.broadcast %145 : vector<8x1xf32> to vector<8x128xf32>
    %156 = arith.subf %139, %155 : vector<8x128xf32>
    %cst_72 = arith.constant 9.99999974E-6 : f32
    %157 = vector.broadcast %cst_72 : f32 to vector<8x1xf32>
    %158 = arith.addf %154, %157 : vector<8x1xf32>
    %159 = math.rsqrt %158 : vector<8x1xf32>
    %160 = vector.broadcast %159 : vector<8x1xf32> to vector<8x128xf32>
    %161 = arith.mulf %156, %160 : vector<8x128xf32>
    %162 = vector.broadcast %140 : vector<1x128xf32> to vector<8x128xf32>
    %163 = arith.mulf %161, %162 : vector<8x128xf32>
    %164 = vector.broadcast %141 : vector<1x128xf32> to vector<8x128xf32>
    %165 = arith.addf %163, %164 : vector<8x128xf32>
    %cst_73 = arith.constant 0.000000e+00 : f32
    %166 = vector.broadcast %cst_73 : f32 to vector<8x128xf32>
    %167 = arith.maximumf %165, %166 : vector<8x128xf32>
    %168 = arith.addf %99, %167 : vector<8x128xf32>
    %c0_74 = arith.constant 0 : index
    %c0_75 = arith.constant 0 : index
    %169 = vector.load %arg6[%c0_74, %c0_75] : memref<128x256xbf16, #tpu.memory_space<vmem>>, vector<128x256xbf16>
    %170 = arith.truncf %168 : vector<8x128xf32> to vector<8x128xbf16>
    %cst_76 = arith.constant dense<0.000000e+00> : vector<8x256xf32>
    %171 = tpu.matmul %170, %169, %cst_76 {dimension_numbers = #tpu.dot_dimension_numbers<[1], [0], [0], [1], [0, 0, 1, 1], [], []>} : vector<8x128xbf16>, vector<128x256xbf16>, vector<8x256xf32> -> vector<8x256xf32>
    %c24 = arith.constant 24 : index
    %c0_77 = arith.constant 0 : index
    %172 = vector.load %arg11[%c24, %c0_77] : memref<26x256xf32, #tpu.memory_space<vmem>>, vector<1x256xf32>
    %173 = vector.broadcast %172 : vector<1x256xf32> to vector<8x256xf32>
    %174 = arith.addf %171, %173 : vector<8x256xf32>
    %cst_78 = arith.constant 0.000000e+00 : f32
    %175 = vector.broadcast %cst_78 : f32 to vector<8x256xf32>
    %176 = arith.maximumf %174, %175 : vector<8x256xf32>
    %c0_79 = arith.constant 0 : index
    %c0_80 = arith.constant 0 : index
    %c0_81 = arith.constant 0 : index
    %177 = vector.load %arg5[%c0_79, %c0_80, %c0_81] : memref<8x256x256xbf16, #tpu.memory_space<vmem>>, vector<1x256x256xbf16>
    %178 = vector.shape_cast %177 : vector<1x256x256xbf16> to vector<256x256xbf16>
    %179 = arith.truncf %176 : vector<8x256xf32> to vector<8x256xbf16>
    %cst_82 = arith.constant dense<0.000000e+00> : vector<8x256xf32>
    %180 = tpu.matmul %179, %178, %cst_82 {dimension_numbers = #tpu.dot_dimension_numbers<[1], [0], [0], [1], [0, 0, 1, 1], [], []>} : vector<8x256xbf16>, vector<256x256xbf16>, vector<8x256xf32> -> vector<8x256xf32>
    %c0_83 = arith.constant 0 : index
    %c0_84 = arith.constant 0 : index
    %181 = vector.load %arg11[%c0_83, %c0_84] : memref<26x256xf32, #tpu.memory_space<vmem>>, vector<1x256xf32>
    %182 = vector.broadcast %181 : vector<1x256xf32> to vector<8x256xf32>
    %183 = arith.addf %180, %182 : vector<8x256xf32>
    %c1_85 = arith.constant 1 : index
    %c0_86 = arith.constant 0 : index
    %184 = vector.load %arg11[%c1_85, %c0_86] : memref<26x256xf32, #tpu.memory_space<vmem>>, vector<1x256xf32>
    %c2_87 = arith.constant 2 : index
    %c0_88 = arith.constant 0 : index
    %185 = vector.load %arg11[%c2_87, %c0_88] : memref<26x256xf32, #tpu.memory_space<vmem>>, vector<1x256xf32>
    %cst_89 = arith.constant dense<0.000000e+00> : vector<8xf32>
    %186 = vector.multi_reduction <add>, %183, %cst_89 [1] : vector<8x256xf32> to vector<8xf32>
    %187 = vector.shape_cast %186 : vector<8xf32> to vector<8x1xf32>
    %cst_90 = arith.constant 2.560000e+02 : f32
    %188 = vector.broadcast %cst_90 : f32 to vector<8x1xf32>
    %189 = arith.divf %187, %188 : vector<8x1xf32>
    %190 = arith.mulf %183, %183 : vector<8x256xf32>
    %cst_91 = arith.constant dense<0.000000e+00> : vector<8xf32>
    %191 = vector.multi_reduction <add>, %190, %cst_91 [1] : vector<8x256xf32> to vector<8xf32>
    %192 = vector.shape_cast %191 : vector<8xf32> to vector<8x1xf32>
    %cst_92 = arith.constant 2.560000e+02 : f32
    %193 = vector.broadcast %cst_92 : f32 to vector<8x1xf32>
    %194 = arith.divf %192, %193 : vector<8x1xf32>
    %195 = arith.mulf %189, %189 : vector<8x1xf32>
    %196 = arith.subf %194, %195 : vector<8x1xf32>
    %cst_93 = arith.constant 0.000000e+00 : f32
    %197 = vector.broadcast %cst_93 : f32 to vector<8x1xf32>
    %198 = arith.maximumf %196, %197 : vector<8x1xf32>
    %199 = vector.broadcast %189 : vector<8x1xf32> to vector<8x256xf32>
    %200 = arith.subf %183, %199 : vector<8x256xf32>
    %cst_94 = arith.constant 9.99999974E-6 : f32
    %201 = vector.broadcast %cst_94 : f32 to vector<8x1xf32>
    %202 = arith.addf %198, %201 : vector<8x1xf32>
    %203 = math.rsqrt %202 : vector<8x1xf32>
    %204 = vector.broadcast %203 : vector<8x1xf32> to vector<8x256xf32>
    %205 = arith.mulf %200, %204 : vector<8x256xf32>
    %206 = vector.broadcast %184 : vector<1x256xf32> to vector<8x256xf32>
    %207 = arith.mulf %205, %206 : vector<8x256xf32>
    %208 = vector.broadcast %185 : vector<1x256xf32> to vector<8x256xf32>
    %209 = arith.addf %207, %208 : vector<8x256xf32>
    %c1_95 = arith.constant 1 : index
    %c0_96 = arith.constant 0 : index
    %c0_97 = arith.constant 0 : index
    %210 = vector.load %arg5[%c1_95, %c0_96, %c0_97] : memref<8x256x256xbf16, #tpu.memory_space<vmem>>, vector<1x256x256xbf16>
    %211 = vector.shape_cast %210 : vector<1x256x256xbf16> to vector<256x256xbf16>
    %212 = arith.truncf %209 : vector<8x256xf32> to vector<8x256xbf16>
    %cst_98 = arith.constant dense<0.000000e+00> : vector<8x256xf32>
    %213 = tpu.matmul %212, %211, %cst_98 {dimension_numbers = #tpu.dot_dimension_numbers<[1], [0], [0], [1], [0, 0, 1, 1], [], []>} : vector<8x256xbf16>, vector<256x256xbf16>, vector<8x256xf32> -> vector<8x256xf32>
    %c3_99 = arith.constant 3 : index
    %c0_100 = arith.constant 0 : index
    %214 = vector.load %arg11[%c3_99, %c0_100] : memref<26x256xf32, #tpu.memory_space<vmem>>, vector<1x256xf32>
    %215 = vector.broadcast %214 : vector<1x256xf32> to vector<8x256xf32>
    %216 = arith.addf %213, %215 : vector<8x256xf32>
    %c4_101 = arith.constant 4 : index
    %c0_102 = arith.constant 0 : index
    %217 = vector.load %arg11[%c4_101, %c0_102] : memref<26x256xf32, #tpu.memory_space<vmem>>, vector<1x256xf32>
    %c5_103 = arith.constant 5 : index
    %c0_104 = arith.constant 0 : index
    %218 = vector.load %arg11[%c5_103, %c0_104] : memref<26x256xf32, #tpu.memory_space<vmem>>, vector<1x256xf32>
    %cst_105 = arith.constant dense<0.000000e+00> : vector<8xf32>
    %219 = vector.multi_reduction <add>, %216, %cst_105 [1] : vector<8x256xf32> to vector<8xf32>
    %220 = vector.shape_cast %219 : vector<8xf32> to vector<8x1xf32>
    %cst_106 = arith.constant 2.560000e+02 : f32
    %221 = vector.broadcast %cst_106 : f32 to vector<8x1xf32>
    %222 = arith.divf %220, %221 : vector<8x1xf32>
    %223 = arith.mulf %216, %216 : vector<8x256xf32>
    %cst_107 = arith.constant dense<0.000000e+00> : vector<8xf32>
    %224 = vector.multi_reduction <add>, %223, %cst_107 [1] : vector<8x256xf32> to vector<8xf32>
    %225 = vector.shape_cast %224 : vector<8xf32> to vector<8x1xf32>
    %cst_108 = arith.constant 2.560000e+02 : f32
    %226 = vector.broadcast %cst_108 : f32 to vector<8x1xf32>
    %227 = arith.divf %225, %226 : vector<8x1xf32>
    %228 = arith.mulf %222, %222 : vector<8x1xf32>
    %229 = arith.subf %227, %228 : vector<8x1xf32>
    %cst_109 = arith.constant 0.000000e+00 : f32
    %230 = vector.broadcast %cst_109 : f32 to vector<8x1xf32>
    %231 = arith.maximumf %229, %230 : vector<8x1xf32>
    %232 = vector.broadcast %222 : vector<8x1xf32> to vector<8x256xf32>
    %233 = arith.subf %216, %232 : vector<8x256xf32>
    %cst_110 = arith.constant 9.99999974E-6 : f32
    %234 = vector.broadcast %cst_110 : f32 to vector<8x1xf32>
    %235 = arith.addf %231, %234 : vector<8x1xf32>
    %236 = math.rsqrt %235 : vector<8x1xf32>
    %237 = vector.broadcast %236 : vector<8x1xf32> to vector<8x256xf32>
    %238 = arith.mulf %233, %237 : vector<8x256xf32>
    %239 = vector.broadcast %217 : vector<1x256xf32> to vector<8x256xf32>
    %240 = arith.mulf %238, %239 : vector<8x256xf32>
    %241 = vector.broadcast %218 : vector<1x256xf32> to vector<8x256xf32>
    %242 = arith.addf %240, %241 : vector<8x256xf32>
    %cst_111 = arith.constant 0.000000e+00 : f32
    %243 = vector.broadcast %cst_111 : f32 to vector<8x256xf32>
    %244 = arith.maximumf %242, %243 : vector<8x256xf32>
    %245 = arith.addf %176, %244 : vector<8x256xf32>
    %c2_112 = arith.constant 2 : index
    %c0_113 = arith.constant 0 : index
    %c0_114 = arith.constant 0 : index
    %246 = vector.load %arg5[%c2_112, %c0_113, %c0_114] : memref<8x256x256xbf16, #tpu.memory_space<vmem>>, vector<1x256x256xbf16>
    %247 = vector.shape_cast %246 : vector<1x256x256xbf16> to vector<256x256xbf16>
    %248 = arith.truncf %245 : vector<8x256xf32> to vector<8x256xbf16>
    %cst_115 = arith.constant dense<0.000000e+00> : vector<8x256xf32>
    %249 = tpu.matmul %248, %247, %cst_115 {dimension_numbers = #tpu.dot_dimension_numbers<[1], [0], [0], [1], [0, 0, 1, 1], [], []>} : vector<8x256xbf16>, vector<256x256xbf16>, vector<8x256xf32> -> vector<8x256xf32>
    %c6_116 = arith.constant 6 : index
    %c0_117 = arith.constant 0 : index
    %250 = vector.load %arg11[%c6_116, %c0_117] : memref<26x256xf32, #tpu.memory_space<vmem>>, vector<1x256xf32>
    %251 = vector.broadcast %250 : vector<1x256xf32> to vector<8x256xf32>
    %252 = arith.addf %249, %251 : vector<8x256xf32>
    %c7_118 = arith.constant 7 : index
    %c0_119 = arith.constant 0 : index
    %253 = vector.load %arg11[%c7_118, %c0_119] : memref<26x256xf32, #tpu.memory_space<vmem>>, vector<1x256xf32>
    %c8_120 = arith.constant 8 : index
    %c0_121 = arith.constant 0 : index
    %254 = vector.load %arg11[%c8_120, %c0_121] : memref<26x256xf32, #tpu.memory_space<vmem>>, vector<1x256xf32>
    %cst_122 = arith.constant dense<0.000000e+00> : vector<8xf32>
    %255 = vector.multi_reduction <add>, %252, %cst_122 [1] : vector<8x256xf32> to vector<8xf32>
    %256 = vector.shape_cast %255 : vector<8xf32> to vector<8x1xf32>
    %cst_123 = arith.constant 2.560000e+02 : f32
    %257 = vector.broadcast %cst_123 : f32 to vector<8x1xf32>
    %258 = arith.divf %256, %257 : vector<8x1xf32>
    %259 = arith.mulf %252, %252 : vector<8x256xf32>
    %cst_124 = arith.constant dense<0.000000e+00> : vector<8xf32>
    %260 = vector.multi_reduction <add>, %259, %cst_124 [1] : vector<8x256xf32> to vector<8xf32>
    %261 = vector.shape_cast %260 : vector<8xf32> to vector<8x1xf32>
    %cst_125 = arith.constant 2.560000e+02 : f32
    %262 = vector.broadcast %cst_125 : f32 to vector<8x1xf32>
    %263 = arith.divf %261, %262 : vector<8x1xf32>
    %264 = arith.mulf %258, %258 : vector<8x1xf32>
    %265 = arith.subf %263, %264 : vector<8x1xf32>
    %cst_126 = arith.constant 0.000000e+00 : f32
    %266 = vector.broadcast %cst_126 : f32 to vector<8x1xf32>
    %267 = arith.maximumf %265, %266 : vector<8x1xf32>
    %268 = vector.broadcast %258 : vector<8x1xf32> to vector<8x256xf32>
    %269 = arith.subf %252, %268 : vector<8x256xf32>
    %cst_127 = arith.constant 9.99999974E-6 : f32
    %270 = vector.broadcast %cst_127 : f32 to vector<8x1xf32>
    %271 = arith.addf %267, %270 : vector<8x1xf32>
    %272 = math.rsqrt %271 : vector<8x1xf32>
    %273 = vector.broadcast %272 : vector<8x1xf32> to vector<8x256xf32>
    %274 = arith.mulf %269, %273 : vector<8x256xf32>
    %275 = vector.broadcast %253 : vector<1x256xf32> to vector<8x256xf32>
    %276 = arith.mulf %274, %275 : vector<8x256xf32>
    %277 = vector.broadcast %254 : vector<1x256xf32> to vector<8x256xf32>
    %278 = arith.addf %276, %277 : vector<8x256xf32>
    %c3_128 = arith.constant 3 : index
    %c0_129 = arith.constant 0 : index
    %c0_130 = arith.constant 0 : index
    %279 = vector.load %arg5[%c3_128, %c0_129, %c0_130] : memref<8x256x256xbf16, #tpu.memory_space<vmem>>, vector<1x256x256xbf16>
    %280 = vector.shape_cast %279 : vector<1x256x256xbf16> to vector<256x256xbf16>
    %281 = arith.truncf %278 : vector<8x256xf32> to vector<8x256xbf16>
    %cst_131 = arith.constant dense<0.000000e+00> : vector<8x256xf32>
    %282 = tpu.matmul %281, %280, %cst_131 {dimension_numbers = #tpu.dot_dimension_numbers<[1], [0], [0], [1], [0, 0, 1, 1], [], []>} : vector<8x256xbf16>, vector<256x256xbf16>, vector<8x256xf32> -> vector<8x256xf32>
    %c9_132 = arith.constant 9 : index
    %c0_133 = arith.constant 0 : index
    %283 = vector.load %arg11[%c9_132, %c0_133] : memref<26x256xf32, #tpu.memory_space<vmem>>, vector<1x256xf32>
    %284 = vector.broadcast %283 : vector<1x256xf32> to vector<8x256xf32>
    %285 = arith.addf %282, %284 : vector<8x256xf32>
    %c10_134 = arith.constant 10 : index
    %c0_135 = arith.constant 0 : index
    %286 = vector.load %arg11[%c10_134, %c0_135] : memref<26x256xf32, #tpu.memory_space<vmem>>, vector<1x256xf32>
    %c11_136 = arith.constant 11 : index
    %c0_137 = arith.constant 0 : index
    %287 = vector.load %arg11[%c11_136, %c0_137] : memref<26x256xf32, #tpu.memory_space<vmem>>, vector<1x256xf32>
    %cst_138 = arith.constant dense<0.000000e+00> : vector<8xf32>
    %288 = vector.multi_reduction <add>, %285, %cst_138 [1] : vector<8x256xf32> to vector<8xf32>
    %289 = vector.shape_cast %288 : vector<8xf32> to vector<8x1xf32>
    %cst_139 = arith.constant 2.560000e+02 : f32
    %290 = vector.broadcast %cst_139 : f32 to vector<8x1xf32>
    %291 = arith.divf %289, %290 : vector<8x1xf32>
    %292 = arith.mulf %285, %285 : vector<8x256xf32>
    %cst_140 = arith.constant dense<0.000000e+00> : vector<8xf32>
    %293 = vector.multi_reduction <add>, %292, %cst_140 [1] : vector<8x256xf32> to vector<8xf32>
    %294 = vector.shape_cast %293 : vector<8xf32> to vector<8x1xf32>
    %cst_141 = arith.constant 2.560000e+02 : f32
    %295 = vector.broadcast %cst_141 : f32 to vector<8x1xf32>
    %296 = arith.divf %294, %295 : vector<8x1xf32>
    %297 = arith.mulf %291, %291 : vector<8x1xf32>
    %298 = arith.subf %296, %297 : vector<8x1xf32>
    %cst_142 = arith.constant 0.000000e+00 : f32
    %299 = vector.broadcast %cst_142 : f32 to vector<8x1xf32>
    %300 = arith.maximumf %298, %299 : vector<8x1xf32>
    %301 = vector.broadcast %291 : vector<8x1xf32> to vector<8x256xf32>
    %302 = arith.subf %285, %301 : vector<8x256xf32>
    %cst_143 = arith.constant 9.99999974E-6 : f32
    %303 = vector.broadcast %cst_143 : f32 to vector<8x1xf32>
    %304 = arith.addf %300, %303 : vector<8x1xf32>
    %305 = math.rsqrt %304 : vector<8x1xf32>
    %306 = vector.broadcast %305 : vector<8x1xf32> to vector<8x256xf32>
    %307 = arith.mulf %302, %306 : vector<8x256xf32>
    %308 = vector.broadcast %286 : vector<1x256xf32> to vector<8x256xf32>
    %309 = arith.mulf %307, %308 : vector<8x256xf32>
    %310 = vector.broadcast %287 : vector<1x256xf32> to vector<8x256xf32>
    %311 = arith.addf %309, %310 : vector<8x256xf32>
    %cst_144 = arith.constant 0.000000e+00 : f32
    %312 = vector.broadcast %cst_144 : f32 to vector<8x256xf32>
    %313 = arith.maximumf %311, %312 : vector<8x256xf32>
    %314 = arith.addf %245, %313 : vector<8x256xf32>
    %c0_145 = arith.constant 0 : index
    %c0_146 = arith.constant 0 : index
    %315 = vector.load %arg7[%c0_145, %c0_146] : memref<256x256xbf16, #tpu.memory_space<vmem>>, vector<256x256xbf16>
    %316 = arith.truncf %314 : vector<8x256xf32> to vector<8x256xbf16>
    %cst_147 = arith.constant dense<0.000000e+00> : vector<8x256xf32>
    %317 = tpu.matmul %316, %315, %cst_147 {dimension_numbers = #tpu.dot_dimension_numbers<[1], [0], [0], [1], [0, 0, 1, 1], [], []>} : vector<8x256xbf16>, vector<256x256xbf16>, vector<8x256xf32> -> vector<8x256xf32>
    %c25 = arith.constant 25 : index
    %c0_148 = arith.constant 0 : index
    %318 = vector.load %arg11[%c25, %c0_148] : memref<26x256xf32, #tpu.memory_space<vmem>>, vector<1x256xf32>
    %319 = vector.broadcast %318 : vector<1x256xf32> to vector<8x256xf32>
    %320 = arith.addf %317, %319 : vector<8x256xf32>
    %cst_149 = arith.constant 0.000000e+00 : f32
    %321 = vector.broadcast %cst_149 : f32 to vector<8x256xf32>
    %322 = arith.maximumf %320, %321 : vector<8x256xf32>
    %c4_150 = arith.constant 4 : index
    %c0_151 = arith.constant 0 : index
    %c0_152 = arith.constant 0 : index
    %323 = vector.load %arg5[%c4_150, %c0_151, %c0_152] : memref<8x256x256xbf16, #tpu.memory_space<vmem>>, vector<1x256x256xbf16>
    %324 = vector.shape_cast %323 : vector<1x256x256xbf16> to vector<256x256xbf16>
    %325 = arith.truncf %322 : vector<8x256xf32> to vector<8x256xbf16>
    %cst_153 = arith.constant dense<0.000000e+00> : vector<8x256xf32>
    %326 = tpu.matmul %325, %324, %cst_153 {dimension_numbers = #tpu.dot_dimension_numbers<[1], [0], [0], [1], [0, 0, 1, 1], [], []>} : vector<8x256xbf16>, vector<256x256xbf16>, vector<8x256xf32> -> vector<8x256xf32>
    %c12_154 = arith.constant 12 : index
    %c0_155 = arith.constant 0 : index
    %327 = vector.load %arg11[%c12_154, %c0_155] : memref<26x256xf32, #tpu.memory_space<vmem>>, vector<1x256xf32>
    %328 = vector.broadcast %327 : vector<1x256xf32> to vector<8x256xf32>
    %329 = arith.addf %326, %328 : vector<8x256xf32>
    %c13_156 = arith.constant 13 : index
    %c0_157 = arith.constant 0 : index
    %330 = vector.load %arg11[%c13_156, %c0_157] : memref<26x256xf32, #tpu.memory_space<vmem>>, vector<1x256xf32>
    %c14_158 = arith.constant 14 : index
    %c0_159 = arith.constant 0 : index
    %331 = vector.load %arg11[%c14_158, %c0_159] : memref<26x256xf32, #tpu.memory_space<vmem>>, vector<1x256xf32>
    %cst_160 = arith.constant dense<0.000000e+00> : vector<8xf32>
    %332 = vector.multi_reduction <add>, %329, %cst_160 [1] : vector<8x256xf32> to vector<8xf32>
    %333 = vector.shape_cast %332 : vector<8xf32> to vector<8x1xf32>
    %cst_161 = arith.constant 2.560000e+02 : f32
    %334 = vector.broadcast %cst_161 : f32 to vector<8x1xf32>
    %335 = arith.divf %333, %334 : vector<8x1xf32>
    %336 = arith.mulf %329, %329 : vector<8x256xf32>
    %cst_162 = arith.constant dense<0.000000e+00> : vector<8xf32>
    %337 = vector.multi_reduction <add>, %336, %cst_162 [1] : vector<8x256xf32> to vector<8xf32>
    %338 = vector.shape_cast %337 : vector<8xf32> to vector<8x1xf32>
    %cst_163 = arith.constant 2.560000e+02 : f32
    %339 = vector.broadcast %cst_163 : f32 to vector<8x1xf32>
    %340 = arith.divf %338, %339 : vector<8x1xf32>
    %341 = arith.mulf %335, %335 : vector<8x1xf32>
    %342 = arith.subf %340, %341 : vector<8x1xf32>
    %cst_164 = arith.constant 0.000000e+00 : f32
    %343 = vector.broadcast %cst_164 : f32 to vector<8x1xf32>
    %344 = arith.maximumf %342, %343 : vector<8x1xf32>
    %345 = vector.broadcast %335 : vector<8x1xf32> to vector<8x256xf32>
    %346 = arith.subf %329, %345 : vector<8x256xf32>
    %cst_165 = arith.constant 9.99999974E-6 : f32
    %347 = vector.broadcast %cst_165 : f32 to vector<8x1xf32>
    %348 = arith.addf %344, %347 : vector<8x1xf32>
    %349 = math.rsqrt %348 : vector<8x1xf32>
    %350 = vector.broadcast %349 : vector<8x1xf32> to vector<8x256xf32>
    %351 = arith.mulf %346, %350 : vector<8x256xf32>
    %352 = vector.broadcast %330 : vector<1x256xf32> to vector<8x256xf32>
    %353 = arith.mulf %351, %352 : vector<8x256xf32>
    %354 = vector.broadcast %331 : vector<1x256xf32> to vector<8x256xf32>
    %355 = arith.addf %353, %354 : vector<8x256xf32>
    %c5_166 = arith.constant 5 : index
    %c0_167 = arith.constant 0 : index
    %c0_168 = arith.constant 0 : index
    %356 = vector.load %arg5[%c5_166, %c0_167, %c0_168] : memref<8x256x256xbf16, #tpu.memory_space<vmem>>, vector<1x256x256xbf16>
    %357 = vector.shape_cast %356 : vector<1x256x256xbf16> to vector<256x256xbf16>
    %358 = arith.truncf %355 : vector<8x256xf32> to vector<8x256xbf16>
    %cst_169 = arith.constant dense<0.000000e+00> : vector<8x256xf32>
    %359 = tpu.matmul %358, %357, %cst_169 {dimension_numbers = #tpu.dot_dimension_numbers<[1], [0], [0], [1], [0, 0, 1, 1], [], []>} : vector<8x256xbf16>, vector<256x256xbf16>, vector<8x256xf32> -> vector<8x256xf32>
    %c15_170 = arith.constant 15 : index
    %c0_171 = arith.constant 0 : index
    %360 = vector.load %arg11[%c15_170, %c0_171] : memref<26x256xf32, #tpu.memory_space<vmem>>, vector<1x256xf32>
    %361 = vector.broadcast %360 : vector<1x256xf32> to vector<8x256xf32>
    %362 = arith.addf %359, %361 : vector<8x256xf32>
    %c16 = arith.constant 16 : index
    %c0_172 = arith.constant 0 : index
    %363 = vector.load %arg11[%c16, %c0_172] : memref<26x256xf32, #tpu.memory_space<vmem>>, vector<1x256xf32>
    %c17 = arith.constant 17 : index
    %c0_173 = arith.constant 0 : index
    %364 = vector.load %arg11[%c17, %c0_173] : memref<26x256xf32, #tpu.memory_space<vmem>>, vector<1x256xf32>
    %cst_174 = arith.constant dense<0.000000e+00> : vector<8xf32>
    %365 = vector.multi_reduction <add>, %362, %cst_174 [1] : vector<8x256xf32> to vector<8xf32>
    %366 = vector.shape_cast %365 : vector<8xf32> to vector<8x1xf32>
    %cst_175 = arith.constant 2.560000e+02 : f32
    %367 = vector.broadcast %cst_175 : f32 to vector<8x1xf32>
    %368 = arith.divf %366, %367 : vector<8x1xf32>
    %369 = arith.mulf %362, %362 : vector<8x256xf32>
    %cst_176 = arith.constant dense<0.000000e+00> : vector<8xf32>
    %370 = vector.multi_reduction <add>, %369, %cst_176 [1] : vector<8x256xf32> to vector<8xf32>
    %371 = vector.shape_cast %370 : vector<8xf32> to vector<8x1xf32>
    %cst_177 = arith.constant 2.560000e+02 : f32
    %372 = vector.broadcast %cst_177 : f32 to vector<8x1xf32>
    %373 = arith.divf %371, %372 : vector<8x1xf32>
    %374 = arith.mulf %368, %368 : vector<8x1xf32>
    %375 = arith.subf %373, %374 : vector<8x1xf32>
    %cst_178 = arith.constant 0.000000e+00 : f32
    %376 = vector.broadcast %cst_178 : f32 to vector<8x1xf32>
    %377 = arith.maximumf %375, %376 : vector<8x1xf32>
    %378 = vector.broadcast %368 : vector<8x1xf32> to vector<8x256xf32>
    %379 = arith.subf %362, %378 : vector<8x256xf32>
    %cst_179 = arith.constant 9.99999974E-6 : f32
    %380 = vector.broadcast %cst_179 : f32 to vector<8x1xf32>
    %381 = arith.addf %377, %380 : vector<8x1xf32>
    %382 = math.rsqrt %381 : vector<8x1xf32>
    %383 = vector.broadcast %382 : vector<8x1xf32> to vector<8x256xf32>
    %384 = arith.mulf %379, %383 : vector<8x256xf32>
    %385 = vector.broadcast %363 : vector<1x256xf32> to vector<8x256xf32>
    %386 = arith.mulf %384, %385 : vector<8x256xf32>
    %387 = vector.broadcast %364 : vector<1x256xf32> to vector<8x256xf32>
    %388 = arith.addf %386, %387 : vector<8x256xf32>
    %cst_180 = arith.constant 0.000000e+00 : f32
    %389 = vector.broadcast %cst_180 : f32 to vector<8x256xf32>
    %390 = arith.maximumf %388, %389 : vector<8x256xf32>
    %391 = arith.addf %322, %390 : vector<8x256xf32>
    %c6_181 = arith.constant 6 : index
    %c0_182 = arith.constant 0 : index
    %c0_183 = arith.constant 0 : index
    %392 = vector.load %arg5[%c6_181, %c0_182, %c0_183] : memref<8x256x256xbf16, #tpu.memory_space<vmem>>, vector<1x256x256xbf16>
    %393 = vector.shape_cast %392 : vector<1x256x256xbf16> to vector<256x256xbf16>
    %394 = arith.truncf %391 : vector<8x256xf32> to vector<8x256xbf16>
    %cst_184 = arith.constant dense<0.000000e+00> : vector<8x256xf32>
    %395 = tpu.matmul %394, %393, %cst_184 {dimension_numbers = #tpu.dot_dimension_numbers<[1], [0], [0], [1], [0, 0, 1, 1], [], []>} : vector<8x256xbf16>, vector<256x256xbf16>, vector<8x256xf32> -> vector<8x256xf32>
    %c18 = arith.constant 18 : index
    %c0_185 = arith.constant 0 : index
    %396 = vector.load %arg11[%c18, %c0_185] : memref<26x256xf32, #tpu.memory_space<vmem>>, vector<1x256xf32>
    %397 = vector.broadcast %396 : vector<1x256xf32> to vector<8x256xf32>
    %398 = arith.addf %395, %397 : vector<8x256xf32>
    %c19 = arith.constant 19 : index
    %c0_186 = arith.constant 0 : index
    %399 = vector.load %arg11[%c19, %c0_186] : memref<26x256xf32, #tpu.memory_space<vmem>>, vector<1x256xf32>
    %c20 = arith.constant 20 : index
    %c0_187 = arith.constant 0 : index
    %400 = vector.load %arg11[%c20, %c0_187] : memref<26x256xf32, #tpu.memory_space<vmem>>, vector<1x256xf32>
    %cst_188 = arith.constant dense<0.000000e+00> : vector<8xf32>
    %401 = vector.multi_reduction <add>, %398, %cst_188 [1] : vector<8x256xf32> to vector<8xf32>
    %402 = vector.shape_cast %401 : vector<8xf32> to vector<8x1xf32>
    %cst_189 = arith.constant 2.560000e+02 : f32
    %403 = vector.broadcast %cst_189 : f32 to vector<8x1xf32>
    %404 = arith.divf %402, %403 : vector<8x1xf32>
    %405 = arith.mulf %398, %398 : vector<8x256xf32>
    %cst_190 = arith.constant dense<0.000000e+00> : vector<8xf32>
    %406 = vector.multi_reduction <add>, %405, %cst_190 [1] : vector<8x256xf32> to vector<8xf32>
    %407 = vector.shape_cast %406 : vector<8xf32> to vector<8x1xf32>
    %cst_191 = arith.constant 2.560000e+02 : f32
    %408 = vector.broadcast %cst_191 : f32 to vector<8x1xf32>
    %409 = arith.divf %407, %408 : vector<8x1xf32>
    %410 = arith.mulf %404, %404 : vector<8x1xf32>
    %411 = arith.subf %409, %410 : vector<8x1xf32>
    %cst_192 = arith.constant 0.000000e+00 : f32
    %412 = vector.broadcast %cst_192 : f32 to vector<8x1xf32>
    %413 = arith.maximumf %411, %412 : vector<8x1xf32>
    %414 = vector.broadcast %404 : vector<8x1xf32> to vector<8x256xf32>
    %415 = arith.subf %398, %414 : vector<8x256xf32>
    %cst_193 = arith.constant 9.99999974E-6 : f32
    %416 = vector.broadcast %cst_193 : f32 to vector<8x1xf32>
    %417 = arith.addf %413, %416 : vector<8x1xf32>
    %418 = math.rsqrt %417 : vector<8x1xf32>
    %419 = vector.broadcast %418 : vector<8x1xf32> to vector<8x256xf32>
    %420 = arith.mulf %415, %419 : vector<8x256xf32>
    %421 = vector.broadcast %399 : vector<1x256xf32> to vector<8x256xf32>
    %422 = arith.mulf %420, %421 : vector<8x256xf32>
    %423 = vector.broadcast %400 : vector<1x256xf32> to vector<8x256xf32>
    %424 = arith.addf %422, %423 : vector<8x256xf32>
    %c7_194 = arith.constant 7 : index
    %c0_195 = arith.constant 0 : index
    %c0_196 = arith.constant 0 : index
    %425 = vector.load %arg5[%c7_194, %c0_195, %c0_196] : memref<8x256x256xbf16, #tpu.memory_space<vmem>>, vector<1x256x256xbf16>
    %426 = vector.shape_cast %425 : vector<1x256x256xbf16> to vector<256x256xbf16>
    %427 = arith.truncf %424 : vector<8x256xf32> to vector<8x256xbf16>
    %cst_197 = arith.constant dense<0.000000e+00> : vector<8x256xf32>
    %428 = tpu.matmul %427, %426, %cst_197 {dimension_numbers = #tpu.dot_dimension_numbers<[1], [0], [0], [1], [0, 0, 1, 1], [], []>} : vector<8x256xbf16>, vector<256x256xbf16>, vector<8x256xf32> -> vector<8x256xf32>
    %c21 = arith.constant 21 : index
    %c0_198 = arith.constant 0 : index
    %429 = vector.load %arg11[%c21, %c0_198] : memref<26x256xf32, #tpu.memory_space<vmem>>, vector<1x256xf32>
    %430 = vector.broadcast %429 : vector<1x256xf32> to vector<8x256xf32>
    %431 = arith.addf %428, %430 : vector<8x256xf32>
    %c22 = arith.constant 22 : index
    %c0_199 = arith.constant 0 : index
    %432 = vector.load %arg11[%c22, %c0_199] : memref<26x256xf32, #tpu.memory_space<vmem>>, vector<1x256xf32>
    %c23 = arith.constant 23 : index
    %c0_200 = arith.constant 0 : index
    %433 = vector.load %arg11[%c23, %c0_200] : memref<26x256xf32, #tpu.memory_space<vmem>>, vector<1x256xf32>
    %cst_201 = arith.constant dense<0.000000e+00> : vector<8xf32>
    %434 = vector.multi_reduction <add>, %431, %cst_201 [1] : vector<8x256xf32> to vector<8xf32>
    %435 = vector.shape_cast %434 : vector<8xf32> to vector<8x1xf32>
    %cst_202 = arith.constant 2.560000e+02 : f32
    %436 = vector.broadcast %cst_202 : f32 to vector<8x1xf32>
    %437 = arith.divf %435, %436 : vector<8x1xf32>
    %438 = arith.mulf %431, %431 : vector<8x256xf32>
    %cst_203 = arith.constant dense<0.000000e+00> : vector<8xf32>
    %439 = vector.multi_reduction <add>, %438, %cst_203 [1] : vector<8x256xf32> to vector<8xf32>
    %440 = vector.shape_cast %439 : vector<8xf32> to vector<8x1xf32>
    %cst_204 = arith.constant 2.560000e+02 : f32
    %441 = vector.broadcast %cst_204 : f32 to vector<8x1xf32>
    %442 = arith.divf %440, %441 : vector<8x1xf32>
    %443 = arith.mulf %437, %437 : vector<8x1xf32>
    %444 = arith.subf %442, %443 : vector<8x1xf32>
    %cst_205 = arith.constant 0.000000e+00 : f32
    %445 = vector.broadcast %cst_205 : f32 to vector<8x1xf32>
    %446 = arith.maximumf %444, %445 : vector<8x1xf32>
    %447 = vector.broadcast %437 : vector<8x1xf32> to vector<8x256xf32>
    %448 = arith.subf %431, %447 : vector<8x256xf32>
    %cst_206 = arith.constant 9.99999974E-6 : f32
    %449 = vector.broadcast %cst_206 : f32 to vector<8x1xf32>
    %450 = arith.addf %446, %449 : vector<8x1xf32>
    %451 = math.rsqrt %450 : vector<8x1xf32>
    %452 = vector.broadcast %451 : vector<8x1xf32> to vector<8x256xf32>
    %453 = arith.mulf %448, %452 : vector<8x256xf32>
    %454 = vector.broadcast %432 : vector<1x256xf32> to vector<8x256xf32>
    %455 = arith.mulf %453, %454 : vector<8x256xf32>
    %456 = vector.broadcast %433 : vector<1x256xf32> to vector<8x256xf32>
    %457 = arith.addf %455, %456 : vector<8x256xf32>
    %cst_207 = arith.constant 0.000000e+00 : f32
    %458 = vector.broadcast %cst_207 : f32 to vector<8x256xf32>
    %459 = arith.maximumf %457, %458 : vector<8x256xf32>
    %460 = arith.addf %391, %459 : vector<8x256xf32>
    %c0_208 = arith.constant 0 : index
    %c0_209 = arith.constant 0 : index
    %461 = vector.load %arg8[%c0_208, %c0_209] : memref<256x128xbf16, #tpu.memory_space<vmem>>, vector<256x128xbf16>
    %462 = arith.truncf %460 : vector<8x256xf32> to vector<8x256xbf16>
    %cst_210 = arith.constant dense<0.000000e+00> : vector<8x128xf32>
    %463 = tpu.matmul %462, %461, %cst_210 {dimension_numbers = #tpu.dot_dimension_numbers<[1], [0], [0], [1], [0, 0, 1, 1], [], []>} : vector<8x256xbf16>, vector<256x128xbf16>, vector<8x128xf32> -> vector<8x128xf32>
    %c28 = arith.constant 28 : index
    %c0_211 = arith.constant 0 : index
    %464 = vector.load %arg10[%c28, %c0_211] : memref<29x128xf32, #tpu.memory_space<vmem>>, vector<1x128xf32>
    %465 = vector.broadcast %464 : vector<1x128xf32> to vector<8x128xf32>
    %466 = arith.addf %463, %465 : vector<8x128xf32>
    %cst_212 = arith.constant 0.000000e+00 : f32
    %467 = vector.broadcast %cst_212 : f32 to vector<8x128xf32>
    %468 = arith.maximumf %466, %467 : vector<8x128xf32>
    %c6_213 = arith.constant 6 : index
    %c0_214 = arith.constant 0 : index
    %c0_215 = arith.constant 0 : index
    %469 = vector.load %arg4[%c6_213, %c0_214, %c0_215] : memref<10x128x128xbf16, #tpu.memory_space<vmem>>, vector<1x128x128xbf16>
    %470 = vector.shape_cast %469 : vector<1x128x128xbf16> to vector<128x128xbf16>
    %471 = arith.truncf %468 : vector<8x128xf32> to vector<8x128xbf16>
    %cst_216 = arith.constant dense<0.000000e+00> : vector<8x128xf32>
    %472 = tpu.matmul %471, %470, %cst_216 {dimension_numbers = #tpu.dot_dimension_numbers<[1], [0], [0], [1], [0, 0, 1, 1], [], []>} : vector<8x128xbf16>, vector<128x128xbf16>, vector<8x128xf32> -> vector<8x128xf32>
    %c16_217 = arith.constant 16 : index
    %c0_218 = arith.constant 0 : index
    %473 = vector.load %arg10[%c16_217, %c0_218] : memref<29x128xf32, #tpu.memory_space<vmem>>, vector<1x128xf32>
    %474 = vector.broadcast %473 : vector<1x128xf32> to vector<8x128xf32>
    %475 = arith.addf %472, %474 : vector<8x128xf32>
    %c17_219 = arith.constant 17 : index
    %c0_220 = arith.constant 0 : index
    %476 = vector.load %arg10[%c17_219, %c0_220] : memref<29x128xf32, #tpu.memory_space<vmem>>, vector<1x128xf32>
    %c18_221 = arith.constant 18 : index
    %c0_222 = arith.constant 0 : index
    %477 = vector.load %arg10[%c18_221, %c0_222] : memref<29x128xf32, #tpu.memory_space<vmem>>, vector<1x128xf32>
    %cst_223 = arith.constant dense<0.000000e+00> : vector<8xf32>
    %478 = vector.multi_reduction <add>, %475, %cst_223 [1] : vector<8x128xf32> to vector<8xf32>
    %479 = vector.shape_cast %478 : vector<8xf32> to vector<8x1xf32>
    %cst_224 = arith.constant 1.280000e+02 : f32
    %480 = vector.broadcast %cst_224 : f32 to vector<8x1xf32>
    %481 = arith.divf %479, %480 : vector<8x1xf32>
    %482 = arith.mulf %475, %475 : vector<8x128xf32>
    %cst_225 = arith.constant dense<0.000000e+00> : vector<8xf32>
    %483 = vector.multi_reduction <add>, %482, %cst_225 [1] : vector<8x128xf32> to vector<8xf32>
    %484 = vector.shape_cast %483 : vector<8xf32> to vector<8x1xf32>
    %cst_226 = arith.constant 1.280000e+02 : f32
    %485 = vector.broadcast %cst_226 : f32 to vector<8x1xf32>
    %486 = arith.divf %484, %485 : vector<8x1xf32>
    %487 = arith.mulf %481, %481 : vector<8x1xf32>
    %488 = arith.subf %486, %487 : vector<8x1xf32>
    %cst_227 = arith.constant 0.000000e+00 : f32
    %489 = vector.broadcast %cst_227 : f32 to vector<8x1xf32>
    %490 = arith.maximumf %488, %489 : vector<8x1xf32>
    %491 = vector.broadcast %481 : vector<8x1xf32> to vector<8x128xf32>
    %492 = arith.subf %475, %491 : vector<8x128xf32>
    %cst_228 = arith.constant 9.99999974E-6 : f32
    %493 = vector.broadcast %cst_228 : f32 to vector<8x1xf32>
    %494 = arith.addf %490, %493 : vector<8x1xf32>
    %495 = math.rsqrt %494 : vector<8x1xf32>
    %496 = vector.broadcast %495 : vector<8x1xf32> to vector<8x128xf32>
    %497 = arith.mulf %492, %496 : vector<8x128xf32>
    %498 = vector.broadcast %476 : vector<1x128xf32> to vector<8x128xf32>
    %499 = arith.mulf %497, %498 : vector<8x128xf32>
    %500 = vector.broadcast %477 : vector<1x128xf32> to vector<8x128xf32>
    %501 = arith.addf %499, %500 : vector<8x128xf32>
    %c7_229 = arith.constant 7 : index
    %c0_230 = arith.constant 0 : index
    %c0_231 = arith.constant 0 : index
    %502 = vector.load %arg4[%c7_229, %c0_230, %c0_231] : memref<10x128x128xbf16, #tpu.memory_space<vmem>>, vector<1x128x128xbf16>
    %503 = vector.shape_cast %502 : vector<1x128x128xbf16> to vector<128x128xbf16>
    %504 = arith.truncf %501 : vector<8x128xf32> to vector<8x128xbf16>
    %cst_232 = arith.constant dense<0.000000e+00> : vector<8x128xf32>
    %505 = tpu.matmul %504, %503, %cst_232 {dimension_numbers = #tpu.dot_dimension_numbers<[1], [0], [0], [1], [0, 0, 1, 1], [], []>} : vector<8x128xbf16>, vector<128x128xbf16>, vector<8x128xf32> -> vector<8x128xf32>
    %c19_233 = arith.constant 19 : index
    %c0_234 = arith.constant 0 : index
    %506 = vector.load %arg10[%c19_233, %c0_234] : memref<29x128xf32, #tpu.memory_space<vmem>>, vector<1x128xf32>
    %507 = vector.broadcast %506 : vector<1x128xf32> to vector<8x128xf32>
    %508 = arith.addf %505, %507 : vector<8x128xf32>
    %c20_235 = arith.constant 20 : index
    %c0_236 = arith.constant 0 : index
    %509 = vector.load %arg10[%c20_235, %c0_236] : memref<29x128xf32, #tpu.memory_space<vmem>>, vector<1x128xf32>
    %c21_237 = arith.constant 21 : index
    %c0_238 = arith.constant 0 : index
    %510 = vector.load %arg10[%c21_237, %c0_238] : memref<29x128xf32, #tpu.memory_space<vmem>>, vector<1x128xf32>
    %cst_239 = arith.constant dense<0.000000e+00> : vector<8xf32>
    %511 = vector.multi_reduction <add>, %508, %cst_239 [1] : vector<8x128xf32> to vector<8xf32>
    %512 = vector.shape_cast %511 : vector<8xf32> to vector<8x1xf32>
    %cst_240 = arith.constant 1.280000e+02 : f32
    %513 = vector.broadcast %cst_240 : f32 to vector<8x1xf32>
    %514 = arith.divf %512, %513 : vector<8x1xf32>
    %515 = arith.mulf %508, %508 : vector<8x128xf32>
    %cst_241 = arith.constant dense<0.000000e+00> : vector<8xf32>
    %516 = vector.multi_reduction <add>, %515, %cst_241 [1] : vector<8x128xf32> to vector<8xf32>
    %517 = vector.shape_cast %516 : vector<8xf32> to vector<8x1xf32>
    %cst_242 = arith.constant 1.280000e+02 : f32
    %518 = vector.broadcast %cst_242 : f32 to vector<8x1xf32>
    %519 = arith.divf %517, %518 : vector<8x1xf32>
    %520 = arith.mulf %514, %514 : vector<8x1xf32>
    %521 = arith.subf %519, %520 : vector<8x1xf32>
    %cst_243 = arith.constant 0.000000e+00 : f32
    %522 = vector.broadcast %cst_243 : f32 to vector<8x1xf32>
    %523 = arith.maximumf %521, %522 : vector<8x1xf32>
    %524 = vector.broadcast %514 : vector<8x1xf32> to vector<8x128xf32>
    %525 = arith.subf %508, %524 : vector<8x128xf32>
    %cst_244 = arith.constant 9.99999974E-6 : f32
    %526 = vector.broadcast %cst_244 : f32 to vector<8x1xf32>
    %527 = arith.addf %523, %526 : vector<8x1xf32>
    %528 = math.rsqrt %527 : vector<8x1xf32>
    %529 = vector.broadcast %528 : vector<8x1xf32> to vector<8x128xf32>
    %530 = arith.mulf %525, %529 : vector<8x128xf32>
    %531 = vector.broadcast %509 : vector<1x128xf32> to vector<8x128xf32>
    %532 = arith.mulf %530, %531 : vector<8x128xf32>
    %533 = vector.broadcast %510 : vector<1x128xf32> to vector<8x128xf32>
    %534 = arith.addf %532, %533 : vector<8x128xf32>
    %cst_245 = arith.constant 0.000000e+00 : f32
    %535 = vector.broadcast %cst_245 : f32 to vector<8x128xf32>
    %536 = arith.maximumf %534, %535 : vector<8x128xf32>
    %537 = arith.addf %468, %536 : vector<8x128xf32>
    %c8_246 = arith.constant 8 : index
    %c0_247 = arith.constant 0 : index
    %c0_248 = arith.constant 0 : index
    %538 = vector.load %arg4[%c8_246, %c0_247, %c0_248] : memref<10x128x128xbf16, #tpu.memory_space<vmem>>, vector<1x128x128xbf16>
    %539 = vector.shape_cast %538 : vector<1x128x128xbf16> to vector<128x128xbf16>
    %540 = arith.truncf %537 : vector<8x128xf32> to vector<8x128xbf16>
    %cst_249 = arith.constant dense<0.000000e+00> : vector<8x128xf32>
    %541 = tpu.matmul %540, %539, %cst_249 {dimension_numbers = #tpu.dot_dimension_numbers<[1], [0], [0], [1], [0, 0, 1, 1], [], []>} : vector<8x128xbf16>, vector<128x128xbf16>, vector<8x128xf32> -> vector<8x128xf32>
    %c22_250 = arith.constant 22 : index
    %c0_251 = arith.constant 0 : index
    %542 = vector.load %arg10[%c22_250, %c0_251] : memref<29x128xf32, #tpu.memory_space<vmem>>, vector<1x128xf32>
    %543 = vector.broadcast %542 : vector<1x128xf32> to vector<8x128xf32>
    %544 = arith.addf %541, %543 : vector<8x128xf32>
    %c23_252 = arith.constant 23 : index
    %c0_253 = arith.constant 0 : index
    %545 = vector.load %arg10[%c23_252, %c0_253] : memref<29x128xf32, #tpu.memory_space<vmem>>, vector<1x128xf32>
    %c24_254 = arith.constant 24 : index
    %c0_255 = arith.constant 0 : index
    %546 = vector.load %arg10[%c24_254, %c0_255] : memref<29x128xf32, #tpu.memory_space<vmem>>, vector<1x128xf32>
    %cst_256 = arith.constant dense<0.000000e+00> : vector<8xf32>
    %547 = vector.multi_reduction <add>, %544, %cst_256 [1] : vector<8x128xf32> to vector<8xf32>
    %548 = vector.shape_cast %547 : vector<8xf32> to vector<8x1xf32>
    %cst_257 = arith.constant 1.280000e+02 : f32
    %549 = vector.broadcast %cst_257 : f32 to vector<8x1xf32>
    %550 = arith.divf %548, %549 : vector<8x1xf32>
    %551 = arith.mulf %544, %544 : vector<8x128xf32>
    %cst_258 = arith.constant dense<0.000000e+00> : vector<8xf32>
    %552 = vector.multi_reduction <add>, %551, %cst_258 [1] : vector<8x128xf32> to vector<8xf32>
    %553 = vector.shape_cast %552 : vector<8xf32> to vector<8x1xf32>
    %cst_259 = arith.constant 1.280000e+02 : f32
    %554 = vector.broadcast %cst_259 : f32 to vector<8x1xf32>
    %555 = arith.divf %553, %554 : vector<8x1xf32>
    %556 = arith.mulf %550, %550 : vector<8x1xf32>
    %557 = arith.subf %555, %556 : vector<8x1xf32>
    %cst_260 = arith.constant 0.000000e+00 : f32
    %558 = vector.broadcast %cst_260 : f32 to vector<8x1xf32>
    %559 = arith.maximumf %557, %558 : vector<8x1xf32>
    %560 = vector.broadcast %550 : vector<8x1xf32> to vector<8x128xf32>
    %561 = arith.subf %544, %560 : vector<8x128xf32>
    %cst_261 = arith.constant 9.99999974E-6 : f32
    %562 = vector.broadcast %cst_261 : f32 to vector<8x1xf32>
    %563 = arith.addf %559, %562 : vector<8x1xf32>
    %564 = math.rsqrt %563 : vector<8x1xf32>
    %565 = vector.broadcast %564 : vector<8x1xf32> to vector<8x128xf32>
    %566 = arith.mulf %561, %565 : vector<8x128xf32>
    %567 = vector.broadcast %545 : vector<1x128xf32> to vector<8x128xf32>
    %568 = arith.mulf %566, %567 : vector<8x128xf32>
    %569 = vector.broadcast %546 : vector<1x128xf32> to vector<8x128xf32>
    %570 = arith.addf %568, %569 : vector<8x128xf32>
    %c9_262 = arith.constant 9 : index
    %c0_263 = arith.constant 0 : index
    %c0_264 = arith.constant 0 : index
    %571 = vector.load %arg4[%c9_262, %c0_263, %c0_264] : memref<10x128x128xbf16, #tpu.memory_space<vmem>>, vector<1x128x128xbf16>
    %572 = vector.shape_cast %571 : vector<1x128x128xbf16> to vector<128x128xbf16>
    %573 = arith.truncf %570 : vector<8x128xf32> to vector<8x128xbf16>
    %cst_265 = arith.constant dense<0.000000e+00> : vector<8x128xf32>
    %574 = tpu.matmul %573, %572, %cst_265 {dimension_numbers = #tpu.dot_dimension_numbers<[1], [0], [0], [1], [0, 0, 1, 1], [], []>} : vector<8x128xbf16>, vector<128x128xbf16>, vector<8x128xf32> -> vector<8x128xf32>
    %c25_266 = arith.constant 25 : index
    %c0_267 = arith.constant 0 : index
    %575 = vector.load %arg10[%c25_266, %c0_267] : memref<29x128xf32, #tpu.memory_space<vmem>>, vector<1x128xf32>
    %576 = vector.broadcast %575 : vector<1x128xf32> to vector<8x128xf32>
    %577 = arith.addf %574, %576 : vector<8x128xf32>
    %c26 = arith.constant 26 : index
    %c0_268 = arith.constant 0 : index
    %578 = vector.load %arg10[%c26, %c0_268] : memref<29x128xf32, #tpu.memory_space<vmem>>, vector<1x128xf32>
    %c27 = arith.constant 27 : index
    %c0_269 = arith.constant 0 : index
    %579 = vector.load %arg10[%c27, %c0_269] : memref<29x128xf32, #tpu.memory_space<vmem>>, vector<1x128xf32>
    %cst_270 = arith.constant dense<0.000000e+00> : vector<8xf32>
    %580 = vector.multi_reduction <add>, %577, %cst_270 [1] : vector<8x128xf32> to vector<8xf32>
    %581 = vector.shape_cast %580 : vector<8xf32> to vector<8x1xf32>
    %cst_271 = arith.constant 1.280000e+02 : f32
    %582 = vector.broadcast %cst_271 : f32 to vector<8x1xf32>
    %583 = arith.divf %581, %582 : vector<8x1xf32>
    %584 = arith.mulf %577, %577 : vector<8x128xf32>
    %cst_272 = arith.constant dense<0.000000e+00> : vector<8xf32>
    %585 = vector.multi_reduction <add>, %584, %cst_272 [1] : vector<8x128xf32> to vector<8xf32>
    %586 = vector.shape_cast %585 : vector<8xf32> to vector<8x1xf32>
    %cst_273 = arith.constant 1.280000e+02 : f32
    %587 = vector.broadcast %cst_273 : f32 to vector<8x1xf32>
    %588 = arith.divf %586, %587 : vector<8x1xf32>
    %589 = arith.mulf %583, %583 : vector<8x1xf32>
    %590 = arith.subf %588, %589 : vector<8x1xf32>
    %cst_274 = arith.constant 0.000000e+00 : f32
    %591 = vector.broadcast %cst_274 : f32 to vector<8x1xf32>
    %592 = arith.maximumf %590, %591 : vector<8x1xf32>
    %593 = vector.broadcast %583 : vector<8x1xf32> to vector<8x128xf32>
    %594 = arith.subf %577, %593 : vector<8x128xf32>
    %cst_275 = arith.constant 9.99999974E-6 : f32
    %595 = vector.broadcast %cst_275 : f32 to vector<8x1xf32>
    %596 = arith.addf %592, %595 : vector<8x1xf32>
    %597 = math.rsqrt %596 : vector<8x1xf32>
    %598 = vector.broadcast %597 : vector<8x1xf32> to vector<8x128xf32>
    %599 = arith.mulf %594, %598 : vector<8x128xf32>
    %600 = vector.broadcast %578 : vector<1x128xf32> to vector<8x128xf32>
    %601 = arith.mulf %599, %600 : vector<8x128xf32>
    %602 = vector.broadcast %579 : vector<1x128xf32> to vector<8x128xf32>
    %603 = arith.addf %601, %602 : vector<8x128xf32>
    %cst_276 = arith.constant 0.000000e+00 : f32
    %604 = vector.broadcast %cst_276 : f32 to vector<8x128xf32>
    %605 = arith.maximumf %603, %604 : vector<8x128xf32>
    %606 = arith.addf %537, %605 : vector<8x128xf32>
    %c0_277 = arith.constant 0 : index
    %c0_278 = arith.constant 0 : index
    %607 = vector.load %arg9[%c0_277, %c0_278] : memref<128x3072xbf16, #tpu.memory_space<vmem>>, vector<128x3072xbf16>
    %608 = arith.truncf %606 : vector<8x128xf32> to vector<8x128xbf16>
    %cst_279 = arith.constant dense<0.000000e+00> : vector<8x3072xf32>
    %609 = tpu.matmul %608, %607, %cst_279 {dimension_numbers = #tpu.dot_dimension_numbers<[1], [0], [0], [1], [0, 0, 1, 1], [], []>} : vector<8x128xbf16>, vector<128x3072xbf16>, vector<8x3072xf32> -> vector<8x3072xf32>
    %c0_280 = arith.constant 0 : index
    %c0_281 = arith.constant 0 : index
    %610 = vector.load %arg12[%c0_280, %c0_281] : memref<1x3072xf32, #tpu.memory_space<vmem>>, vector<1x3072xf32>
    %611 = vector.broadcast %610 : vector<1x3072xf32> to vector<8x3072xf32>
    %612 = arith.addf %609, %611 : vector<8x3072xf32>
    %c0_282 = arith.constant 0 : index
    %c0_283 = arith.constant 0 : index
    %613 = vector.load %arg13[%c0_282, %c0_283] : memref<8x3072xf32, #tpu.memory_space<vmem>>, vector<8x3072xf32>
    tpu.vector_store %arg13[%c0_282, %c0_283], %612 {strides = array<i32>} : memref<8x3072xf32, #tpu.memory_space<vmem>>, vector<8x3072xf32>,
    return
  }
  func.func @transform_0(%arg0: i32) -> (i32, i32) {
    %c0_i32 = arith.constant 0 : i32
    %c0_i32_0 = arith.constant 0 : i32
    return %arg0, %c0_i32 : i32, i32
  }
  func.func @transform_1(%arg0: i32) -> (i32, i32) {
    %c0_i32 = arith.constant 0 : i32
    %c0_i32_0 = arith.constant 0 : i32
    return %arg0, %c0_i32 : i32, i32
  }
  func.func @transform_2(%arg0: i32) -> (i32, i32) {
    %c0_i32 = arith.constant 0 : i32
    %c0_i32_0 = arith.constant 0 : i32
    %c0_i32_1 = arith.constant 0 : i32
    return %c0_i32, %c0_i32_0 : i32, i32
  }
  func.func @transform_3(%arg0: i32) -> (i32, i32, i32) {
    %c0_i32 = arith.constant 0 : i32
    %c0_i32_0 = arith.constant 0 : i32
    %c0_i32_1 = arith.constant 0 : i32
    %c0_i32_2 = arith.constant 0 : i32
    return %c0_i32, %c0_i32_0, %c0_i32_1 : i32, i32, i32
  }
  func.func @transform_4(%arg0: i32) -> (i32, i32, i32) {
    %c0_i32 = arith.constant 0 : i32
    %c0_i32_0 = arith.constant 0 : i32
    %c0_i32_1 = arith.constant 0 : i32
    %c0_i32_2 = arith.constant 0 : i32
    return %c0_i32, %c0_i32_0, %c0_i32_1 : i32, i32, i32
  }
  func.func @transform_5(%arg0: i32) -> (i32, i32) {
    %c0_i32 = arith.constant 0 : i32
    %c0_i32_0 = arith.constant 0 : i32
    %c0_i32_1 = arith.constant 0 : i32
    return %c0_i32, %c0_i32_0 : i32, i32
  }
  func.func @transform_6(%arg0: i32) -> (i32, i32) {
    %c0_i32 = arith.constant 0 : i32
    %c0_i32_0 = arith.constant 0 : i32
    %c0_i32_1 = arith.constant 0 : i32
    return %c0_i32, %c0_i32_0 : i32, i32
  }
  func.func @transform_7(%arg0: i32) -> (i32, i32) {
    %c0_i32 = arith.constant 0 : i32
    %c0_i32_0 = arith.constant 0 : i32
    %c0_i32_1 = arith.constant 0 : i32
    return %c0_i32, %c0_i32_0 : i32, i32
  }
  func.func @transform_8(%arg0: i32) -> (i32, i32) {
    %c0_i32 = arith.constant 0 : i32
    %c0_i32_0 = arith.constant 0 : i32
    %c0_i32_1 = arith.constant 0 : i32
    return %c0_i32, %c0_i32_0 : i32, i32
  }
  func.func @transform_9(%arg0: i32) -> (i32, i32) {
    %c0_i32 = arith.constant 0 : i32
    %c0_i32_0 = arith.constant 0 : i32
    %c0_i32_1 = arith.constant 0 : i32
    return %c0_i32, %c0_i32_0 : i32, i32
  }
  func.func @transform_10(%arg0: i32) -> (i32, i32) {
    %c0_i32 = arith.constant 0 : i32
    %c0_i32_0 = arith.constant 0 : i32
    %c0_i32_1 = arith.constant 0 : i32
    return %c0_i32, %c0_i32_0 : i32, i32
  }
  func.func @transform_11(%arg0: i32) -> (i32, i32) {
    %c0_i32 = arith.constant 0 : i32
    %c0_i32_0 = arith.constant 0 : i32
    %c0_i32_1 = arith.constant 0 : i32
    return %c0_i32, %c0_i32_0 : i32, i32
  }
  func.func @transform_12(%arg0: i32) -> (i32, i32) {
    %c0_i32 = arith.constant 0 : i32
    %c0_i32_0 = arith.constant 0 : i32
    return %arg0, %c0_i32 : i32, i32
  }
}

</mosaic_0001>

<bundles_post_ra>
// kernel: tpu_custom_call.1
= control target key start
LH: loop header
LB: loop body
LE: loop exit
PB: predicated region body
PF: predicated region fallthrough
CT: control target
= control target key end

     0   :  { %17 = vsyncpa [#allocation3], 0  ;;  %s11318_s0 = inlined_call_operand.hbm [shape: f32[8,3072], index: 0, kind: input, shape index: {}]   ;;  %s11319_s1 = inlined_call_operand.vmem [shape: f32[8,1], index: 1, kind: input, shape index: {}]   ;;  %s11320_s2 = inlined_call_operand.hbm [shape: bf16[3072,128], index: 2, kind: input, shape index: {}]   ;;  %s11321_s3 = inlined_call_operand.hbm [shape: bf16[10,128,128], index: 3, kind: input, shape index: {}]   ;;  %s11322_s4 = inlined_call_operand.hbm [shape: bf16[8,256,256], index: 4, kind: input, shape index: {}]   ;;  %s11323_s5 = inlined_call_operand.hbm [shape: bf16[128,256], index: 5, kind: input, shape index: {}]   ;;  %s11324_s6 = inlined_call_operand.hbm [shape: bf16[256,256], index: 6, kind: input, shape index: {}]   ;;  %s11325_s7 = inlined_call_operand.hbm [shape: bf16[256,128], index: 7, kind: input, shape index: {}]   ;;  %s11326_s8 = inlined_call_operand.hbm [shape: bf16[128,3072], index: 8, kind: input, shape index: {}]   ;;  %s11327_s9 = inlined_call_operand.hbm [shape: f32[29,128], index: 9, kind: input, shape index: {}]   ;;  %s11328_s10 = inlined_call_operand.hbm [shape: f32[26,256], index: 10, kind: input, shape index: {}]   ;;  %s11329_s11 = inlined_call_operand.vmem [shape: f32[1,3072], index: 11, kind: input, shape index: {}]   ;;  %s11330_s12 = inlined_call_operand.hbm [shape: f32[8,3072], index: 12, kind: output, shape index: {}]  }
   0x1   :  { %18 = vsyncpa [#allocation6], 0 }
   0x2   :  { %19 = vsyncpa [#allocation9], 0 }
   0x3   :  { %20 = vsyncpa [#allocation12], 0 }
   0x4   :  { %21 = vsyncpa [#allocation15], 0 }
   0x5   :  { %22 = vsyncpa [#allocation18], 0 }
   0x6   :  { %23 = vsyncpa [#allocation4], 0  ;;  %s10803_s21 = smov [#allocation5]  }
   0x7   :  { %s41_s22 = sshll.u32 %s10803_s21, 4  ;;  %s42_s22 = int_to_ptr.vmem [resolvable:$true] %s41_s22 }
   0x8   :  { %s10577_s23 = scalar_lea.vmem %s42_s22, 24576  ;;  %p10582_p1 = scmp.lt.s32.totalorder %s42_s22, %s42_s22 }
   0x9   :  { %p10578_p0 = scmp.ne.s32.totalorder %s42_s22, %s10577_s23  ;;  %p10583_p2 = scmp.lt.s32.totalorder %s10577_s23, %s10577_s23 }
   0xb   :  { %p10584_p3 = por %p10583_p2, %p10582_p1 }
   0xd   :  { %p10585_p4 = pnand %p10584_p3, %p10578_p0 }
   0xf   :  { %10588 = shalt.err (!%p10585_p4)
}
  0x10   :  { %s10804_s24 = smov 64   ;;  %s10805_s25 = smov 4  }
  0x11   :  { %47 = dma.hbm_to_vmem [thread:$0]  %s11320_s2, 24576, %s42_s22, [#allocation6], %s10804_s24, %s10804_s24, %s10805_s25  }
  0x12   :  { %s10806_s28 = smov [#allocation8]  }
  0x13   :  { %s65_s29 = sshll.u32 %s10806_s28, 4  ;;  %s66_s29 = int_to_ptr.vmem [resolvable:$true] %s65_s29 }
  0x14   :  { %s10597_s30 = scalar_lea.vmem %s66_s29, 32768  ;;  %p10602_p6 = scmp.lt.s32.totalorder %s66_s29, %s66_s29 }
  0x15   :  { %p10598_p5 = scmp.ne.s32.totalorder %s66_s29, %s10597_s30  ;;  %p10603_p7 = scmp.lt.s32.totalorder %s10597_s30, %s10597_s30 }
  0x17   :  { %p10604_p8 = por %p10603_p7, %p10602_p6 }
  0x19   :  { %p10605_p9 = pnand %p10604_p8, %p10598_p5 }
  0x1b   :  { %10608 = shalt.err (!%p10605_p9)
}
  0x1c   :  { %s10807_s13 = smov 128   ;;  %s10808_s14 = smov 8  }
  0x1d   :  { %71 = dma.hbm_to_vmem [thread:$0]  %s11322_s4, 32768, %s66_s29, [#allocation9], %s10807_s13, %s10807_s13, %s10808_s14  }
  0x1e   :  { %s10809_s2 = smov [#allocation11]   ;;  %s10810_s18 = smov [#allocation14]  }
  0x1f   :  { %s89_s17 = sshll.u32 %s10809_s2, 4  ;;  %s113_s19 = sshll.u32 %s10810_s18, 4  ;;  %s90_s17 = int_to_ptr.vmem [resolvable:$true] %s89_s17  ;;  %s114_s19 = int_to_ptr.vmem [resolvable:$true] %s113_s19 }
  0x20   :  { %s10617_s20 = scalar_lea.vmem %s90_s17, 4096  ;;  %p10622_p11 = scmp.lt.s32.totalorder %s90_s17, %s90_s17 }
  0x21   :  { %p10618_p10 = scmp.ne.s32.totalorder %s90_s17, %s10617_s20  ;;  %p10623_p12 = scmp.lt.s32.totalorder %s10617_s20, %s10617_s20 }
  0x23   :  { %p10624_p13 = por %p10623_p12, %p10622_p11 }
  0x25   :  { %p10625_p0 = pnand %p10624_p13, %p10618_p10 }
  0x27   :  { %10628 = shalt.err (!%p10625_p0)
}
  0x28   :  { %95 = dma.hbm_to_vmem [thread:$0]  %s11324_s6, 4096, %s90_s17, [#allocation12], %s10807_s13, %s10807_s13, %s10808_s14  }
  0x29   :  { %s10637_s4 = scalar_lea.vmem %s114_s19, 24576  ;;  %p10642_p2 = scmp.lt.s32.totalorder %s114_s19, %s114_s19 }
  0x2a   :  { %p10638_p1 = scmp.ne.s32.totalorder %s114_s19, %s10637_s4  ;;  %p10643_p3 = scmp.lt.s32.totalorder %s10637_s4, %s10637_s4 }
  0x2c   :  { %p10644_p4 = por %p10643_p3, %p10642_p2 }
  0x2e   :  { %p10645_p5 = pnand %p10644_p4, %p10638_p1 }
  0x30   :  { %10648 = shalt.err (!%p10645_p5)
}
  0x31   :  { %s10811_s23 = smov 1536   ;;  %s10812_s26 = smov 96  }
  0x32   :  { %119 = dma.hbm_to_vmem [thread:$0]  %s11326_s8, 24576, %s114_s19, [#allocation15], %s10811_s23, %s10811_s23, %s10812_s26  }
  0x33   :  { %s10813_s29 = smov [#allocation2]   ;;  %s10814_s15 = smov [#allocation7]  }
  0x34   :  { %s30_s30 = sshll.u32 %s10813_s29, 4  ;;  %s53_s16 = sshll.u32 %s10814_s15, 4  ;;  %s31_s30 = int_to_ptr.vmem [resolvable:$true] %s30_s30  ;;  %s54_s16 = int_to_ptr.vmem [resolvable:$true] %s53_s16 }
  0x35   :  { %s10657_s6 = scalar_lea.vmem %s31_s30, 3072  ;;  %p10662_p7 = scmp.lt.s32.totalorder %s31_s30, %s31_s30 }
  0x36   :  { %p10658_p6 = scmp.ne.s32.totalorder %s31_s30, %s10657_s6  ;;  %p10663_p8 = scmp.lt.s32.totalorder %s10657_s6, %s10657_s6 }
  0x38   :  { %p10664_p9 = por %p10663_p8, %p10662_p7 }
  0x3a   :  { %p10665_p10 = pnand %p10664_p9, %p10658_p6 }
  0x3c   :  { %10668 = shalt.err (!%p10665_p10)
}
  0x3d   :  { %33 = dma.hbm_to_vmem [thread:$0]  %s11318_s0, 3072, %s31_s30, [#allocation3]  }
  0x3e   :  { %s10677_s18 = scalar_lea.vmem %s54_s16, 10240  ;;  %p10682_p12 = scmp.lt.s32.totalorder %s54_s16, %s54_s16 }
  0x3f   :  { %p10678_p11 = scmp.ne.s32.totalorder %s54_s16, %s10677_s18  ;;  %p10683_p13 = scmp.lt.s32.totalorder %s10677_s18, %s10677_s18 }
  0x41   :  { %p10684_p0 = por %p10683_p13, %p10682_p12 }
  0x43   :  { %p10685_p1 = pnand %p10684_p0, %p10678_p11 }
  0x45   :  { %10688 = shalt.err (!%p10685_p1)
}
  0x46   :  { %59 = dma.hbm_to_vmem [thread:$0]  %s11321_s3, 10240, %s54_s16, [#allocation6], %s10804_s24, %s10804_s24, %s10805_s25  }
  0x47   :  { %s10815_s20 = smov [#allocation10]   ;;  %s10816_s22 = smov [#allocation13]  }
  0x48   :  { %s77_s21 = sshll.u32 %s10815_s20, 4  ;;  %s101_s4 = sshll.u32 %s10816_s22, 4  ;;  %s78_s21 = int_to_ptr.vmem [resolvable:$true] %s77_s21  ;;  %s102_s4 = int_to_ptr.vmem [resolvable:$true] %s101_s4 }
  0x49   :  { %s10697_s0 = scalar_lea.vmem %s78_s21, 2048  ;;  %p10702_p3 = scmp.lt.s32.totalorder %s78_s21, %s78_s21 }
  0x4a   :  { %p10698_p2 = scmp.ne.s32.totalorder %s78_s21, %s10697_s0  ;;  %p10703_p4 = scmp.lt.s32.totalorder %s10697_s0, %s10697_s0 }
  0x4c   :  { %p10704_p5 = por %p10703_p4, %p10702_p3 }
  0x4e   :  { %p10705_p6 = pnand %p10704_p5, %p10698_p2 }
  0x50   :  { %10708 = shalt.err (!%p10705_p6)
}
  0x51   :  { %83 = dma.hbm_to_vmem [thread:$0]  %s11323_s5, 2048, %s78_s21, [#allocation9], %s10807_s13, %s10807_s13, %s10808_s14  }
  0x52   :  { %s10717_s3 = scalar_lea.vmem %s102_s4, 2048  ;;  %p10722_p8 = scmp.lt.s32.totalorder %s102_s4, %s102_s4 }
  0x53   :  { %p10718_p7 = scmp.ne.s32.totalorder %s102_s4, %s10717_s3  ;;  %p10723_p9 = scmp.lt.s32.totalorder %s10717_s3, %s10717_s3 }
  0x55   :  { %p10724_p10 = por %p10723_p9, %p10722_p8 }
  0x57   :  { %p10725_p11 = pnand %p10724_p10, %p10718_p7 }
  0x59   :  { %10728 = shalt.err (!%p10725_p11)
}
  0x5a   :  { %107 = dma.hbm_to_vmem [thread:$0]  %s11325_s7, 2048, %s102_s4, [#allocation12], %s10804_s24, %s10804_s24, %s10805_s25  }
  0x5b   :  { %s10817_s29 = smov [#allocation16]   ;;  %s10818_s15 = smov [#allocation17]  }
  0x5c   :  { %s125_s30 = sshll.u32 %s10817_s29, 4  ;;  %s137_s16 = sshll.u32 %s10818_s15, 4  ;;  %s126_s30 = int_to_ptr.vmem [resolvable:$true] %s125_s30  ;;  %s138_s16 = int_to_ptr.vmem [resolvable:$true] %s137_s16 }
  0x5d   :  { %s10737_s5 = scalar_lea.vmem %s126_s30, 512  ;;  %p10742_p13 = scmp.lt.s32.totalorder %s126_s30, %s126_s30 }
  0x5e   :  { %p10738_p12 = scmp.ne.s32.totalorder %s126_s30, %s10737_s5  ;;  %p10743_p0 = scmp.lt.s32.totalorder %s10737_s5, %s10737_s5 }
  0x60   :  { %p10744_p1 = por %p10743_p0, %p10742_p13 }
  0x62   :  { %p10745_p2 = pnand %p10744_p1, %p10738_p12 }
  0x64   :  { %10748 = shalt.err (!%p10745_p2)
}
  0x65   :  { %131 = dma.hbm_to_vmem [thread:$0]  %s11327_s9, 512, %s126_s30, [#allocation15], %s10807_s13, %s10807_s13, %s10808_s14  }
  0x66   :  { %s10757_s7 = scalar_lea.vmem %s138_s16, 1024  ;;  %p10762_p4 = scmp.lt.s32.totalorder %s138_s16, %s138_s16 }
  0x67   :  { %p10758_p3 = scmp.ne.s32.totalorder %s138_s16, %s10757_s7  ;;  %p10763_p5 = scmp.lt.s32.totalorder %s10757_s7, %s10757_s7 }
  0x69   :  { %p10764_p6 = por %p10763_p5, %p10762_p4 }
  0x6b   :  { %p10765_p7 = pnand %p10764_p6, %p10758_p3 }
  0x6d   :  { %10768 = shalt.err (!%p10765_p7)
}
  0x6e   :  { %s10819_s24 = smov 256   ;;  %s10820_s25 = smov 16  }
  0x6f   :  { %143 = dma.hbm_to_vmem [thread:$0]  %s11328_s10, 1024, %s138_s16, [#allocation18], %s10819_s24, %s10819_s24, %s10820_s25  }
  0x70   :  { %10789 = dma.done.wait [#allocation3], 3072  }
  0x71   :  { %10790 = vsyncadd [#allocation3], 4294964224 }
  0x72   :  { %10791 = dma.done.wait [#allocation6], 34816  }
  0x73   :  { %10792 = vsyncadd [#allocation6], 4294932480 }
  0x74   :  { %10793 = dma.done.wait [#allocation9], 34816  }
  0x75   :  { %10794 = vsyncadd [#allocation9], 4294932480 }
  0x76   :  { %10795 = dma.done.wait [#allocation12], 6144  }
  0x77   :  { %10796 = vsyncadd [#allocation12], 4294961152 }
  0x78   :  { %10797 = dma.done.wait [#allocation15], 25088  }
  0x79   :  { %10798 = vsyncadd [#allocation15], 4294942208 }
  0x7a   :  { %10799 = dma.done.wait [#allocation18], 1024  }
  0x7b   :  { %10800 = vsyncadd [#allocation18], 4294966272  ;;  %v10821_v0 = vmov 0   ;;  %v10822_v1 = vmov 0.0   ;;  %v177_v2 = vld [vmem:[%s11319_s1] sm:$0xff]  ;;  %v9793_v3 = vld [vmem:[#allocation7 + $0x38] sm:$0xff]  }
  0x7c   :  { %9792 = vset.pattern.permute.xlu0 %v10821_v0  ;;  %9570 = vmatprep.subr.bf16.mxu0 %v10822_v1  ;;  %v9794_v4 = vld [vmem:[#allocation7 + $0x30] sm:$0xff]   ;;  %vm10823_vm0 = vmmov 0   ;;  %v9795_v5 = vld [vmem:[#allocation7 + $0x28] sm:$0xff]   ;;  %v9796_v6 = vld [vmem:[#allocation7 + $0x20] sm:$0xff]  }
  0x7d   :  { %9590 = vmatprep.subr.bf16.mxu1 %v10822_v1  ;;  %181 = vperm.xlu0 %9792, %v177_v2   ;;  %v9803_v7 = vld [vmem:[#allocation7 + $0x78] sm:$0xff]   ;;  %v9806_v8 = vld [vmem:[#allocation7 + $0x70] sm:$0xff]   ;;  %v9809_v10 = vld [vmem:[#allocation7 + $0x68] sm:$0xff]  }
  0x7e   :  { %9571 = vmatpush3.bf16.msra.mxu0 %v9793_v3  ;;  %9586 = vmatprep.mubr.msk.bf16.mxu0 %vm10823_vm0, %v10822_v1  ;;  %v9797_v9 = vld [vmem:[#allocation7 + $0x18] sm:$0xff]   ;;  %v9798_v11 = vld [vmem:[#allocation7 + $0x10] sm:$0xff]   ;;  %v9812_v12 = vld [vmem:[#allocation7 + $0x60] sm:$0xff]  }
  0x7f   :  { %9572 = vmatprep.subr.bf16.mxu0 %v10822_v1  ;;  %9606 = vmatprep.mubr.msk.bf16.mxu1 %vm10823_vm0, %v10822_v1  ;;  %v9799_v13 = vld [vmem:[#allocation7 + $0x8] sm:$0xff]   ;;  %v9815_v14 = vld [vmem:[#allocation7 + $0x58] sm:$0xff]   ;;  %v9800_v15 = vld [vmem:[#allocation7] sm:$0xff]  }
  0x80   :  { %9591 = vmatpush3.bf16.msra.mxu1 %v9803_v7  ;;  %v9801_v16 = vld [vmem:[#allocation5 + $0x78] sm:$0xff]   ;;  %v9818_v17 = vld [vmem:[#allocation7 + $0x50] sm:$0xff]   ;;  %v9821_v18 = vld [vmem:[#allocation7 + $0x48] sm:$0xff]  }
  0x81   :  { %9592 = vmatprep.subr.bf16.mxu1 %v10822_v1  ;;  %v8381_v19 = vld [vmem:[#allocation16] ss:$0 sm:$0xff]  ;;  %v8382_v20 = vld [vmem:[#allocation16 + $0x1] ss:$0 sm:$0xff]  ;;  %v9802_v24 = vld [vmem:[#allocation5 + $0x38] sm:$0xff]  }
  0x82   :  { %9573 = vmatpush3.bf16.msra.mxu0 %v9794_v4  ;;  %v9804_v26 = vld [vmem:[#allocation5 + $0x70] sm:$0xff]   ;;  %v9807_v29 = vld [vmem:[#allocation5 + $0x68] sm:$0xff]   ;;  %v9810_v31 = vld [vmem:[#allocation5 + $0x60] sm:$0xff]  }
  0x83   :  { %9574 = vmatprep.subr.bf16.mxu0 %v10822_v1  ;;  %v9805_v28 = vld [vmem:[#allocation5 + $0x30] sm:$0xff]   ;;  %v9808_v30 = vld [vmem:[#allocation5 + $0x28] sm:$0xff]   ;;  %v9811_v32 = vld [vmem:[#allocation5 + $0x20] sm:$0xff]  }
  0x84   :  { %9593 = vmatpush3.bf16.msra.mxu1 %v9806_v8  ;;  %v9813_v33 = vld [vmem:[#allocation5 + $0x58] sm:$0xff]   ;;  %v9816_v35 = vld [vmem:[#allocation5 + $0x50] sm:$0xff]   ;;  %v9819_v37 = vld [vmem:[#allocation5 + $0x48] sm:$0xff]  }
  0x85   :  { %9594 = vmatprep.subr.bf16.mxu1 %v10822_v1  ;;  %v9814_v34 = vld [vmem:[#allocation5 + $0x18] sm:$0xff]   ;;  %v9817_v36 = vld [vmem:[#allocation5 + $0x10] sm:$0xff]   ;;  %v9820_v38 = vld [vmem:[#allocation5 + $0x8] sm:$0xff]  }
  0x86   :  { %9575 = vmatpush3.bf16.msra.mxu0 %v9795_v5  ;;  %v9822_v39 = vld [vmem:[#allocation5 + $0x40] sm:$0xff]   ;;  %v307_v41 = vld [vmem:[#allocation2 + $0x8] sm:$0xff]  ;;  %v9825_v46 = vld [vmem:[#allocation5 + $0xf8] sm:$0xff]  }
  0x87   :  { %9576 = vmatprep.subr.bf16.mxu0 %v10822_v1  ;;  %v9823_v40 = vld [vmem:[#allocation5] sm:$0xff]   ;;  %v715_v42 = vpack.c.bf16 %v307_v41, %v307_v41  ;;  %v9827_v47 = vld [vmem:[#allocation5 + $0x178] sm:$0xff]   ;;  %v9831_v49 = vld [vmem:[#allocation5 + $0x170] sm:$0xff]  }
  0x88   :  { %9595 = vmatpush3.bf16.msra.mxu1 %v9809_v10  ;;  %v306_v43 = vld [vmem:[#allocation2] sm:$0xff]  ;;  %v9828_v48 = vld [vmem:[#allocation5 + $0x138] sm:$0xff]   ;;  %v9832_v50 = vld [vmem:[#allocation5 + $0x130] sm:$0xff]  }
  0x89   :  { %9596 = vmatprep.subr.bf16.mxu1 %v10822_v1  ;;  %v9824_v44 = vld [vmem:[#allocation7 + $0x40] sm:$0xff]   ;;  %v714_v45 = vpack.c.bf16 %v306_v43, %v306_v43  ;;  %v9835_v51 = vld [vmem:[#allocation5 + $0x168] sm:$0xff]   ;;  %v9843_v55 = vld [vmem:[#allocation5 + $0x158] sm:$0xff]  }
  0x8a   :  { %9577 = vmatpush3.bf16.msra.mxu0 %v9796_v6  ;;  %v9836_v52 = vld [vmem:[#allocation5 + $0x128] sm:$0xff]   ;;  %v9839_v53 = vld [vmem:[#allocation5 + $0x160] sm:$0xff]   ;;  %v9844_v56 = vld [vmem:[#allocation5 + $0x118] sm:$0xff]  }
  0x8b   :  { %9578 = vmatprep.subr.bf16.mxu0 %v10822_v1  ;;  %v9840_v54 = vld [vmem:[#allocation5 + $0x120] sm:$0xff]   ;;  %v9847_v57 = vld [vmem:[#allocation5 + $0x150] sm:$0xff]   ;;  %v9851_v59 = vld [vmem:[#allocation5 + $0x148] sm:$0xff]  }
  0x8c   :  { %9597 = vmatpush3.bf16.msra.mxu1 %v9812_v12  ;;  %v9848_v58 = vld [vmem:[#allocation5 + $0x110] sm:$0xff]   ;;  %v9852_v60 = vld [vmem:[#allocation5 + $0x108] sm:$0xff]   ;;  %v9855_v61 = vld [vmem:[#allocation5 + $0x140] sm:$0xff]  }
  0x8d   :  { %9598 = vmatprep.subr.bf16.mxu1 %v10822_v1  ;;  %v9856_v62 = vld [vmem:[#allocation5 + $0x100] sm:$0xff]   ;;  %v311_v63 = vld [vmem:[#allocation2 + $0x28] sm:$0xff]  ;;  %v9859_v5 = vld [vmem:[#allocation5 + $0x278] sm:$0xff]  }
  0x8e   :  { %9579 = vmatpush3.bf16.msra.mxu0 %v9797_v9  ;;  %v719_v2 = vpack.c.bf16 %v311_v63, %v311_v63  ;;  %v310_v3 = vld [vmem:[#allocation2 + $0x20] sm:$0xff]  ;;  %v9860_v6 = vld [vmem:[#allocation5 + $0x238] sm:$0xff]   ;;  %v9863_v7 = vld [vmem:[#allocation5 + $0x270] sm:$0xff]  }
  0x8f   :  { %9580 = vmatprep.subr.bf16.mxu0 %v10822_v1  ;;  %v718_v4 = vpack.c.bf16 %v310_v3, %v310_v3  ;;  %v9864_v8 = vld [vmem:[#allocation5 + $0x230] sm:$0xff]   ;;  %v9867_v9 = vld [vmem:[#allocation5 + $0x268] sm:$0xff]   ;;  %v9872_v12 = vld [vmem:[#allocation5 + $0x220] sm:$0xff]  }
  0x90   :  { %9599 = vmatpush3.bf16.msra.mxu1 %v9815_v14  ;;  %v9868_v10 = vld [vmem:[#allocation5 + $0x228] sm:$0xff]   ;;  %v9876_v14 = vld [vmem:[#allocation5 + $0x218] sm:$0xff]   ;;  %v318_v43 = vld [vmem:[#allocation2 + $0x60] sm:$0xff] }
  0x91   :  { %9600 = vmatprep.subr.bf16.mxu1 %v10822_v1  ;;  %v319_v41 = vld [vmem:[#allocation2 + $0x68] sm:$0xff]  ;;  %v9951_v63 = vld [vmem:[#allocation5 + $0x440] sm:$0xff]   ;;  %v9826_v3 = vld [vmem:[#allocation5 + $0xb8] sm:$0xff]  }
  0x92   :  { %9581 = vmatpush3.bf16.msra.mxu0 %v9798_v11  ;;  %v9871_v11 = vld [vmem:[#allocation5 + $0x260] sm:$0xff]  }
  0x93   :  { %9582 = vmatprep.subr.bf16.mxu0 %v10822_v1 }
  0x94   :  { %9601 = vmatpush3.bf16.msra.mxu1 %v9818_v17  ;;  %v9883_v17 = vld [vmem:[#allocation5 + $0x248] sm:$0xff]  }
  0x95   :  { %9602 = vmatprep.subr.bf16.mxu1 %v10822_v1 }
  0x96   :  { %9583 = vmatpush3.bf16.msra.mxu0 %v9799_v13  ;;  %v9875_v13 = vld [vmem:[#allocation5 + $0x258] sm:$0xff]  }
  0x97   :  { %9584 = vmatprep.subr.bf16.mxu0 %v10822_v1 }
  0x98   :  { %9603 = vmatpush3.bf16.msra.mxu1 %v9821_v18  ;;  %v9884_v18 = vld [vmem:[#allocation5 + $0x208] sm:$0xff]  }
  0x99   :  { %9604 = vmatprep.subr.bf16.mxu1 %v10822_v1 }
  0x9a   :  { %9585 = vmatpush3.bf16.msra.mxu0 %v9800_v15  ;;  %v9879_v15 = vld [vmem:[#allocation5 + $0x250] sm:$0xff]  }
  0x9b   :  { %9212 = vmatprep.subr.bf16.mxu0 %v9801_v16  ;;  %v9880_v16 = vld [vmem:[#allocation5 + $0x210] sm:$0xff]  }
  0x9c   :  { %9605 = vmatpush3.bf16.msra.mxu1 %v9824_v44  ;;  %v726_v44 = vpack.c.bf16 %v318_v43, %v318_v43  ;;  %v313_v43 = vld [vmem:[#allocation2 + $0x38] sm:$0xff] }
  0x9d   :  { %9234 = vmatprep.subr.bf16.mxu1 %v9825_v46  ;;  %v9924_v46 = vld [vmem:[#allocation5 + $0x438] sm:$0xff]  }
  0xf8   :  { %v182_v21 = vpop.permute.xlu0 %181 }
  0xf9   :  { %v188_v22 = vmul.f32 %v8381_v19, %v182_v21  ;;  %v9887_v19 = vld [vmem:[#allocation5 + $0x240] sm:$0xff]   ;;  %v315_v21 = vld [vmem:[#allocation2 + $0x48] sm:$0xff] }
  0xfb   :  { %v194_v23 = vadd.f32 %v8382_v20, %v188_v22  ;;  %v9888_v20 = vld [vmem:[#allocation5 + $0x200] sm:$0xff]   ;;  %v723_v22 = vpack.c.bf16 %v315_v21, %v315_v21 }
  0xfc   :  { %v9837_v21 = vld [vmem:[#allocation5 + $0xe0] sm:$0xff]  }
  0xfd   :  { %v195_v25 = vmax.f32 %v194_v23, 0.0  ;;  %v314_v23 = vld [vmem:[#allocation2 + $0x40] sm:$0xff] }
  0xff   :  { %v212_v27 = vpack.c.bf16 %v195_v25, %v195_v25  ;;  %v9891_v25 = vld [vmem:[#allocation5 + $0x378] sm:$0xff]  }
 0x101   :  { %9587 = vmatmul.mubr.bf16.vlgmr.msra.gmra.mxu0 %v212_v27  ;;  %v9895_v27 = vld [vmem:[#allocation5 + $0x370] sm:$0xff]  }
 0x102   :  { %9213 = vmatpush3.bf16.msra.mxu0 %v9802_v24  ;;  %2028 = vmatprep.mubr.bf16.mxu0 %v715_v42  ;;  %v722_v24 = vpack.c.bf16 %v314_v23, %v314_v23  ;;  %v727_v42 = vpack.c.bf16 %v319_v41, %v319_v41  ;;  %v9838_v23 = vld [vmem:[#allocation5 + $0xa0] sm:$0xff]   ;;  %v9857_v41 = vld [vmem:[#allocation5 + $0x1f8] sm:$0xff]  }
 0x103   :  { %9214 = vmatprep.subr.bf16.mxu0 %v9804_v26  ;;  %v9892_v26 = vld [vmem:[#allocation5 + $0x338] sm:$0xff]  }
 0x106   :  { %9215 = vmatpush3.bf16.msra.mxu0 %v9805_v28  ;;  %v9896_v28 = vld [vmem:[#allocation5 + $0x330] sm:$0xff]  }
 0x107   :  { %9216 = vmatprep.subr.bf16.mxu0 %v9807_v29  ;;  %v9899_v29 = vld [vmem:[#allocation5 + $0x368] sm:$0xff]  }
 0x10a   :  { %9217 = vmatpush3.bf16.msra.mxu0 %v9808_v30  ;;  %v9900_v30 = vld [vmem:[#allocation5 + $0x328] sm:$0xff]  }
 0x10b   :  { %9218 = vmatprep.subr.bf16.mxu0 %v9810_v31  ;;  %v9903_v31 = vld [vmem:[#allocation5 + $0x360] sm:$0xff]  }
 0x10e   :  { %9219 = vmatpush3.bf16.msra.mxu0 %v9811_v32  ;;  %v9904_v32 = vld [vmem:[#allocation5 + $0x320] sm:$0xff]  }
 0x10f   :  { %9220 = vmatprep.subr.bf16.mxu0 %v9813_v33  ;;  %v9907_v33 = vld [vmem:[#allocation5 + $0x358] sm:$0xff]  }
 0x112   :  { %9221 = vmatpush3.bf16.msra.mxu0 %v9814_v34  ;;  %v9908_v34 = vld [vmem:[#allocation5 + $0x318] sm:$0xff]  }
 0x113   :  { %9222 = vmatprep.subr.bf16.mxu0 %v9816_v35  ;;  %v9911_v35 = vld [vmem:[#allocation5 + $0x350] sm:$0xff]  }
 0x116   :  { %9223 = vmatpush3.bf16.msra.mxu0 %v9817_v36  ;;  %v9912_v36 = vld [vmem:[#allocation5 + $0x310] sm:$0xff]  }
 0x117   :  { %9224 = vmatprep.subr.bf16.mxu0 %v9819_v37  ;;  %v9915_v37 = vld [vmem:[#allocation5 + $0x348] sm:$0xff]  }
 0x11a   :  { %9225 = vmatpush3.bf16.msra.mxu0 %v9820_v38  ;;  %v9916_v38 = vld [vmem:[#allocation5 + $0x308] sm:$0xff]  }
 0x11b   :  { %9226 = vmatprep.subr.bf16.mxu0 %v9822_v39  ;;  %v9919_v39 = vld [vmem:[#allocation5 + $0x340] sm:$0xff]  }
 0x11e   :  { %9227 = vmatpush3.bf16.msra.mxu0 %v9823_v40  ;;  %v9920_v40 = vld [vmem:[#allocation5 + $0x300] sm:$0xff]  }
 0x11f   :  { %9256 = vmatprep.subr.bf16.mxu0 %v9827_v47  ;;  %v9927_v47 = vld [vmem:[#allocation5 + $0x470] sm:$0xff]  }
 0x121   :  { %2029 = vmatmul.mubr.bf16.vlgmr.msra.gmra.mxu0 %v714_v45  ;;  %v9923_v45 = vld [vmem:[#allocation5 + $0x478] sm:$0xff]  }
 0x122   :  { %9257 = vmatpush3.bf16.msra.mxu0 %v9828_v48  ;;  %2108 = vmatprep.mubr.bf16.mxu0 %v719_v2  ;;  %v9928_v48 = vld [vmem:[#allocation5 + $0x430] sm:$0xff]  }
 0x123   :  { %9258 = vmatprep.subr.bf16.mxu0 %v9831_v49  ;;  %v9931_v49 = vld [vmem:[#allocation5 + $0x468] sm:$0xff]  }
 0x126   :  { %9259 = vmatpush3.bf16.msra.mxu0 %v9832_v50  ;;  %v9932_v50 = vld [vmem:[#allocation5 + $0x428] sm:$0xff]  }
 0x127   :  { %9260 = vmatprep.subr.bf16.mxu0 %v9835_v51  ;;  %v9935_v51 = vld [vmem:[#allocation5 + $0x460] sm:$0xff]  }
 0x12a   :  { %9261 = vmatpush3.bf16.msra.mxu0 %v9836_v52  ;;  %v9936_v52 = vld [vmem:[#allocation5 + $0x420] sm:$0xff]  }
 0x12b   :  { %9262 = vmatprep.subr.bf16.mxu0 %v9839_v53  ;;  %v9939_v53 = vld [vmem:[#allocation5 + $0x458] sm:$0xff]  }
 0x12e   :  { %9263 = vmatpush3.bf16.msra.mxu0 %v9840_v54  ;;  %v9940_v54 = vld [vmem:[#allocation5 + $0x418] sm:$0xff]  }
 0x12f   :  { %9264 = vmatprep.subr.bf16.mxu0 %v9843_v55  ;;  %v9943_v55 = vld [vmem:[#allocation5 + $0x450] sm:$0xff]  }
 0x132   :  { %9265 = vmatpush3.bf16.msra.mxu0 %v9844_v56  ;;  %v9944_v56 = vld [vmem:[#allocation5 + $0x410] sm:$0xff]  }
 0x133   :  { %9266 = vmatprep.subr.bf16.mxu0 %v9847_v57  ;;  %v9947_v57 = vld [vmem:[#allocation5 + $0x448] sm:$0xff]  }
 0x136   :  { %9267 = vmatpush3.bf16.msra.mxu0 %v9848_v58  ;;  %v8383_v58 = vld [vmem:[#allocation16 + $0x2] ss:$0 sm:$0xff] }
 0x137   :  { %9268 = vmatprep.subr.bf16.mxu0 %v9851_v59  ;;  %v9948_v59 = vld [vmem:[#allocation5 + $0x408] sm:$0xff]  }
 0x13a   :  { %9269 = vmatpush3.bf16.msra.mxu0 %v9852_v60  ;;  %v309_v60 = vld [vmem:[#allocation2 + $0x18] sm:$0xff] }
 0x13b   :  { %9270 = vmatprep.subr.bf16.mxu0 %v9855_v61 }
 0x13e   :  { %9271 = vmatpush3.bf16.msra.mxu0 %v9856_v62 }
 0x13f   :  { %9300 = vmatprep.subr.bf16.mxu0 %v9859_v5  ;;  %v9952_v5 = vld [vmem:[#allocation5 + $0x400] sm:$0xff]  }
 0x141   :  { %2109 = vmatmul.mubr.bf16.vlgmr.msra.gmra.mxu0 %v718_v4  ;;  %v717_v4 = vpack.c.bf16 %v309_v60, %v309_v60  ;;  %v9874_v60 = vld [vmem:[#allocation5 + $0x198] sm:$0xff]  }
 0x142   :  { %9301 = vmatpush3.bf16.msra.mxu0 %v9860_v6  ;;  %2188 = vmatprep.mubr.bf16.mxu0 %v723_v22  ;;  %v9963_v22 = vld [vmem:[#allocation5 + $0x568] sm:$0xff]  }
 0x143   :  { %9302 = vmatprep.subr.bf16.mxu0 %v9863_v7  ;;  %v9829_v7 = vld [vmem:[#allocation5 + $0xf0] sm:$0xff]  }
 0x146   :  { %9303 = vmatpush3.bf16.msra.mxu0 %v9864_v8  ;;  %v323_v8 = vld [vmem:[#allocation2 + $0x88] sm:$0xff] }
 0x147   :  { %9304 = vmatprep.subr.bf16.mxu0 %v9867_v9 }
 0x14a   :  { %9305 = vmatpush3.bf16.msra.mxu0 %v9868_v10  ;;  %v731_v10 = vpack.c.bf16 %v323_v8, %v323_v8 }
 0x14b   :  { %9306 = vmatprep.subr.bf16.mxu0 %v9871_v11  ;;  %v322_v11 = vld [vmem:[#allocation2 + $0x80] sm:$0xff] }
 0x14e   :  { %9307 = vmatpush3.bf16.msra.mxu0 %v9872_v12  ;;  %v730_v12 = vpack.c.bf16 %v322_v11, %v322_v11 }
 0x14f   :  { %9308 = vmatprep.subr.bf16.mxu0 %v9875_v13  ;;  %v9955_v13 = vld [vmem:[#allocation5 + $0x578] sm:$0xff]  }
 0x152   :  { %9309 = vmatpush3.bf16.msra.mxu0 %v9876_v14 }
 0x153   :  { %9310 = vmatprep.subr.bf16.mxu0 %v9879_v15  ;;  %v9830_v15 = vld [vmem:[#allocation5 + $0xb0] sm:$0xff]  }
 0x156   :  { %9311 = vmatpush3.bf16.msra.mxu0 %v9880_v16  ;;  %v9956_v16 = vld [vmem:[#allocation5 + $0x538] sm:$0xff]  }
 0x157   :  { %9312 = vmatprep.subr.bf16.mxu0 %v9883_v17  ;;  %v9833_v17 = vld [vmem:[#allocation5 + $0xe8] sm:$0xff]  }
 0x15a   :  { %9313 = vmatpush3.bf16.msra.mxu0 %v9884_v18  ;;  %v9959_v18 = vld [vmem:[#allocation5 + $0x570] sm:$0xff]  }
 0x15b   :  { %9314 = vmatprep.subr.bf16.mxu0 %v9887_v19  ;;  %v9834_v19 = vld [vmem:[#allocation5 + $0xa8] sm:$0xff]  }
 0x15e   :  { %9315 = vmatpush3.bf16.msra.mxu0 %v9888_v20  ;;  %v9960_v20 = vld [vmem:[#allocation5 + $0x530] sm:$0xff]  }
 0x15f   :  { %9344 = vmatprep.subr.bf16.mxu0 %v9891_v25  ;;  %v9841_v25 = vld [vmem:[#allocation5 + $0xd8] sm:$0xff]  }
 0x161   :  { %2189 = vmatmul.mubr.bf16.vlgmr.msra.gmra.mxu0 %v722_v24  ;;  %v9964_v24 = vld [vmem:[#allocation5 + $0x528] sm:$0xff]  }
 0x162   :  { %9345 = vmatpush3.bf16.msra.mxu0 %v9892_v26  ;;  %2268 = vmatprep.mubr.bf16.mxu0 %v727_v42  ;;  %v9967_v26 = vld [vmem:[#allocation5 + $0x560] sm:$0xff]   ;;  %v9980_v42 = vld [vmem:[#allocation5 + $0x508] sm:$0xff]  }
 0x163   :  { %9346 = vmatprep.subr.bf16.mxu0 %v9895_v27  ;;  %v9842_v27 = vld [vmem:[#allocation5 + $0x98] sm:$0xff]  }
 0x166   :  { %9347 = vmatpush3.bf16.msra.mxu0 %v9896_v28  ;;  %v9968_v28 = vld [vmem:[#allocation5 + $0x520] sm:$0xff]  }
 0x167   :  { %9348 = vmatprep.subr.bf16.mxu0 %v9899_v29  ;;  %v9845_v29 = vld [vmem:[#allocation5 + $0xd0] sm:$0xff]  }
 0x16a   :  { %9349 = vmatpush3.bf16.msra.mxu0 %v9900_v30  ;;  %v9971_v30 = vld [vmem:[#allocation5 + $0x558] sm:$0xff]  }
 0x16b   :  { %9350 = vmatprep.subr.bf16.mxu0 %v9903_v31  ;;  %v9846_v31 = vld [vmem:[#allocation5 + $0x90] sm:$0xff]  }
 0x16e   :  { %9351 = vmatpush3.bf16.msra.mxu0 %v9904_v32  ;;  %v9972_v32 = vld [vmem:[#allocation5 + $0x518] sm:$0xff]  }
 0x16f   :  { %9352 = vmatprep.subr.bf16.mxu0 %v9907_v33  ;;  %v9849_v33 = vld [vmem:[#allocation5 + $0xc8] sm:$0xff]  }
 0x172   :  { %9353 = vmatpush3.bf16.msra.mxu0 %v9908_v34  ;;  %v9975_v34 = vld [vmem:[#allocation5 + $0x550] sm:$0xff]  }
 0x173   :  { %9354 = vmatprep.subr.bf16.mxu0 %v9911_v35  ;;  %v9850_v35 = vld [vmem:[#allocation5 + $0x88] sm:$0xff]  }
 0x176   :  { %9355 = vmatpush3.bf16.msra.mxu0 %v9912_v36  ;;  %v9976_v36 = vld [vmem:[#allocation5 + $0x510] sm:$0xff]  }
 0x177   :  { %9356 = vmatprep.subr.bf16.mxu0 %v9915_v37  ;;  %v9853_v37 = vld [vmem:[#allocation5 + $0xc0] sm:$0xff]  }
 0x17a   :  { %9357 = vmatpush3.bf16.msra.mxu0 %v9916_v38  ;;  %v9854_v38 = vld [vmem:[#allocation5 + $0x80] sm:$0xff]  }
 0x17b   :  { %9358 = vmatprep.subr.bf16.mxu0 %v9919_v39  ;;  %v308_v39 = vld [vmem:[#allocation2 + $0x10] sm:$0xff] }
 0x17e   :  { %9359 = vmatpush3.bf16.msra.mxu0 %v9920_v40  ;;  %v9979_v40 = vld [vmem:[#allocation5 + $0x548] sm:$0xff]  }
 0x17f   :  { %9388 = vmatprep.subr.bf16.mxu0 %v9923_v45  ;;  %v9983_v45 = vld [vmem:[#allocation5 + $0x540] sm:$0xff]  }
 0x181   :  { %2269 = vmatmul.mubr.bf16.vlgmr.msra.gmra.mxu0 %v726_v44  ;;  %v716_v44 = vpack.c.bf16 %v308_v39, %v308_v39 }
 0x182   :  { %9389 = vmatpush3.bf16.msra.mxu0 %v9924_v46  ;;  %2348 = vmatprep.mubr.bf16.mxu0 %v731_v10  ;;  %v9858_v46 = vld [vmem:[#allocation5 + $0x1b8] sm:$0xff]  }
 0x183   :  { %9390 = vmatprep.subr.bf16.mxu0 %v9927_v47  ;;  %v721_v47 = vpack.c.bf16 %v313_v43, %v313_v43  ;;  %v9890_v10 = vld [vmem:[#allocation5 + $0x2b8] sm:$0xff]   ;;  %v9933_v43 = vld [vmem:[#allocation5 + $0x3e0] sm:$0xff]  }
 0x186   :  { %9391 = vmatpush3.bf16.msra.mxu0 %v9928_v48  ;;  %v9984_v48 = vld [vmem:[#allocation5 + $0x500] sm:$0xff]  }
 0x187   :  { %9392 = vmatprep.subr.bf16.mxu0 %v9931_v49  ;;  %v9861_v49 = vld [vmem:[#allocation5 + $0x1f0] sm:$0xff]  }
 0x18a   :  { %9393 = vmatpush3.bf16.msra.mxu0 %v9932_v50  ;;  %v327_v50 = vld [vmem:[#allocation2 + $0xa8] sm:$0xff] }
 0x18b   :  { %9394 = vmatprep.subr.bf16.mxu0 %v9935_v51  ;;  %v735_v51 = vpack.c.bf16 %v327_v50, %v327_v50  ;;  %v9942_v50 = vld [vmem:[#allocation5 + $0x390] sm:$0xff]  }
 0x18e   :  { %9395 = vmatpush3.bf16.msra.mxu0 %v9936_v52  ;;  %v326_v52 = vld [vmem:[#allocation2 + $0xa0] sm:$0xff] }
 0x18f   :  { %9396 = vmatprep.subr.bf16.mxu0 %v9939_v53  ;;  %v734_v53 = vpack.c.bf16 %v326_v52, %v326_v52  ;;  %v9946_v52 = vld [vmem:[#allocation5 + $0x388] sm:$0xff]  }
 0x192   :  { %9397 = vmatpush3.bf16.msra.mxu0 %v9940_v54  ;;  %v9862_v54 = vld [vmem:[#allocation5 + $0x1b0] sm:$0xff]  }
 0x193   :  { %9398 = vmatprep.subr.bf16.mxu0 %v9943_v55  ;;  %v9865_v55 = vld [vmem:[#allocation5 + $0x1e8] sm:$0xff]  }
 0x196   :  { %9399 = vmatpush3.bf16.msra.mxu0 %v9944_v56  ;;  %v9866_v56 = vld [vmem:[#allocation5 + $0x1a8] sm:$0xff]  }
 0x197   :  { %9400 = vmatprep.subr.bf16.mxu0 %v9947_v57  ;;  %v9869_v57 = vld [vmem:[#allocation5 + $0x1e0] sm:$0xff]  }
 0x19a   :  { %9401 = vmatpush3.bf16.msra.mxu0 %v9948_v59  ;;  %v9873_v59 = vld [vmem:[#allocation5 + $0x1d8] sm:$0xff]  }
 0x19b   :  { %9402 = vmatprep.subr.bf16.mxu0 %v9951_v63  ;;  %v9881_v63 = vld [vmem:[#allocation5 + $0x1c8] sm:$0xff]  }
 0x19e   :  { %9403 = vmatpush3.bf16.msra.mxu0 %v9952_v5  ;;  %v312_v5 = vld [vmem:[#allocation2 + $0x30] sm:$0xff] }
 0x19f   :  { %9432 = vmatprep.subr.bf16.mxu0 %v9955_v13  ;;  %v720_v8 = vpack.c.bf16 %v312_v5, %v312_v5 }
 0x1a1   :  { %2349 = vmatmul.mubr.bf16.vlgmr.msra.gmra.mxu0 %v730_v12  ;;  %v9893_v12 = vld [vmem:[#allocation5 + $0x2f0] sm:$0xff]  }
 0x1a2   :  { %9433 = vmatpush3.bf16.msra.mxu0 %v9956_v16  ;;  %2428 = vmatprep.mubr.bf16.mxu0 %v735_v51  ;;  %v9894_v16 = vld [vmem:[#allocation5 + $0x2b0] sm:$0xff]   ;;  %v9945_v51 = vld [vmem:[#allocation5 + $0x3c8] sm:$0xff]  }
 0x1a3   :  { %9434 = vmatprep.subr.bf16.mxu0 %v9959_v18 }
 0x1a6   :  { %9435 = vmatpush3.bf16.msra.mxu0 %v9960_v20  ;;  %v9901_v20 = vld [vmem:[#allocation5 + $0x2e0] sm:$0xff]  }
 0x1a7   :  { %9436 = vmatprep.subr.bf16.mxu0 %v9963_v22  ;;  %v9905_v22 = vld [vmem:[#allocation5 + $0x2d8] sm:$0xff]  }
 0x1aa   :  { %9437 = vmatpush3.bf16.msra.mxu0 %v9964_v24  ;;  %v9909_v24 = vld [vmem:[#allocation5 + $0x2d0] sm:$0xff]  }
 0x1ab   :  { %9438 = vmatprep.subr.bf16.mxu0 %v9967_v26  ;;  %v9913_v26 = vld [vmem:[#allocation5 + $0x2c8] sm:$0xff]  }
 0x1ae   :  { %9439 = vmatpush3.bf16.msra.mxu0 %v9968_v28  ;;  %v9917_v28 = vld [vmem:[#allocation5 + $0x2c0] sm:$0xff]  }
 0x1af   :  { %9440 = vmatprep.subr.bf16.mxu0 %v9971_v30  ;;  %v316_v30 = vld [vmem:[#allocation2 + $0x50] sm:$0xff] }
 0x1b2   :  { %9441 = vmatpush3.bf16.msra.mxu0 %v9972_v32  ;;  %v321_v32 = vld [vmem:[#allocation2 + $0x78] sm:$0xff] }
 0x1b3   :  { %9442 = vmatprep.subr.bf16.mxu0 %v9975_v34  ;;  %v9922_v34 = vld [vmem:[#allocation5 + $0x3b8] sm:$0xff]  }
 0x1b6   :  { %9443 = vmatpush3.bf16.msra.mxu0 %v9976_v36  ;;  %v9925_v36 = vld [vmem:[#allocation5 + $0x3f0] sm:$0xff]  }
 0x1b7   :  { %9444 = vmatprep.subr.bf16.mxu0 %v9979_v40 }
 0x1ba   :  { %9445 = vmatpush3.bf16.msra.mxu0 %v9980_v42 }
 0x1bb   :  { %9446 = vmatprep.subr.bf16.mxu0 %v9983_v45 }
 0x1be   :  { %9447 = vmatpush3.bf16.msra.mxu0 %v9984_v48  ;;  %v9938_v48 = vld [vmem:[#allocation5 + $0x398] sm:$0xff]  }
 0x1bf   :  { %9610 = vmatprep.subr.bf16.mxu0 %v10822_v1 }
 0x1c1   :  { %v300_v61 = vpop.f32.mrf.mxu0  ;;  %2429 = vmatmul.mubr.bf16.vlgmr.msra.gmra.mxu0 %v734_v53  ;;  %v9949_v53 = vld [vmem:[#allocation5 + $0x3c0] sm:$0xff]  }
 0x1c2   :  { %v301_v62 = vadd.f32 %v8383_v58, %v300_v61  ;;  %9626 = vmatprep.mubr.msk.bf16.mxu0 %vm10823_vm0, %v10822_v1  ;;  %v9870_v58 = vld [vmem:[#allocation5 + $0x1a0] sm:$0xff]   ;;  %v9877_v61 = vld [vmem:[#allocation5 + $0x1d0] sm:$0xff]  }
 0x1c3   :  { %v9588_v2 = vpop.f32.mrf.mxu0 }
 0x1c4   :  { %v755_v6 = vpack.c.bf16 %v301_v62, %v301_v62  ;;  %v9878_v62 = vld [vmem:[#allocation5 + $0x190] sm:$0xff]   ;;  %v9882_v2 = vld [vmem:[#allocation5 + $0x188] sm:$0xff]  }
 0x1c5   :  { %v303_v9 = vpop.f32.mrf.mxu0 }
 0x1c6   :  { %9607 = vmatmul.mubr.bf16.vlgmr.msra.gmra.mxu1 %v755_v6  ;;  %v9889_v6 = vld [vmem:[#allocation5 + $0x2f8] sm:$0xff]  }
 0x1c7   :  { %9235 = vmatpush3.bf16.msra.mxu1 %v9826_v3  ;;  %v9589_v14 = vpop.f32.mrf.mxu0  ;;  %2068 = vmatprep.mubr.bf16.mxu1 %v717_v4  ;;  %v9885_v3 = vld [vmem:[#allocation5 + $0x1c0] sm:$0xff]  }
 0x1c8   :  { %9236 = vmatprep.subr.bf16.mxu1 %v9829_v7  ;;  %v9886_v4 = vld [vmem:[#allocation5 + $0x180] sm:$0xff]   ;;  %v317_v7 = vld [vmem:[#allocation2 + $0x58] sm:$0xff] }
 0x1c9   :  { %v725_v11 = vpack.c.bf16 %v317_v7, %v317_v7 }
 0x1cb   :  { %9237 = vmatpush3.bf16.msra.mxu1 %v9830_v15 }
 0x1cc   :  { %9238 = vmatprep.subr.bf16.mxu1 %v9833_v17  ;;  %v9897_v17 = vld [vmem:[#allocation5 + $0x2e8] sm:$0xff]  }
 0x1cf   :  { %9239 = vmatpush3.bf16.msra.mxu1 %v9834_v19  ;;  %v9898_v19 = vld [vmem:[#allocation5 + $0x2a8] sm:$0xff]  }
 0x1d0   :  { %9240 = vmatprep.subr.bf16.mxu1 %v9837_v21  ;;  %v9902_v21 = vld [vmem:[#allocation5 + $0x2a0] sm:$0xff]  }
 0x1d3   :  { %9241 = vmatpush3.bf16.msra.mxu1 %v9838_v23  ;;  %v9906_v23 = vld [vmem:[#allocation5 + $0x298] sm:$0xff]  }
 0x1d4   :  { %9242 = vmatprep.subr.bf16.mxu1 %v9841_v25  ;;  %v9910_v25 = vld [vmem:[#allocation5 + $0x290] sm:$0xff]  }
 0x1d7   :  { %9243 = vmatpush3.bf16.msra.mxu1 %v9842_v27  ;;  %v9914_v27 = vld [vmem:[#allocation5 + $0x288] sm:$0xff]  }
 0x1d8   :  { %9244 = vmatprep.subr.bf16.mxu1 %v9845_v29  ;;  %v9918_v29 = vld [vmem:[#allocation5 + $0x280] sm:$0xff]  }
 0x1db   :  { %9245 = vmatpush3.bf16.msra.mxu1 %v9846_v31  ;;  %v9921_v31 = vld [vmem:[#allocation5 + $0x3f8] sm:$0xff]  }
 0x1dc   :  { %9246 = vmatprep.subr.bf16.mxu1 %v9849_v33  ;;  %v724_v33 = vpack.c.bf16 %v316_v30, %v316_v30  ;;  %v9990_v30 = vld [vmem:[#allocation5 + $0x5a8] sm:$0xff]  }
 0x1df   :  { %9247 = vmatpush3.bf16.msra.mxu1 %v9850_v35  ;;  %v729_v35 = vpack.c.bf16 %v321_v32, %v321_v32  ;;  %v9991_v32 = vld [vmem:[#allocation5 + $0x5e0] sm:$0xff]  }
 0x1e0   :  { %9248 = vmatprep.subr.bf16.mxu1 %v9853_v37  ;;  %v9926_v37 = vld [vmem:[#allocation5 + $0x3b0] sm:$0xff]  }
 0x1e1   :  { %v9228_v9 = vpop.f32.mrf.mxu0 }
 0x1e3   :  { %9249 = vmatpush3.bf16.msra.mxu1 %v9854_v38  ;;  %v9229_v13 = vpop.f32.mrf.mxu0  ;;  %v9929_v38 = vld [vmem:[#allocation5 + $0x3e8] sm:$0xff]  }
 0x1e4   :  { %9278 = vmatprep.subr.bf16.mxu1 %v9857_v41  ;;  %v10968_v14 = vadd.f32 %v9229_v13, %v9228_v9  ;;  %v9930_v41 = vld [vmem:[#allocation5 + $0x3a8] sm:$0xff]   ;;  %v9966_v9 = vld [vmem:[#allocation5 + $0x4a0] sm:$0xff]   ;;  %v9974_v13 = vld [vmem:[#allocation5 + $0x490] sm:$0xff]  }
 0x1e5   :  { %v9231_v15 = vpop.f32.mrf.mxu0 }
 0x1e6   :  { %2069 = vmatmul.mubr.bf16.vlgmr.msra.gmra.mxu1 %v716_v44  ;;  %v9977_v15 = vld [vmem:[#allocation5 + $0x4c8] sm:$0xff]  }
 0x1e7   :  { %9279 = vmatpush3.bf16.msra.mxu1 %v9858_v46  ;;  %2148 = vmatprep.mubr.bf16.mxu1 %v721_v47  ;;  %v9232_v18 = vpop.f32.mrf.mxu0  ;;  %v9934_v46 = vld [vmem:[#allocation5 + $0x3a0] sm:$0xff]   ;;  %v9937_v47 = vld [vmem:[#allocation5 + $0x3d8] sm:$0xff]  }
 0x1e8   :  { %9280 = vmatprep.subr.bf16.mxu1 %v9861_v49  ;;  %v9941_v49 = vld [vmem:[#allocation5 + $0x3d0] sm:$0xff]   ;;  %v9982_v18 = vld [vmem:[#allocation5 + $0x480] sm:$0xff]  }
 0x1eb   :  { %9281 = vmatpush3.bf16.msra.mxu1 %v9862_v54  ;;  %v9950_v54 = vld [vmem:[#allocation5 + $0x380] sm:$0xff]  }
 0x1ec   :  { %9282 = vmatprep.subr.bf16.mxu1 %v9865_v55  ;;  %v320_v55 = vld [vmem:[#allocation2 + $0x70] sm:$0xff] }
 0x1ef   :  { %9283 = vmatpush3.bf16.msra.mxu1 %v9866_v56  ;;  %v9953_v56 = vld [vmem:[#allocation5 + $0x4f8] sm:$0xff]  }
 0x1f0   :  { %9284 = vmatprep.subr.bf16.mxu1 %v9869_v57  ;;  %v325_v57 = vld [vmem:[#allocation2 + $0x98] sm:$0xff] }
 0x1f3   :  { %9285 = vmatpush3.bf16.msra.mxu1 %v9870_v58  ;;  %v728_v58 = vpack.c.bf16 %v320_v55, %v320_v55 }
 0x1f4   :  { %9286 = vmatprep.subr.bf16.mxu1 %v9873_v59  ;;  %v9954_v59 = vld [vmem:[#allocation5 + $0x4b8] sm:$0xff]  }
 0x1f7   :  { %9287 = vmatpush3.bf16.msra.mxu1 %v9874_v60  ;;  %v733_v60 = vpack.c.bf16 %v325_v57, %v325_v57 }
 0x1f8   :  { %9288 = vmatprep.subr.bf16.mxu1 %v9877_v61  ;;  %v9957_v61 = vld [vmem:[#allocation5 + $0x4f0] sm:$0xff]  }
 0x1fb   :  { %9289 = vmatpush3.bf16.msra.mxu1 %v9878_v62  ;;  %v9958_v62 = vld [vmem:[#allocation5 + $0x4b0] sm:$0xff]  }
 0x1fc   :  { %9290 = vmatprep.subr.bf16.mxu1 %v9881_v63  ;;  %v9961_v63 = vld [vmem:[#allocation5 + $0x4e8] sm:$0xff]  }
 0x1ff   :  { %9291 = vmatpush3.bf16.msra.mxu1 %v9882_v2 }
 0x200   :  { %9292 = vmatprep.subr.bf16.mxu1 %v9885_v3 }
 0x201   :  { %v9272_v39 = vpop.f32.mrf.mxu0 }
 0x203   :  { %9293 = vmatpush3.bf16.msra.mxu1 %v9886_v4  ;;  %v9273_v40 = vpop.f32.mrf.mxu0  ;;  %v9962_v4 = vld [vmem:[#allocation5 + $0x4a8] sm:$0xff]  }
 0x204   :  { %9322 = vmatprep.subr.bf16.mxu1 %v9889_v6  ;;  %v10970_v42 = vadd.f32 %v9273_v40, %v9272_v39  ;;  %v9965_v6 = vld [vmem:[#allocation5 + $0x4e0] sm:$0xff]   ;;  %v9996_v39 = vld [vmem:[#allocation5 + $0x590] sm:$0xff]   ;;  %v9997_v40 = vld [vmem:[#allocation5 + $0x5c8] sm:$0xff]  }
 0x205   :  { %v9275_v44 = vpop.f32.mrf.mxu0 }
 0x206   :  { %2149 = vmatmul.mubr.bf16.vlgmr.msra.gmra.mxu1 %v720_v8  ;;  %v10000_v44 = vld [vmem:[#allocation5 + $0x580] sm:$0xff]  }
 0x207   :  { %9323 = vmatpush3.bf16.msra.mxu1 %v9890_v10  ;;  %2228 = vmatprep.mubr.bf16.mxu1 %v725_v11  ;;  %v9276_v45 = vpop.f32.mrf.mxu0  ;;  %v9969_v10 = vld [vmem:[#allocation5 + $0x4d8] sm:$0xff]  }
 0x208   :  { %9324 = vmatprep.subr.bf16.mxu1 %v9893_v12  ;;  %v9970_v11 = vld [vmem:[#allocation5 + $0x498] sm:$0xff]   ;;  %v9973_v12 = vld [vmem:[#allocation5 + $0x4d0] sm:$0xff]  }
 0x209   :  { %v328_v45 = vld [vmem:[#allocation2 + $0xb0] sm:$0xff] }
 0x20b   :  { %9325 = vmatpush3.bf16.msra.mxu1 %v9894_v16  ;;  %v9978_v16 = vld [vmem:[#allocation5 + $0x488] sm:$0xff]  }
 0x20c   :  { %9326 = vmatprep.subr.bf16.mxu1 %v9897_v17  ;;  %v9981_v17 = vld [vmem:[#allocation5 + $0x4c0] sm:$0xff]  }
 0x20f   :  { %9327 = vmatpush3.bf16.msra.mxu1 %v9898_v19  ;;  %v324_v19 = vld [vmem:[#allocation2 + $0x90] sm:$0xff] }
 0x210   :  { %9328 = vmatprep.subr.bf16.mxu1 %v9901_v20  ;;  %v9985_v20 = vld [vmem:[#allocation5 + $0x5f8] sm:$0xff]  }
 0x213   :  { %9329 = vmatpush3.bf16.msra.mxu1 %v9902_v21  ;;  %v329_v21 = vld [vmem:[#allocation2 + $0xb8] sm:$0xff] }
 0x214   :  { %9330 = vmatprep.subr.bf16.mxu1 %v9905_v22  ;;  %v732_v22 = vpack.c.bf16 %v324_v19, %v324_v19 }
 0x217   :  { %9331 = vmatpush3.bf16.msra.mxu1 %v9906_v23  ;;  %v9986_v23 = vld [vmem:[#allocation5 + $0x5b8] sm:$0xff]  }
 0x218   :  { %9332 = vmatprep.subr.bf16.mxu1 %v9909_v24  ;;  %v737_v24 = vpack.c.bf16 %v329_v21, %v329_v21  ;;  %v10008_v21 = vld [vmem:[#allocation7 + $0x80] sm:$0xff]  }
 0x21b   :  { %9333 = vmatpush3.bf16.msra.mxu1 %v9910_v25  ;;  %v9987_v25 = vld [vmem:[#allocation5 + $0x5f0] sm:$0xff]  }
 0x21c   :  { %9334 = vmatprep.subr.bf16.mxu1 %v9913_v26  ;;  %v9988_v26 = vld [vmem:[#allocation5 + $0x5b0] sm:$0xff]  }
 0x21f   :  { %9335 = vmatpush3.bf16.msra.mxu1 %v9914_v27  ;;  %v9989_v27 = vld [vmem:[#allocation5 + $0x5e8] sm:$0xff]  }
 0x220   :  { %9336 = vmatprep.subr.bf16.mxu1 %v9917_v28 }
 0x221   :  { %v9316_v2 = vpop.f32.mrf.mxu0 }
 0x223   :  { %9337 = vmatpush3.bf16.msra.mxu1 %v9918_v29  ;;  %v9317_v3 = vpop.f32.mrf.mxu0 }
 0x224   :  { %9366 = vmatprep.subr.bf16.mxu1 %v9921_v31  ;;  %v10972_v5 = vadd.f32 %v9317_v3, %v9316_v2 }
 0x225   :  { %v9319_v7 = vpop.f32.mrf.mxu0 }
 0x226   :  { %2229 = vmatmul.mubr.bf16.vlgmr.msra.gmra.mxu1 %v724_v33  ;;  %v10002_v7 = vld [vmem:[#allocation7 + $0xb0] sm:$0xff]  }
 0x227   :  { %9367 = vmatpush3.bf16.msra.mxu1 %v9922_v34  ;;  %2308 = vmatprep.mubr.bf16.mxu1 %v729_v35  ;;  %v9320_v8 = vpop.f32.mrf.mxu0  ;;  %v9992_v35 = vld [vmem:[#allocation5 + $0x5a0] sm:$0xff]  }
 0x228   :  { %9368 = vmatprep.subr.bf16.mxu1 %v9925_v36  ;;  %v9993_v36 = vld [vmem:[#allocation5 + $0x5d8] sm:$0xff]  }
 0x22b   :  { %9369 = vmatpush3.bf16.msra.mxu1 %v9926_v37  ;;  %v9994_v37 = vld [vmem:[#allocation5 + $0x598] sm:$0xff]  }
 0x22c   :  { %9370 = vmatprep.subr.bf16.mxu1 %v9929_v38  ;;  %v9995_v38 = vld [vmem:[#allocation5 + $0x5d0] sm:$0xff]  }
 0x22f   :  { %9371 = vmatpush3.bf16.msra.mxu1 %v9930_v41  ;;  %v9998_v41 = vld [vmem:[#allocation5 + $0x588] sm:$0xff]  }
 0x230   :  { %9372 = vmatprep.subr.bf16.mxu1 %v9933_v43  ;;  %v9999_v43 = vld [vmem:[#allocation5 + $0x5c0] sm:$0xff]  }
 0x233   :  { %9373 = vmatpush3.bf16.msra.mxu1 %v9934_v46  ;;  %v736_v46 = vpack.c.bf16 %v328_v45, %v328_v45 }
 0x234   :  { %9374 = vmatprep.subr.bf16.mxu1 %v9937_v47 }
 0x237   :  { %9375 = vmatpush3.bf16.msra.mxu1 %v9938_v48 }
 0x238   :  { %9376 = vmatprep.subr.bf16.mxu1 %v9941_v49 }
 0x23b   :  { %9377 = vmatpush3.bf16.msra.mxu1 %v9942_v50 }
 0x23c   :  { %9378 = vmatprep.subr.bf16.mxu1 %v9945_v51 }
 0x23f   :  { %9379 = vmatpush3.bf16.msra.mxu1 %v9946_v52 }
 0x240   :  { %9380 = vmatprep.subr.bf16.mxu1 %v9949_v53 }
 0x241   :  { %v9360_v28 = vpop.f32.mrf.mxu0 }
 0x243   :  { %9381 = vmatpush3.bf16.msra.mxu1 %v9950_v54  ;;  %v9361_v29 = vpop.f32.mrf.mxu0 }
 0x244   :  { %9410 = vmatprep.subr.bf16.mxu1 %v9953_v56  ;;  %v10974_v31 = vadd.f32 %v9361_v29, %v9360_v28 }
 0x245   :  { %v9363_v33 = vpop.f32.mrf.mxu0 }
 0x246   :  { %2309 = vmatmul.mubr.bf16.vlgmr.msra.gmra.mxu1 %v728_v58 }
 0x247   :  { %9411 = vmatpush3.bf16.msra.mxu1 %v9954_v59  ;;  %2388 = vmatprep.mubr.bf16.mxu1 %v733_v60  ;;  %v9364_v34 = vpop.f32.mrf.mxu0 }
 0x248   :  { %9412 = vmatprep.subr.bf16.mxu1 %v9957_v61 }
 0x24b   :  { %9413 = vmatpush3.bf16.msra.mxu1 %v9958_v62 }
 0x24c   :  { %9414 = vmatprep.subr.bf16.mxu1 %v9961_v63 }
 0x24f   :  { %9415 = vmatpush3.bf16.msra.mxu1 %v9962_v4  ;;  %v10001_v4 = vld [vmem:[#allocation7 + $0xb8] sm:$0xff]  }
 0x250   :  { %9416 = vmatprep.subr.bf16.mxu1 %v9965_v6  ;;  %9611 = vmatpush3.bf16.msra.mxu0 %v10001_v4  ;;  %v10016_v4 = vld [vmem:[#allocation7 + $0xc0] sm:$0xff]  }
 0x251   :  { %9612 = vmatprep.subr.bf16.mxu0 %v10822_v1 }
 0x253   :  { %9417 = vmatpush3.bf16.msra.mxu1 %v9966_v9  ;;  %v10003_v9 = vld [vmem:[#allocation7 + $0xa8] sm:$0xff]  }
 0x254   :  { %9418 = vmatprep.subr.bf16.mxu1 %v9969_v10  ;;  %9613 = vmatpush3.bf16.msra.mxu0 %v10002_v7  ;;  %v10004_v10 = vld [vmem:[#allocation7 + $0xa0] sm:$0xff]  }
 0x255   :  { %9614 = vmatprep.subr.bf16.mxu0 %v10822_v1 }
 0x257   :  { %9419 = vmatpush3.bf16.msra.mxu1 %v9970_v11  ;;  %v10005_v11 = vld [vmem:[#allocation7 + $0x98] sm:$0xff]  }
 0x258   :  { %9420 = vmatprep.subr.bf16.mxu1 %v9973_v12  ;;  %9615 = vmatpush3.bf16.msra.mxu0 %v10003_v9  ;;  %v10006_v12 = vld [vmem:[#allocation7 + $0x90] sm:$0xff]  }
 0x259   :  { %9616 = vmatprep.subr.bf16.mxu0 %v10822_v1 }
 0x25b   :  { %9421 = vmatpush3.bf16.msra.mxu1 %v9974_v13 }
 0x25c   :  { %9422 = vmatprep.subr.bf16.mxu1 %v9977_v15  ;;  %9617 = vmatpush3.bf16.msra.mxu0 %v10004_v10 }
 0x25d   :  { %9618 = vmatprep.subr.bf16.mxu0 %v10822_v1 }
 0x25f   :  { %9423 = vmatpush3.bf16.msra.mxu1 %v9978_v16 }
 0x260   :  { %9424 = vmatprep.subr.bf16.mxu1 %v9981_v17  ;;  %9619 = vmatpush3.bf16.msra.mxu0 %v10005_v11  ;;  %v10007_v17 = vld [vmem:[#allocation7 + $0x88] sm:$0xff]  }
 0x261   :  { %v9404_v50 = vpop.f32.mrf.mxu0  ;;  %9620 = vmatprep.subr.bf16.mxu0 %v10822_v1 }
 0x263   :  { %9425 = vmatpush3.bf16.msra.mxu1 %v9982_v18  ;;  %v9405_v52 = vpop.f32.mrf.mxu0 }
 0x264   :  { %9454 = vmatprep.subr.bf16.mxu1 %v9985_v20  ;;  %v9406_v54 = vadd.f32 %v9405_v52, %v9404_v50  ;;  %9621 = vmatpush3.bf16.msra.mxu0 %v10006_v12 }
 0x265   :  { %v9407_v55 = vpop.f32.mrf.mxu0  ;;  %9622 = vmatprep.subr.bf16.mxu0 %v10822_v1 }
 0x266   :  { %2389 = vmatmul.mubr.bf16.vlgmr.msra.gmra.mxu1 %v732_v22 }
 0x267   :  { %9455 = vmatpush3.bf16.msra.mxu1 %v9986_v23  ;;  %2468 = vmatprep.mubr.bf16.mxu1 %v737_v24  ;;  %v9408_v56 = vpop.f32.mrf.mxu0 }
 0x268   :  { %9456 = vmatprep.subr.bf16.mxu1 %v9987_v25  ;;  %9623 = vmatpush3.bf16.msra.mxu0 %v10007_v17 }
 0x269   :  { %9624 = vmatprep.subr.bf16.mxu0 %v10822_v1 }
 0x26b   :  { %9457 = vmatpush3.bf16.msra.mxu1 %v9988_v26 }
 0x26c   :  { %9458 = vmatprep.subr.bf16.mxu1 %v9989_v27  ;;  %9625 = vmatpush3.bf16.msra.mxu0 %v10008_v21 }
 0x26d   :  { %9650 = vmatprep.subr.bf16.mxu0 %v10822_v1 }
 0x26f   :  { %9459 = vmatpush3.bf16.msra.mxu1 %v9990_v30 }
 0x270   :  { %9460 = vmatprep.subr.bf16.mxu1 %v9991_v32 }
 0x273   :  { %9461 = vmatpush3.bf16.msra.mxu1 %v9992_v35 }
 0x274   :  { %9462 = vmatprep.subr.bf16.mxu1 %v9993_v36 }
 0x277   :  { %9463 = vmatpush3.bf16.msra.mxu1 %v9994_v37 }
 0x278   :  { %9464 = vmatprep.subr.bf16.mxu1 %v9995_v38 }
 0x27b   :  { %9465 = vmatpush3.bf16.msra.mxu1 %v9996_v39 }
 0x27c   :  { %9466 = vmatprep.subr.bf16.mxu1 %v9997_v40 }
 0x27f   :  { %9467 = vmatpush3.bf16.msra.mxu1 %v9998_v41 }
 0x280   :  { %9468 = vmatprep.subr.bf16.mxu1 %v9999_v43 }
 0x281   :  { %v9448_v60 = vpop.f32.mrf.mxu0 }
 0x283   :  { %9469 = vmatpush3.bf16.msra.mxu1 %v10000_v44  ;;  %v9449_v63 = vpop.f32.mrf.mxu0 }
 0x284   :  { %9630 = vmatprep.subr.bf16.mxu1 %v10822_v1 }
 0x285   :  { %v9451_v6 = vpop.f32.mrf.mxu0 }
 0x286   :  { %2469 = vmatmul.mubr.bf16.vlgmr.msra.gmra.mxu1 %v736_v46  ;;  %v838_v47 = vpop.f32.mrf.mxu1 }
 0x287   :  { %v2031_v48 = vadd.f32 %v10968_v14, %v838_v47  ;;  %9646 = vmatprep.mubr.msk.bf16.mxu1 %vm10823_vm0, %v10822_v1  ;;  %v9450_v14 = vadd.f32 %v9449_v63, %v9448_v60  ;;  %v9452_v8 = vpop.f32.mrf.mxu0  ;;  %v8592_v47 = vld [vmem:[#allocation16 + $0x3] ss:$0 sm:$0xff]  ;;  %v10009_v60 = vld [vmem:[#allocation7 + $0xf8] sm:$0xff]  }
 0x288   :  { %v9608_v49 = vpop.f32.mrf.mxu1  ;;  %9631 = vmatpush3.bf16.msra.mxu1 %v10009_v60  ;;  %v10012_v63 = vld [vmem:[#allocation7 + $0xe0] sm:$0xff]  }
 0x289   :  { %9632 = vmatprep.subr.bf16.mxu1 %v10822_v1 }
 0x28a   :  { %v841_v51 = vpop.f32.mrf.mxu1 }
 0x28c   :  { %v9609_v53 = vpop.f32.mrf.mxu1 }
 0x28d   :  { %v8593_v53 = vld [vmem:[#allocation16 + $0x4] ss:$0 sm:$0xff] }
 0x2a6   :  { %v9250_v57 = vpop.f32.mrf.mxu1 }
 0x2a8   :  { %v9251_v58 = vpop.f32.mrf.mxu1 }
 0x2a9   :  { %v9252_v59 = vadd.f32 %v9251_v58, %v9250_v57 }
 0x2aa   :  { %v9253_v61 = vpop.f32.mrf.mxu1 }
 0x2ab   :  { %v2071_v62 = vadd.f32 %v9252_v59, %v2031_v48  ;;  %v10010_v61 = vld [vmem:[#allocation7 + $0xf0] sm:$0xff]  }
 0x2ac   :  { %v9254_v2 = vpop.f32.mrf.mxu1  ;;  %9633 = vmatpush3.bf16.msra.mxu1 %v10010_v61 }
 0x2ad   :  { %v2111_v3 = vadd.f32 %v10970_v42, %v2071_v62  ;;  %9634 = vmatprep.subr.bf16.mxu1 %v10822_v1  ;;  %v10011_v62 = vld [vmem:[#allocation7 + $0xe8] sm:$0xff]   ;;  %v10013_v2 = vld [vmem:[#allocation7 + $0xd8] sm:$0xff]  }
 0x2b0   :  { %9635 = vmatpush3.bf16.msra.mxu1 %v10011_v62 }
 0x2b1   :  { %9636 = vmatprep.subr.bf16.mxu1 %v10822_v1 }
 0x2b4   :  { %9637 = vmatpush3.bf16.msra.mxu1 %v10012_v63  ;;  %v10025_v63 = vld [vmem:[#allocation7 + $0x178] sm:$0xff]  }
 0x2b5   :  { %9638 = vmatprep.subr.bf16.mxu1 %v10822_v1 }
 0x2b8   :  { %9639 = vmatpush3.bf16.msra.mxu1 %v10013_v2  ;;  %v10027_v2 = vld [vmem:[#allocation7 + $0x168] sm:$0xff]  }
 0x2b9   :  { %9640 = vmatprep.subr.bf16.mxu1 %v10822_v1 }
 0x2c6   :  { %v9294_v42 = vpop.f32.mrf.mxu1 }
 0x2c8   :  { %v9295_v13 = vpop.f32.mrf.mxu1 }
 0x2c9   :  { %v9296_v15 = vadd.f32 %v9295_v13, %v9294_v42 }
 0x2ca   :  { %v9297_v16 = vpop.f32.mrf.mxu1 }
 0x2cb   :  { %v2151_v18 = vadd.f32 %v9296_v15, %v2111_v3  ;;  %v10015_v3 = vld [vmem:[#allocation7 + $0xc8] sm:$0xff]   ;;  %v8602_v16 = vld [vmem:[#allocation16 + $0x5] ss:$0 sm:$0xff] }
 0x2cc   :  { %v9298_v19 = vpop.f32.mrf.mxu1 }
 0x2cd   :  { %v2191_v20 = vadd.f32 %v10972_v5, %v2151_v18  ;;  %v8603_v18 = vld [vmem:[#allocation16 + $0x6] ss:$0 sm:$0xff] }
 0x2e6   :  { %v9338_v22 = vpop.f32.mrf.mxu1 }
 0x2e8   :  { %v9339_v23 = vpop.f32.mrf.mxu1 }
 0x2e9   :  { %v9340_v24 = vadd.f32 %v9339_v23, %v9338_v22  ;;  %v8604_v22 = vld [vmem:[#allocation16 + $0x7] ss:$0 sm:$0xff] }
 0x2ea   :  { %v9341_v25 = vpop.f32.mrf.mxu1 }
 0x2eb   :  { %v2231_v26 = vadd.f32 %v9340_v24, %v2191_v20 }
 0x2ec   :  { %v9342_v27 = vpop.f32.mrf.mxu1 }
 0x2ed   :  { %v2271_v28 = vadd.f32 %v10974_v31, %v2231_v26 }
 0x306   :  { %v9382_v29 = vpop.f32.mrf.mxu1 }
 0x308   :  { %v9383_v30 = vpop.f32.mrf.mxu1 }
 0x309   :  { %v9384_v32 = vadd.f32 %v9383_v30, %v9382_v29  ;;  %v10017_v29 = vld [vmem:[#allocation7 + $0x138] sm:$0xff]   ;;  %v10018_v30 = vld [vmem:[#allocation7 + $0x130] sm:$0xff]  }
 0x30a   :  { %v9385_v33 = vpop.f32.mrf.mxu1 }
 0x30b   :  { %v2311_v34 = vadd.f32 %v9384_v32, %v2271_v28  ;;  %v10019_v32 = vld [vmem:[#allocation7 + $0x128] sm:$0xff]   ;;  %v10020_v33 = vld [vmem:[#allocation7 + $0x120] sm:$0xff]  }
 0x30c   :  { %v9386_v5 = vpop.f32.mrf.mxu1 }
 0x30d   :  { %v2351_v35 = vadd.f32 %v9406_v54, %v2311_v34  ;;  %v10021_v34 = vld [vmem:[#allocation7 + $0x118] sm:$0xff]   ;;  %v10022_v5 = vld [vmem:[#allocation7 + $0x110] sm:$0xff]  }
 0x326   :  { %v9426_v36 = vpop.f32.mrf.mxu1 }
 0x328   :  { %v9427_v37 = vpop.f32.mrf.mxu1 }
 0x329   :  { %v9428_v38 = vadd.f32 %v9427_v37, %v9426_v36  ;;  %v10024_v36 = vld [vmem:[#allocation7 + $0x100] sm:$0xff]  }
 0x32a   :  { %v9429_v39 = vpop.f32.mrf.mxu1 }
 0x32b   :  { %v2391_v40 = vadd.f32 %v9428_v38, %v2351_v35  ;;  %v10023_v35 = vld [vmem:[#allocation7 + $0x108] sm:$0xff]  }
 0x32c   :  { %v9430_v41 = vpop.f32.mrf.mxu1 }
 0x32d   :  { %v2431_v43 = vadd.f32 %v9450_v14, %v2391_v40  ;;  %v10014_v14 = vld [vmem:[#allocation7 + $0xd0] sm:$0xff]  }
 0x32e   :  { %9641 = vmatpush3.bf16.msra.mxu1 %v10014_v14  ;;  %v10028_v14 = vld [vmem:[#allocation7 + $0x160] sm:$0xff]  }
 0x32f   :  { %9642 = vmatprep.subr.bf16.mxu1 %v10822_v1 }
 0x332   :  { %9643 = vmatpush3.bf16.msra.mxu1 %v10015_v3  ;;  %v10029_v3 = vld [vmem:[#allocation7 + $0x158] sm:$0xff]  }
 0x333   :  { %9644 = vmatprep.subr.bf16.mxu1 %v10822_v1 }
 0x336   :  { %9645 = vmatpush3.bf16.msra.mxu1 %v10016_v4  ;;  %v10030_v4 = vld [vmem:[#allocation7 + $0x150] sm:$0xff]  }
 0x337   :  { %9670 = vmatprep.subr.bf16.mxu1 %v10822_v1 }
 0x346   :  { %v9470_v44 = vpop.f32.mrf.mxu1 }
 0x348   :  { %v9471_v45 = vpop.f32.mrf.mxu1 }
 0x349   :  { %v9472_v46 = vadd.f32 %v9471_v45, %v9470_v44 }
 0x34a   :  { %v9473_v48 = vpop.f32.mrf.mxu1 }
 0x34b   :  { %v2471_v31 = vadd.f32 %v9472_v46, %v2431_v43  ;;  %v8613_v48 = vld [vmem:[#allocation16 + $0x8] ss:$0 sm:$0xff] }
 0x34c   :  { %v9474_v49 = vpop.f32.mrf.mxu1 }
 0x34d   :  { %v2481_v50 = vadd.f32 %v8592_v47, %v2471_v31  ;;  %v8614_v49 = vld [vmem:[#allocation16 + $0x9] ss:$0 sm:$0xff] }
 0x34f   :  { %v10991_v51 = vmax.f32 %v2481_v50, 0.0 }
 0x351   :  { %v2500_v52 = vpack.c.bf16 %v10991_v51, %v10991_v51 }
 0x353   :  { %9627 = vmatmul.mubr.bf16.vlgmr.msra.gmra.mxu0 %v2500_v52 }
 0x354   :  { %9666 = vmatprep.mubr.msk.bf16.mxu0 %vm10823_vm0, %v10822_v1  ;;  %9651 = vmatpush3.bf16.msra.mxu0 %v10017_v29 }
 0x355   :  { %9652 = vmatprep.subr.bf16.mxu0 %v10822_v1 }
 0x358   :  { %9653 = vmatpush3.bf16.msra.mxu0 %v10018_v30 }
 0x359   :  { %9654 = vmatprep.subr.bf16.mxu0 %v10822_v1 }
 0x35c   :  { %9655 = vmatpush3.bf16.msra.mxu0 %v10019_v32  ;;  %v10035_v32 = vld [vmem:[#allocation10 + $0x74] ss:$8 sps:$4 sm:$0xff]  }
 0x35d   :  { %9656 = vmatprep.subr.bf16.mxu0 %v10822_v1 }
 0x360   :  { %9657 = vmatpush3.bf16.msra.mxu0 %v10020_v33  ;;  %v10033_v33 = vld [vmem:[#allocation10 + $0x70] ss:$8 sps:$4 sm:$0xff]  }
 0x361   :  { %9658 = vmatprep.subr.bf16.mxu0 %v10822_v1 }
 0x364   :  { %9659 = vmatpush3.bf16.msra.mxu0 %v10021_v34  ;;  %v10038_v34 = vld [vmem:[#allocation10 + $0x64] ss:$8 sps:$4 sm:$0xff]  }
 0x365   :  { %9660 = vmatprep.subr.bf16.mxu0 %v10822_v1 }
 0x368   :  { %9661 = vmatpush3.bf16.msra.mxu0 %v10022_v5  ;;  %v10036_v5 = vld [vmem:[#allocation10 + $0x60] ss:$8 sps:$4 sm:$0xff]  }
 0x369   :  { %9662 = vmatprep.subr.bf16.mxu0 %v10822_v1 }
 0x36c   :  { %9663 = vmatpush3.bf16.msra.mxu0 %v10023_v35  ;;  %v10039_v35 = vld [vmem:[#allocation10 + $0x50] ss:$8 sps:$4 sm:$0xff]  }
 0x36d   :  { %9664 = vmatprep.subr.bf16.mxu0 %v10822_v1 }
 0x370   :  { %9665 = vmatpush3.bf16.msra.mxu0 %v10024_v36  ;;  %v10041_v36 = vld [vmem:[#allocation10 + $0x54] ss:$8 sps:$4 sm:$0xff]  }
 0x371   :  { %3146 = vmatprep.subr.bf16.mxu0 %v10035_v32 }
 0x413   :  { %v2588_v54 = vpop.f32.mrf.mxu0 }
 0x414   :  { %v2589_v55 = vadd.f32 %v8593_v53, %v2588_v54 }
 0x415   :  { %v9628_v56 = vpop.f32.mrf.mxu0 }
 0x416   :  { %2596 = vadd.xlane.f32.xlu0 %v2589_v55  ;;  %v2600_v57 = vmul.f32 %v2589_v55, %v2589_v55  ;;  %v8615_v56 = vld [vmem:[#allocation16 + $0xa] ss:$0 sm:$0xff] }
 0x417   :  { %v2591_v58 = vpop.f32.mrf.mxu0 }
 0x418   :  { %2601 = vadd.xlane.f32.xlu1 %v2600_v57 }
 0x419   :  { %v9629_v59 = vpop.f32.mrf.mxu0 }
 0x49f   :  { %v2597_v6 = vpop.xlane.xlu0 %2596 }
 0x4a0   :  { %v2599_v7 = vmul.f32 0.0078125, %v2597_v6  ;;  %v10031_v6 = vld [vmem:[#allocation7 + $0x148] sm:$0xff]  }
 0x4a1   :  { %v2602_v8 = vpop.xlane.xlu1 %2601 }
 0x4a2   :  { %v2604_v9 = vmul.f32 %v2599_v7, %v2599_v7  ;;  %v2603_v10 = vmul.f32 0.0078125, %v2602_v8  ;;  %v2607_v13 = vsub.f32 %v2589_v55, %v2599_v7  ;;  %v10032_v7 = vld [vmem:[#allocation7 + $0x140] sm:$0xff]  }
 0x4a4   :  { %v2605_v11 = vsub.f32 %v2603_v10, %v2604_v9 }
 0x4a6   :  { %v2606_v42 = vmax.f32 %v2605_v11, 0.0 }
 0x4a8   :  { %v2608_v12 = vadd.f32 1e-05, %v2606_v42 }
 0x4aa   :  { %10537 = vrsqrt.f32 %v2608_v12 }
 0x4b7   :  { %v10538_v15 = vpop.eup %10537 }
 0x4b8   :  { %v2610_v17 = vmul.f32 %v10538_v15, %v2607_v13 }
 0x4ba   :  { %v2615_v19 = vmul.f32 %v8602_v16, %v2610_v17 }
 0x4bc   :  { %v2620_v20 = vadd.f32 %v8603_v18, %v2615_v19  ;;  %v8624_v18 = vld [vmem:[#allocation16 + $0xb] ss:$0 sm:$0xff] }
 0x4be   :  { %v2638_v21 = vpack.c.bf16 %v2620_v20, %v2620_v20  ;;  %v8625_v20 = vld [vmem:[#allocation16 + $0xc] ss:$0 sm:$0xff] }
 0x4c0   :  { %9647 = vmatmul.mubr.bf16.vlgmr.msra.gmra.mxu1 %v2638_v21 }
 0x4c1   :  { %9686 = vmatprep.mubr.msk.bf16.mxu1 %vm10823_vm0, %v10822_v1  ;;  %9671 = vmatpush3.bf16.msra.mxu1 %v10025_v63  ;;  %v10080_v63 = vld [vmem:[#allocation8 + $0x4] ss:$8 sps:$4 sm:$0xff]  }
 0x4c2   :  { %9672 = vmatprep.subr.bf16.mxu1 %v10822_v1 }
 0x580   :  { %v2726_v23 = vpop.f32.mrf.mxu1 }
 0x581   :  { %v2727_v24 = vadd.f32 %v8604_v22, %v2726_v23 }
 0x582   :  { %v9648_v25 = vpop.f32.mrf.mxu1 }
 0x583   :  { %2734 = vadd.xlane.f32.xlu1 %v2727_v24  ;;  %v2737_v27 = vmul.f32 %v2727_v24, %v2727_v24 }
 0x584   :  { %v2729_v26 = vpop.f32.mrf.mxu1 }
 0x586   :  { %v9649_v28 = vpop.f32.mrf.mxu1 }
 0x587   :  { %2738 = vadd.xlane.f32.xlu1 %v2737_v27 }
 0x60c   :  { %v2735_v37 = vpop.xlane.xlu1 %2734 }
 0x60d   :  { %v2736_v38 = vmul.f32 0.0078125, %v2735_v37  ;;  %v10044_v37 = vld [vmem:[#allocation10 + $0x44] ss:$8 sps:$4 sm:$0xff]  }
 0x60f   :  { %v2741_v40 = vmul.f32 %v2736_v38, %v2736_v38  ;;  %v2744_v46 = vsub.f32 %v2727_v24, %v2736_v38  ;;  %v8626_v24 = vld [vmem:[#allocation16 + $0xd] ss:$0 sm:$0xff]  ;;  %v10042_v38 = vld [vmem:[#allocation10 + $0x40] ss:$8 sps:$4 sm:$0xff]  }
 0x610   :  { %v2739_v39 = vpop.xlane.xlu1 %2738 }
 0x611   :  { %v2740_v41 = vmul.f32 0.0078125, %v2739_v39  ;;  %v10047_v39 = vld [vmem:[#allocation10 + $0x34] ss:$8 sps:$4 sm:$0xff]  }
 0x613   :  { %v2742_v43 = vsub.f32 %v2740_v41, %v2741_v40  ;;  %v10045_v40 = vld [vmem:[#allocation10 + $0x30] ss:$8 sps:$4 sm:$0xff]   ;;  %v10050_v41 = vld [vmem:[#allocation10 + $0x24] ss:$8 sps:$4 sm:$0xff]  }
 0x615   :  { %v2743_v44 = vmax.f32 %v2742_v43, 0.0  ;;  %v10048_v43 = vld [vmem:[#allocation10 + $0x20] ss:$8 sps:$4 sm:$0xff]  }
 0x617   :  { %v2745_v45 = vadd.f32 1e-05, %v2743_v44  ;;  %v10053_v44 = vld [vmem:[#allocation10 + $0x14] ss:$8 sps:$4 sm:$0xff]  }
 0x619   :  { %10539 = vrsqrt.f32 %v2745_v45  ;;  %v10051_v45 = vld [vmem:[#allocation10 + $0x10] ss:$8 sps:$4 sm:$0xff]  }
 0x626   :  { %v10540_v47 = vpop.eup %10539 }
 0x627   :  { %v2747_v31 = vmul.f32 %v10540_v47, %v2744_v46  ;;  %v10056_v46 = vld [vmem:[#allocation10 + $0x4] ss:$8 sps:$4 sm:$0xff]   ;;  %v10054_v47 = vld [vmem:[#allocation10] ss:$8 sps:$4 sm:$0xff]  }
 0x629   :  { %v2752_v50 = vmul.f32 %v8613_v48, %v2747_v31  ;;  %v10057_v48 = vld [vmem:[#allocation8 + $0x70] ss:$8 sps:$4 sm:$0xff]   ;;  %v10059_v31 = vld [vmem:[#allocation8 + $0x74] ss:$8 sps:$4 sm:$0xff]  }
 0x62b   :  { %v2757_v52 = vadd.f32 %v8614_v49, %v2752_v50  ;;  %v10062_v49 = vld [vmem:[#allocation8 + $0x64] ss:$8 sps:$4 sm:$0xff]   ;;  %v10060_v50 = vld [vmem:[#allocation8 + $0x60] ss:$8 sps:$4 sm:$0xff]  }
 0x62d   :  { %v2758_v53 = vmax.f32 %v2757_v52, 0.0  ;;  %v10065_v52 = vld [vmem:[#allocation8 + $0x54] ss:$8 sps:$4 sm:$0xff]  }
 0x62f   :  { %v11015_v54 = vadd.f32 %v2758_v53, %v10991_v51  ;;  %v10026_v51 = vld [vmem:[#allocation7 + $0x170] sm:$0xff]  }
 0x630   :  { %9673 = vmatpush3.bf16.msra.mxu1 %v10026_v51  ;;  %v10063_v53 = vld [vmem:[#allocation8 + $0x50] ss:$8 sps:$4 sm:$0xff]   ;;  %v10078_v51 = vld [vmem:[#allocation8] ss:$8 sps:$4 sm:$0xff]  }
 0x631   :  { %v2777_v55 = vpack.c.bf16 %v11015_v54, %v11015_v54  ;;  %9674 = vmatprep.subr.bf16.mxu1 %v10822_v1 }
 0x633   :  { %9667 = vmatmul.mubr.bf16.vlgmr.msra.gmra.mxu0 %v2777_v55  ;;  %v10068_v55 = vld [vmem:[#allocation8 + $0x44] ss:$8 sps:$4 sm:$0xff]  }
 0x634   :  { %3178 = vmatprep.mubr.bf16.mxu0 %v10821_v0  ;;  %9675 = vmatpush3.bf16.msra.mxu1 %v10027_v2  ;;  %v10083_v2 = vld [vmem:[#allocation8 + $0xf4] ss:$8 sps:$4 sm:$0xff]  }
 0x635   :  { %9676 = vmatprep.subr.bf16.mxu1 %v10822_v1  ;;  %3147 = vmatpush1.bf16.msra.mxu0 %v10033_v33 }
 0x636   :  { %3148 = vmatprep.subr.bf16.mxu0 %v10038_v34  ;;  %v10101_v34 = vld [vmem:[#allocation8 + $0x94] ss:$8 sps:$4 sm:$0xff]  }
 0x638   :  { %9677 = vmatpush3.bf16.msra.mxu1 %v10028_v14  ;;  %v10081_v14 = vld [vmem:[#allocation8 + $0xf0] ss:$8 sps:$4 sm:$0xff]  }
 0x639   :  { %9678 = vmatprep.subr.bf16.mxu1 %v10822_v1  ;;  %3149 = vmatpush1.bf16.msra.mxu0 %v10036_v5  ;;  %v10099_v5 = vld [vmem:[#allocation8 + $0x90] ss:$8 sps:$4 sm:$0xff]  }
 0x63a   :  { %3150 = vmatprep.subr.bf16.mxu0 %v10041_v36  ;;  %v10102_v36 = vld [vmem:[#allocation8 + $0x80] ss:$8 sps:$4 sm:$0xff]  }
 0x63c   :  { %9679 = vmatpush3.bf16.msra.mxu1 %v10029_v3  ;;  %v10086_v3 = vld [vmem:[#allocation8 + $0xe4] ss:$8 sps:$4 sm:$0xff]  }
 0x63d   :  { %9680 = vmatprep.subr.bf16.mxu1 %v10822_v1  ;;  %3151 = vmatpush1.bf16.msra.mxu0 %v10039_v35  ;;  %v10104_v35 = vld [vmem:[#allocation8 + $0x84] ss:$8 sps:$4 sm:$0xff]  }
 0x63e   :  { %3152 = vmatprep.subr.bf16.mxu0 %v10044_v37 }
 0x640   :  { %9681 = vmatpush3.bf16.msra.mxu1 %v10030_v4  ;;  %v10084_v4 = vld [vmem:[#allocation8 + $0xe0] ss:$8 sps:$4 sm:$0xff]  }
 0x641   :  { %9682 = vmatprep.subr.bf16.mxu1 %v10822_v1  ;;  %3153 = vmatpush1.bf16.msra.mxu0 %v10042_v38 }
 0x642   :  { %3154 = vmatprep.subr.bf16.mxu0 %v10047_v39  ;;  %v3054_v39 = vld [vmem:[#allocation17 + $0x30] ss:$8 sm:$0x3] }
 0x644   :  { %9683 = vmatpush3.bf16.msra.mxu1 %v10031_v6  ;;  %v10089_v6 = vld [vmem:[#allocation8 + $0xd4] ss:$8 sps:$4 sm:$0xff]  }
 0x645   :  { %9684 = vmatprep.subr.bf16.mxu1 %v10822_v1  ;;  %3155 = vmatpush1.bf16.msra.mxu0 %v10045_v40 }
 0x646   :  { %3156 = vmatprep.subr.bf16.mxu0 %v10050_v41 }
 0x648   :  { %9685 = vmatpush3.bf16.msra.mxu1 %v10032_v7  ;;  %v10087_v7 = vld [vmem:[#allocation8 + $0xd0] ss:$8 sps:$4 sm:$0xff]  }
 0x649   :  { %3157 = vmatpush1.bf16.msra.mxu0 %v10048_v43  ;;  %3395 = vmatprep.subr.bf16.mxu1 %v10059_v31 }
 0x64a   :  { %3158 = vmatprep.subr.bf16.mxu0 %v10053_v44 }
 0x64d   :  { %3159 = vmatpush1.bf16.msra.mxu0 %v10051_v45 }
 0x64e   :  { %3160 = vmatprep.subr.bf16.mxu0 %v10056_v46 }
 0x651   :  { %3161 = vmatpush1.bf16.msra.mxu0 %v10054_v47 }
 0x6f3   :  { %v2865_v57 = vpop.f32.mrf.mxu0 }
 0x6f4   :  { %v2866_v58 = vadd.f32 %v8615_v56, %v2865_v57  ;;  %v10066_v56 = vld [vmem:[#allocation8 + $0x40] ss:$8 sps:$4 sm:$0xff]   ;;  %v10071_v57 = vld [vmem:[#allocation8 + $0x34] ss:$8 sps:$4 sm:$0xff]  }
 0x6f5   :  { %v9668_v59 = vpop.f32.mrf.mxu0 }
 0x6f6   :  { %2873 = vadd.xlane.f32.xlu1 %v2866_v58  ;;  %v2876_v61 = vmul.f32 %v2866_v58, %v2866_v58  ;;  %v10074_v59 = vld [vmem:[#allocation8 + $0x24] ss:$8 sps:$4 sm:$0xff]  }
 0x6f7   :  { %v2868_v60 = vpop.f32.mrf.mxu0 }
 0x6f8   :  { %v10072_v60 = vld [vmem:[#allocation8 + $0x20] ss:$8 sps:$4 sm:$0xff]  }
 0x6f9   :  { %v9669_v62 = vpop.f32.mrf.mxu0 }
 0x6fa   :  { %2877 = vadd.xlane.f32.xlu1 %v2876_v61  ;;  %v10077_v61 = vld [vmem:[#allocation8 + $0x14] ss:$8 sps:$4 sm:$0xff]   ;;  %v10075_v62 = vld [vmem:[#allocation8 + $0x10] ss:$8 sps:$4 sm:$0xff]  }
 0x77f   :  { %v2874_v8 = vpop.xlane.xlu1 %2873 }
 0x780   :  { %v2875_v9 = vmul.f32 0.0078125, %v2874_v8  ;;  %v10092_v8 = vld [vmem:[#allocation8 + $0xc4] ss:$8 sps:$4 sm:$0xff]  }
 0x782   :  { %v2880_v11 = vmul.f32 %v2875_v9, %v2875_v9  ;;  %v2883_v16 = vsub.f32 %v2866_v58, %v2875_v9  ;;  %v10069_v58 = vld [vmem:[#allocation8 + $0x30] ss:$8 sps:$4 sm:$0xff]   ;;  %v10090_v9 = vld [vmem:[#allocation8 + $0xc0] ss:$8 sps:$4 sm:$0xff]  }
 0x783   :  { %v2878_v10 = vpop.xlane.xlu1 %2877 }
 0x784   :  { %v2879_v42 = vmul.f32 0.0078125, %v2878_v10  ;;  %v10095_v10 = vld [vmem:[#allocation8 + $0xb4] ss:$8 sps:$4 sm:$0xff]  }
 0x786   :  { %v2881_v12 = vsub.f32 %v2879_v42, %v2880_v11  ;;  %v10093_v11 = vld [vmem:[#allocation8 + $0xb0] ss:$8 sps:$4 sm:$0xff]   ;;  %v10098_v42 = vld [vmem:[#allocation8 + $0xa4] ss:$8 sps:$4 sm:$0xff]  }
 0x788   :  { %v2882_v13 = vmax.f32 %v2881_v12, 0.0  ;;  %v10096_v12 = vld [vmem:[#allocation8 + $0xa0] ss:$8 sps:$4 sm:$0xff]  }
 0x78a   :  { %v2884_v15 = vadd.f32 1e-05, %v2882_v13 }
 0x78c   :  { %10541 = vrsqrt.f32 %v2884_v15 }
 0x799   :  { %v10542_v17 = vpop.eup %10541 }
 0x79a   :  { %v2886_v19 = vmul.f32 %v10542_v17, %v2883_v16 }
 0x79c   :  { %v2891_v21 = vmul.f32 %v8624_v18, %v2886_v19 }
 0x79e   :  { %v2896_v22 = vadd.f32 %v8625_v20, %v2891_v21 }
 0x7a0   :  { %v2914_v23 = vpack.c.bf16 %v2896_v22, %v2896_v22 }
 0x7a2   :  { %9687 = vmatmul.mubr.bf16.vlgmr.msra.gmra.mxu1 %v2914_v23 }
 0x7a3   :  { %3396 = vmatpush1.bf16.msra.mxu1 %v10057_v48 }
 0x7a4   :  { %3397 = vmatprep.subr.bf16.mxu1 %v10062_v49 }
 0x7a7   :  { %3398 = vmatpush1.bf16.msra.mxu1 %v10060_v50 }
 0x7a8   :  { %3399 = vmatprep.subr.bf16.mxu1 %v10065_v52 }
 0x7ab   :  { %3400 = vmatpush1.bf16.msra.mxu1 %v10063_v53  ;;  %v10105_v53 = vld [vmem:[#allocation8 + $0x170] ss:$8 sps:$4 sm:$0xff]  }
 0x7ac   :  { %3401 = vmatprep.subr.bf16.mxu1 %v10068_v55  ;;  %v10107_v55 = vld [vmem:[#allocation8 + $0x174] ss:$8 sps:$4 sm:$0xff]  }
 0x7ad   :  { %3694 = vmatprep.subr.bf16.mxu0 %v10107_v55 }
 0x7af   :  { %3402 = vmatpush1.bf16.msra.mxu1 %v10066_v56  ;;  %v10110_v56 = vld [vmem:[#allocation8 + $0x164] ss:$8 sps:$4 sm:$0xff]  }
 0x7b0   :  { %3403 = vmatprep.subr.bf16.mxu1 %v10071_v57  ;;  %v10108_v57 = vld [vmem:[#allocation8 + $0x160] ss:$8 sps:$4 sm:$0xff]  }
 0x7b3   :  { %3404 = vmatpush1.bf16.msra.mxu1 %v10069_v58  ;;  %v10113_v58 = vld [vmem:[#allocation8 + $0x154] ss:$8 sps:$4 sm:$0xff]  }
 0x7b4   :  { %3405 = vmatprep.subr.bf16.mxu1 %v10074_v59  ;;  %v10111_v59 = vld [vmem:[#allocation8 + $0x150] ss:$8 sps:$4 sm:$0xff]  }
 0x7b7   :  { %3406 = vmatpush1.bf16.msra.mxu1 %v10072_v60  ;;  %v10116_v60 = vld [vmem:[#allocation8 + $0x144] ss:$8 sps:$4 sm:$0xff]  }
 0x7b8   :  { %3407 = vmatprep.subr.bf16.mxu1 %v10077_v61  ;;  %v10114_v61 = vld [vmem:[#allocation8 + $0x140] ss:$8 sps:$4 sm:$0xff]  }
 0x7bb   :  { %3408 = vmatpush1.bf16.msra.mxu1 %v10075_v62  ;;  %v10119_v62 = vld [vmem:[#allocation8 + $0x134] ss:$8 sps:$4 sm:$0xff]  }
 0x7bc   :  { %3409 = vmatprep.subr.bf16.mxu1 %v10080_v63  ;;  %v10117_v63 = vld [vmem:[#allocation8 + $0x130] ss:$8 sps:$4 sm:$0xff]  }
 0x7bf   :  { %3410 = vmatpush1.bf16.msra.mxu1 %v10078_v51  ;;  %v10122_v51 = vld [vmem:[#allocation8 + $0x124] ss:$8 sps:$4 sm:$0xff]  }
 0x7c0   :  { %3411 = vmatprep.subr.bf16.mxu1 %v10083_v2  ;;  %v10120_v2 = vld [vmem:[#allocation8 + $0x120] ss:$8 sps:$4 sm:$0xff]  }
 0x7c3   :  { %3412 = vmatpush2.bf16.msra.mxu1 %v10081_v14  ;;  %v10125_v14 = vld [vmem:[#allocation8 + $0x114] ss:$8 sps:$4 sm:$0xff]  }
 0x7c4   :  { %3413 = vmatprep.subr.bf16.mxu1 %v10086_v3  ;;  %v10123_v3 = vld [vmem:[#allocation8 + $0x110] ss:$8 sps:$4 sm:$0xff]  }
 0x7c7   :  { %3414 = vmatpush2.bf16.msra.mxu1 %v10084_v4  ;;  %v10128_v4 = vld [vmem:[#allocation8 + $0x104] ss:$8 sps:$4 sm:$0xff]  }
 0x7c8   :  { %3415 = vmatprep.subr.bf16.mxu1 %v10089_v6  ;;  %v10126_v6 = vld [vmem:[#allocation8 + $0x100] ss:$8 sps:$4 sm:$0xff]  }
 0x7cb   :  { %3416 = vmatpush2.bf16.msra.mxu1 %v10087_v7  ;;  %v3223_v7 = vld [vmem:[#allocation17] ss:$8 sm:$0x3] }
 0x7cc   :  { %3417 = vmatprep.subr.bf16.mxu1 %v10092_v8 }
 0x7cf   :  { %3418 = vmatpush2.bf16.msra.mxu1 %v10090_v9 }
 0x7d0   :  { %3419 = vmatprep.subr.bf16.mxu1 %v10095_v10 }
 0x7d3   :  { %3420 = vmatpush2.bf16.msra.mxu1 %v10093_v11 }
 0x7d4   :  { %3421 = vmatprep.subr.bf16.mxu1 %v10098_v42 }
 0x7d7   :  { %3422 = vmatpush2.bf16.msra.mxu1 %v10096_v12 }
 0x7d8   :  { %3423 = vmatprep.subr.bf16.mxu1 %v10101_v34  ;;  %v10149_v34 = vld [vmem:[#allocation8 + $0x194] ss:$8 sps:$4 sm:$0xff]  }
 0x7db   :  { %3424 = vmatpush2.bf16.msra.mxu1 %v10099_v5  ;;  %v10147_v5 = vld [vmem:[#allocation8 + $0x190] ss:$8 sps:$4 sm:$0xff]  }
 0x7dc   :  { %3425 = vmatprep.subr.bf16.mxu1 %v10104_v35  ;;  %v10152_v35 = vld [vmem:[#allocation8 + $0x184] ss:$8 sps:$4 sm:$0xff]  }
 0x7df   :  { %3426 = vmatpush2.bf16.msra.mxu1 %v10102_v36  ;;  %v10150_v36 = vld [vmem:[#allocation8 + $0x180] ss:$8 sps:$4 sm:$0xff]  }
 0x862   :  { %v3002_v25 = vpop.f32.mrf.mxu1 }
 0x863   :  { %v11027_v26 = vadd.f32 %v8626_v24, %v3002_v25  ;;  %v8635_v24 = vld [vmem:[#allocation16 + $0xe] ss:$0 sm:$0xff] }
 0x864   :  { %v9688_v27 = vpop.f32.mrf.mxu1 }
 0x865   :  { %3010 = vadd.xlane.f32.xlu1 %v11027_v26  ;;  %v3013_v29 = vmul.f32 %v11027_v26, %v11027_v26  ;;  %v8636_v27 = vld [vmem:[#allocation16 + $0xf] ss:$0 sm:$0xff] }
 0x866   :  { %v3005_v28 = vpop.f32.mrf.mxu1 }
 0x868   :  { %v9689_v30 = vpop.f32.mrf.mxu1 }
 0x869   :  { %3014 = vadd.xlane.f32.xlu1 %v3013_v29 }
 0x8ee   :  { %v3011_v13 = vpop.xlane.xlu1 %3010 }
 0x8ef   :  { %v3012_v15 = vmul.f32 0.0078125, %v3011_v13 }
 0x8f1   :  { %v3017_v17 = vmul.f32 %v3012_v15, %v3012_v15  ;;  %v3020_v22 = vsub.f32 %v11027_v26, %v3012_v15  ;;  %v3056_v26 = vlaneseq }
 0x8f2   :  { %v3015_v16 = vpop.xlane.xlu1 %3014 }
 0x8f3   :  { %v3016_v18 = vmul.f32 0.0078125, %v3015_v16  ;;  %v11034_v37 = vshrl.u32 %v3056_v26, 7 }
 0x8f5   :  { %v3018_v19 = vsub.f32 %v3016_v18, %v3017_v17  ;;  %v11037_v38 = vsub.s32 0, %v11034_v37  ;;  %v11040_v40 = vsub.s32 1, %v11034_v37 }
 0x8f7   :  { %v3019_v20 = vmax.f32 %v3018_v19, 0.0  ;;  %v3063_v41 = vrot.slane %v3054_v39, %v11040_v40  ;;  %v3228_v8 = vrot.slane %v3223_v7, %v11037_v38  ;;  %v3232_v9 = vrot.slane %v3223_v7, %v11040_v40  ;;  %v10156_v7 = vld [vmem:[#allocation8 + $0x260] ss:$8 sps:$4 sm:$0xff]  }
 0x8f9   :  { %v3021_v21 = vadd.f32 1e-05, %v3019_v20  ;;  %v10131_v20 = vld [vmem:[#allocation8 + $0x1f4] ss:$8 sps:$4 sm:$0xff]  }
 0x8fb   :  { %10543 = vrsqrt.f32 %v3021_v21  ;;  %v10129_v21 = vld [vmem:[#allocation8 + $0x1f0] ss:$8 sps:$4 sm:$0xff]  }
 0x908   :  { %v10544_v23 = vpop.eup %10543 }
 0x909   :  { %v3023_v25 = vmul.f32 %v10544_v23, %v3020_v22  ;;  %v10134_v22 = vld [vmem:[#allocation8 + $0x1e4] ss:$8 sps:$4 sm:$0xff]   ;;  %v10132_v23 = vld [vmem:[#allocation8 + $0x1e0] ss:$8 sps:$4 sm:$0xff]  }
 0x90b   :  { %v3028_v28 = vmul.f32 %v8635_v24, %v3023_v25  ;;  %v10137_v24 = vld [vmem:[#allocation8 + $0x1d4] ss:$8 sps:$4 sm:$0xff]   ;;  %v10135_v25 = vld [vmem:[#allocation8 + $0x1d0] ss:$8 sps:$4 sm:$0xff]  }
 0x90d   :  { %v3033_v29 = vadd.f32 %v8636_v27, %v3028_v28  ;;  %v10138_v27 = vld [vmem:[#allocation8 + $0x1c0] ss:$8 sps:$4 sm:$0xff]   ;;  %v10140_v28 = vld [vmem:[#allocation8 + $0x1c4] ss:$8 sps:$4 sm:$0xff]  }
 0x90f   :  { %v3034_v30 = vmax.f32 %v3033_v29, 0.0  ;;  %v10143_v29 = vld [vmem:[#allocation8 + $0x1b4] ss:$8 sps:$4 sm:$0xff]  }
 0x911   :  { %v3035_v32 = vadd.f32 %v3034_v30, %v11015_v54  ;;  %v3059_v54 = vrot.slane %v3054_v39, %v11037_v38  ;;  %v10141_v30 = vld [vmem:[#allocation8 + $0x1b0] ss:$8 sps:$4 sm:$0xff]  }
 0x913   :  { %v3052_v33 = vpack.c.bf16 %v3035_v32, %v3035_v32  ;;  %v10146_v32 = vld [vmem:[#allocation8 + $0x1a4] ss:$8 sps:$4 sm:$0xff]  }
 0x915   :  { %3179 = vmatmul.mubr.bf16.vlgmr.msra.gmra.mxu0 %v3052_v33  ;;  %v10144_v33 = vld [vmem:[#allocation8 + $0x1a0] ss:$8 sps:$4 sm:$0xff]  }
 0x916   :  { %3695 = vmatpush1.bf16.msra.mxu0 %v10105_v53 }
 0x917   :  { %3696 = vmatprep.subr.bf16.mxu0 %v10110_v56 }
 0x91a   :  { %3697 = vmatpush1.bf16.msra.mxu0 %v10108_v57 }
 0x91b   :  { %3698 = vmatprep.subr.bf16.mxu0 %v10113_v58 }
 0x91e   :  { %3699 = vmatpush1.bf16.msra.mxu0 %v10111_v59 }
 0x91f   :  { %3700 = vmatprep.subr.bf16.mxu0 %v10116_v60 }
 0x922   :  { %3701 = vmatpush1.bf16.msra.mxu0 %v10114_v61 }
 0x923   :  { %3702 = vmatprep.subr.bf16.mxu0 %v10119_v62 }
 0x926   :  { %3703 = vmatpush1.bf16.msra.mxu0 %v10117_v63 }
 0x927   :  { %3704 = vmatprep.subr.bf16.mxu0 %v10122_v51 }
 0x92a   :  { %3705 = vmatpush1.bf16.msra.mxu0 %v10120_v2 }
 0x92b   :  { %3706 = vmatprep.subr.bf16.mxu0 %v10125_v14 }
 0x92e   :  { %3707 = vmatpush1.bf16.msra.mxu0 %v10123_v3  ;;  %v10153_v3 = vld [vmem:[#allocation8 + $0x270] ss:$8 sps:$4 sm:$0xff]  }
 0x92f   :  { %3708 = vmatprep.subr.bf16.mxu0 %v10128_v4  ;;  %v10155_v4 = vld [vmem:[#allocation8 + $0x274] ss:$8 sps:$4 sm:$0xff]  }
 0x930   :  { %3996 = vmatprep.subr.bf16.mxu1 %v10155_v4 }
 0x932   :  { %3709 = vmatpush1.bf16.msra.mxu0 %v10126_v6  ;;  %v10158_v6 = vld [vmem:[#allocation8 + $0x264] ss:$8 sps:$4 sm:$0xff]  }
 0x933   :  { %3710 = vmatprep.subr.bf16.mxu0 %v10131_v20 }
 0x936   :  { %3711 = vmatpush2.bf16.msra.mxu0 %v10129_v21 }
 0x937   :  { %3712 = vmatprep.subr.bf16.mxu0 %v10134_v22 }
 0x93a   :  { %3713 = vmatpush2.bf16.msra.mxu0 %v10132_v23 }
 0x93b   :  { %3714 = vmatprep.subr.bf16.mxu0 %v10137_v24 }
 0x93e   :  { %3715 = vmatpush2.bf16.msra.mxu0 %v10135_v25 }
 0x93f   :  { %3716 = vmatprep.subr.bf16.mxu0 %v10140_v28 }
 0x942   :  { %3717 = vmatpush2.bf16.msra.mxu0 %v10138_v27 }
 0x943   :  { %3718 = vmatprep.subr.bf16.mxu0 %v10143_v29 }
 0x946   :  { %3719 = vmatpush2.bf16.msra.mxu0 %v10141_v30 }
 0x947   :  { %3720 = vmatprep.subr.bf16.mxu0 %v10146_v32 }
 0x94a   :  { %3721 = vmatpush2.bf16.msra.mxu0 %v10144_v33  ;;  %v10176_v33 = vld [vmem:[#allocation8 + $0x204] ss:$8 sps:$4 sm:$0xff]  }
 0x94b   :  { %3722 = vmatprep.subr.bf16.mxu0 %v10149_v34  ;;  %v10174_v34 = vld [vmem:[#allocation8 + $0x200] ss:$8 sps:$4 sm:$0xff]  }
 0x94e   :  { %3723 = vmatpush2.bf16.msra.mxu0 %v10147_v5  ;;  %v10179_v5 = vld [vmem:[#allocation8 + $0x2f4] ss:$8 sps:$4 sm:$0xff]  }
 0x94f   :  { %3724 = vmatprep.subr.bf16.mxu0 %v10152_v35  ;;  %v10177_v35 = vld [vmem:[#allocation8 + $0x2f0] ss:$8 sps:$4 sm:$0xff]  }
 0x952   :  { %3725 = vmatpush2.bf16.msra.mxu0 %v10150_v36  ;;  %v10182_v36 = vld [vmem:[#allocation8 + $0x2e4] ss:$8 sps:$4 sm:$0xff]  }
 0x9d5   :  { %v3180_v43 = vpop.f32.mrf.mxu0 }
 0x9d6   :  { %v3181_v44 = vadd.f32 %v3180_v43, %v3059_v54 }
 0x9d7   :  { %v3182_v45 = vpop.f32.mrf.mxu0 }
 0x9d8   :  { %v3183_v46 = vadd.f32 %v3182_v45, %v3063_v41  ;;  %v11044_v47 = vmax.f32 %v3181_v44, 0.0 }
 0x9d9   :  { %v3184_v48 = vpop.f32.mrf.mxu0 }
 0x9da   :  { %v11046_v31 = vmax.f32 %v3183_v46, 0.0  ;;  %v3221_v52 = vpack.c.bf16 %v11044_v47, %v11044_v47  ;;  %v3437_v48 = vld [vmem:[#allocation17 + $0x1] ss:$8 sm:$0x3] }
 0x9db   :  { %v3185_v49 = vpop.f32.mrf.mxu0  ;;  %v3464_v53 = vrot.slane %v3437_v48, %v11037_v38  ;;  %v3468_v55 = vrot.slane %v3437_v48, %v11040_v40  ;;  %v10192_v48 = vld [vmem:[#allocation8 + $0x2a0] ss:$8 sps:$4 sm:$0xff]  }
 0x9dc   :  { %v3222_v50 = vpack.c.bf16 %v11046_v31, %v11046_v31  ;;  %v3439_v49 = vld [vmem:[#allocation17 + $0x2] ss:$8 sm:$0x3] }
 0x9dd   :  { %v3477_v58 = vrot.slane %v3439_v49, %v11037_v38  ;;  %v3481_v59 = vrot.slane %v3439_v49, %v11040_v40  ;;  %v10197_v49 = vld [vmem:[#allocation8 + $0x294] ss:$8 sps:$4 sm:$0xff]  }
 0x9de   :  { %3427 = vmatprep.mubr.bf16.mxu1 %v3222_v50 }
 0x9df   :  { %3428 = vmatmul.mubr.bf16.vlgmr.msra.gmra.mxu1 %v3221_v52 }
 0x9e0   :  { %3997 = vmatpush1.bf16.msra.mxu1 %v10153_v3 }
 0x9e1   :  { %3998 = vmatprep.subr.bf16.mxu1 %v10158_v6 }
 0x9e4   :  { %3999 = vmatpush1.bf16.msra.mxu1 %v10156_v7 }
 0xa9f   :  { %v3429_v10 = vpop.f32.mrf.mxu1 }
 0xaa0   :  { %v3430_v42 = vadd.f32 %v3429_v10, %v3228_v8  ;;  %v10161_v8 = vld [vmem:[#allocation8 + $0x254] ss:$8 sps:$4 sm:$0xff]   ;;  %v10164_v10 = vld [vmem:[#allocation8 + $0x244] ss:$8 sps:$4 sm:$0xff]  }
 0xaa1   :  { %v3431_v11 = vpop.f32.mrf.mxu1  ;;  %4000 = vmatprep.subr.bf16.mxu1 %v10161_v8 }
 0xaa2   :  { %v3432_v12 = vadd.f32 %v3431_v11, %v3232_v9  ;;  %v3445_v18 = vmul.f32 %v3430_v42, %v3430_v42  ;;  %v10159_v9 = vld [vmem:[#allocation8 + $0x250] ss:$8 sps:$4 sm:$0xff]   ;;  %v10162_v11 = vld [vmem:[#allocation8 + $0x240] ss:$8 sps:$4 sm:$0xff]  }
 0xaa3   :  { %v3433_v13 = vpop.f32.mrf.mxu1  ;;  %4001 = vmatpush1.bf16.msra.mxu1 %v10159_v9 }
 0xaa4   :  { %v3440_v15 = vadd.f32 %v3432_v12, %v3430_v42  ;;  %v3446_v16 = vmul.f32 %v3432_v12, %v3432_v12  ;;  %4002 = vmatprep.subr.bf16.mxu1 %v10164_v10  ;;  %v10170_v13 = vld [vmem:[#allocation8 + $0x224] ss:$8 sps:$4 sm:$0xff]  }
 0xaa5   :  { %v3434_v17 = vpop.f32.mrf.mxu1 }
 0xaa6   :  { %3441 = vadd.xlane.f32.xlu1 %v3440_v15  ;;  %v3447_v19 = vadd.f32 %v3446_v16, %v3445_v18  ;;  %v10168_v15 = vld [vmem:[#allocation8 + $0x220] ss:$8 sps:$4 sm:$0xff]   ;;  %v10173_v16 = vld [vmem:[#allocation8 + $0x214] ss:$8 sps:$4 sm:$0xff]   ;;  %v10171_v17 = vld [vmem:[#allocation8 + $0x210] ss:$8 sps:$4 sm:$0xff]  }
 0xaa7   :  { %4003 = vmatpush1.bf16.msra.mxu1 %v10162_v11  ;;  %v3522_v18 = vld [vmem:[#allocation17 + $0x3] ss:$8 sm:$0x3] }
 0xaa8   :  { %v3531_v20 = vrot.slane %v3522_v18, %v11040_v40 }
 0xaaa   :  { %3448 = vadd.xlane.f32.xlu1 %v3447_v19  ;;  %v3527_v19 = vrot.slane %v3522_v18, %v11037_v38 }
 0xb2f   :  { %v3442_v26 = vpop.xlane.xlu1 %3441 }
 0xb30   :  { %v3444_v39 = vmul.f32 0.00390625, %v3442_v26  ;;  %v10180_v26 = vld [vmem:[#allocation8 + $0x2e0] ss:$8 sps:$4 sm:$0xff]  }
 0xb32   :  { %v3451_v41 = vmul.f32 %v3444_v39, %v3444_v39  ;;  %v3454_v50 = vsub.f32 %v3430_v42, %v3444_v39  ;;  %v3455_v52 = vsub.f32 %v3432_v12, %v3444_v39  ;;  %v10167_v42 = vld [vmem:[#allocation8 + $0x234] ss:$8 sps:$4 sm:$0xff]   ;;  %v10165_v12 = vld [vmem:[#allocation8 + $0x230] ss:$8 sps:$4 sm:$0xff]  }
 0xb33   :  { %v3449_v54 = vpop.xlane.xlu1 %3448  ;;  %4004 = vmatprep.subr.bf16.mxu1 %v10167_v42  ;;  %v10183_v39 = vld [vmem:[#allocation8 + $0x2d0] ss:$8 sps:$4 sm:$0xff]  }
 0xb34   :  { %v3450_v43 = vmul.f32 0.00390625, %v3449_v54  ;;  %4005 = vmatpush1.bf16.msra.mxu1 %v10165_v12  ;;  %v10185_v54 = vld [vmem:[#allocation8 + $0x2d4] ss:$8 sps:$4 sm:$0xff]  }
 0xb35   :  { %4006 = vmatprep.subr.bf16.mxu1 %v10170_v13 }
 0xb36   :  { %v3452_v44 = vsub.f32 %v3450_v43, %v3451_v41  ;;  %v10188_v41 = vld [vmem:[#allocation8 + $0x2c4] ss:$8 sps:$4 sm:$0xff]   ;;  %v10186_v43 = vld [vmem:[#allocation8 + $0x2c0] ss:$8 sps:$4 sm:$0xff]  }
 0xb38   :  { %v3453_v45 = vmax.f32 %v3452_v44, 0.0  ;;  %4007 = vmatpush1.bf16.msra.mxu1 %v10168_v15  ;;  %v10191_v44 = vld [vmem:[#allocation8 + $0x2b4] ss:$8 sps:$4 sm:$0xff]  }
 0xb39   :  { %4008 = vmatprep.subr.bf16.mxu1 %v10173_v16 }
 0xb3a   :  { %v3456_v46 = vadd.f32 1e-05, %v3453_v45  ;;  %v10189_v45 = vld [vmem:[#allocation8 + $0x2b0] ss:$8 sps:$4 sm:$0xff]  }
 0xb3c   :  { %10545 = vrsqrt.f32 %v3456_v46  ;;  %4009 = vmatpush1.bf16.msra.mxu1 %v10171_v17  ;;  %v10194_v46 = vld [vmem:[#allocation8 + $0x2a4] ss:$8 sps:$4 sm:$0xff]  }
 0xb3d   :  { %4010 = vmatprep.subr.bf16.mxu1 %v10176_v33  ;;  %v10221_v33 = vld [vmem:[#allocation8 + $0x314] ss:$8 sps:$4 sm:$0xff]  }
 0xb40   :  { %4011 = vmatpush1.bf16.msra.mxu1 %v10174_v34  ;;  %v10219_v34 = vld [vmem:[#allocation8 + $0x310] ss:$8 sps:$4 sm:$0xff]  }
 0xb41   :  { %4012 = vmatprep.subr.bf16.mxu1 %v10179_v5  ;;  %v10224_v5 = vld [vmem:[#allocation8 + $0x304] ss:$8 sps:$4 sm:$0xff]  }
 0xb44   :  { %4013 = vmatpush2.bf16.msra.mxu1 %v10177_v35  ;;  %v10222_v35 = vld [vmem:[#allocation8 + $0x300] ss:$8 sps:$4 sm:$0xff]  }
 0xb45   :  { %4014 = vmatprep.subr.bf16.mxu1 %v10182_v36  ;;  %v3824_v36 = vld [vmem:[#allocation17 + $0x6] ss:$8 sm:$0x3] }
 0xb48   :  { %4015 = vmatpush2.bf16.msra.mxu1 %v10180_v26  ;;  %v3829_v26 = vrot.slane %v3824_v36, %v11037_v38 }
 0xb49   :  { %v10546_v56 = vpop.eup %10545  ;;  %4016 = vmatprep.subr.bf16.mxu1 %v10185_v54 }
 0xb4a   :  { %v3459_v57 = vmul.f32 %v10546_v56, %v3455_v52  ;;  %v3458_v60 = vmul.f32 %v10546_v56, %v3454_v50  ;;  %v10195_v50 = vld [vmem:[#allocation8 + $0x290] ss:$8 sps:$4 sm:$0xff]   ;;  %v10200_v52 = vld [vmem:[#allocation8 + $0x284] ss:$8 sps:$4 sm:$0xff]  }
 0xb4c   :  { %v3472_v61 = vmul.f32 %v3468_v55, %v3459_v57  ;;  %v3471_v62 = vmul.f32 %v3464_v53, %v3458_v60  ;;  %4017 = vmatpush2.bf16.msra.mxu1 %v10183_v39  ;;  %v10198_v53 = vld [vmem:[#allocation8 + $0x280] ss:$8 sps:$4 sm:$0xff]   ;;  %v3833_v39 = vrot.slane %v3824_v36, %v11040_v40 }
 0xb4d   :  { %4018 = vmatprep.subr.bf16.mxu1 %v10188_v41  ;;  %v10252_v36 = vld [vmem:[#allocation11 + $0x60] ss:$8 sps:$4 sm:$0xff]  }
 0xb4e   :  { %v3485_v63 = vadd.f32 %v3481_v59, %v3472_v61  ;;  %v3484_v51 = vadd.f32 %v3477_v58, %v3471_v62 }
 0xb50   :  { %v3520_v2 = vpack.c.bf16 %v3485_v63, %v3485_v63  ;;  %v3519_v14 = vpack.c.bf16 %v3484_v51, %v3484_v51  ;;  %4019 = vmatpush2.bf16.msra.mxu1 %v10186_v43  ;;  %v3736_v63 = vld [vmem:[#allocation17 + $0x4] ss:$8 sm:$0x3]  ;;  %v3738_v51 = vld [vmem:[#allocation17 + $0x5] ss:$8 sm:$0x3] }
 0xb51   :  { %4020 = vmatprep.subr.bf16.mxu1 %v10191_v44  ;;  %v3762_v3 = vrot.slane %v3736_v63, %v11037_v38  ;;  %v3766_v4 = vrot.slane %v3736_v63, %v11040_v40  ;;  %v3775_v8 = vrot.slane %v3738_v51, %v11037_v38  ;;  %v3779_v9 = vrot.slane %v3738_v51, %v11040_v40  ;;  %v10237_v63 = vld [vmem:[#allocation8 + $0x3b0] ss:$8 sps:$4 sm:$0xff]   ;;  %v10242_v51 = vld [vmem:[#allocation8 + $0x3a4] ss:$8 sps:$4 sm:$0xff]  }
 0xb52   :  { %3726 = vmatprep.mubr.bf16.mxu0 %v3520_v2 }
 0xb53   :  { %3727 = vmatmul.mubr.bf16.vlgmr.msra.gmra.mxu0 %v3519_v14 }
 0xb54   :  { %4021 = vmatpush2.bf16.msra.mxu1 %v10189_v45 }
 0xb55   :  { %4022 = vmatprep.subr.bf16.mxu1 %v10194_v46 }
 0xb58   :  { %4023 = vmatpush2.bf16.msra.mxu1 %v10192_v48 }
 0xb59   :  { %4024 = vmatprep.subr.bf16.mxu1 %v10197_v49 }
 0xb5c   :  { %4025 = vmatpush2.bf16.msra.mxu1 %v10195_v50 }
 0xb5d   :  { %4026 = vmatprep.subr.bf16.mxu1 %v10200_v52 }
 0xb60   :  { %4027 = vmatpush2.bf16.msra.mxu1 %v10198_v53  ;;  %v10227_v53 = vld [vmem:[#allocation8 + $0x3f4] ss:$8 sps:$4 sm:$0xff]  }
 0xc13   :  { %v3728_v21 = vpop.f32.mrf.mxu0 }
 0xc14   :  { %v11060_v22 = vadd.f32 %v3728_v21, %v3527_v19  ;;  %v10201_v21 = vld [vmem:[#allocation8 + $0x370] ss:$8 sps:$4 sm:$0xff]  }
 0xc15   :  { %v3730_v23 = vpop.f32.mrf.mxu0 }
 0xc16   :  { %v3731_v24 = vadd.f32 %v3730_v23, %v3531_v20  ;;  %v3743_v28 = vmul.f32 %v11060_v22, %v11060_v22  ;;  %v10206_v23 = vld [vmem:[#allocation8 + $0x364] ss:$8 sps:$4 sm:$0xff]  }
 0xc17   :  { %v3732_v25 = vpop.f32.mrf.mxu0 }
 0xc18   :  { %v3739_v27 = vadd.f32 %v3731_v24, %v11060_v22  ;;  %v3744_v29 = vmul.f32 %v3731_v24, %v3731_v24  ;;  %v10207_v25 = vld [vmem:[#allocation8 + $0x350] ss:$8 sps:$4 sm:$0xff]  }
 0xc19   :  { %v3733_v30 = vpop.f32.mrf.mxu0 }
 0xc1a   :  { %3740 = vadd.xlane.f32.xlu0 %v3739_v27  ;;  %v3745_v32 = vadd.f32 %v3744_v29, %v3743_v28  ;;  %v10210_v27 = vld [vmem:[#allocation8 + $0x340] ss:$8 sps:$4 sm:$0xff]   ;;  %v10215_v28 = vld [vmem:[#allocation8 + $0x334] ss:$8 sps:$4 sm:$0xff]   ;;  %v10213_v29 = vld [vmem:[#allocation8 + $0x330] ss:$8 sps:$4 sm:$0xff]  }
 0xc1b   :  { %v10218_v30 = vld [vmem:[#allocation8 + $0x324] ss:$8 sps:$4 sm:$0xff]  }
 0xc1c   :  { %3746 = vadd.xlane.f32.xlu1 %v3745_v32  ;;  %v10216_v32 = vld [vmem:[#allocation8 + $0x320] ss:$8 sps:$4 sm:$0xff]  }
 0xca3   :  { %v3741_v55 = vpop.xlane.xlu0 %3740 }
 0xca4   :  { %v3742_v56 = vmul.f32 0.00390625, %v3741_v55  ;;  %v10225_v55 = vld [vmem:[#allocation8 + $0x3f0] ss:$8 sps:$4 sm:$0xff]  }
 0xca5   :  { %v3747_v57 = vpop.xlane.xlu1 %3746 }
 0xca6   :  { %v3748_v58 = vmul.f32 0.00390625, %v3747_v57  ;;  %v3749_v59 = vmul.f32 %v3742_v56, %v3742_v56  ;;  %v3752_v2 = vsub.f32 %v11060_v22, %v3742_v56  ;;  %v3753_v14 = vsub.f32 %v3731_v24, %v3742_v56  ;;  %v10203_v22 = vld [vmem:[#allocation8 + $0x374] ss:$8 sps:$4 sm:$0xff]   ;;  %v10204_v24 = vld [vmem:[#allocation8 + $0x360] ss:$8 sps:$4 sm:$0xff]  }
 0xca7   :  { %4294 = vmatprep.subr.bf16.mxu0 %v10203_v22  ;;  %v10230_v56 = vld [vmem:[#allocation8 + $0x3e4] ss:$8 sps:$4 sm:$0xff]   ;;  %v10228_v57 = vld [vmem:[#allocation8 + $0x3e0] ss:$8 sps:$4 sm:$0xff]  }
 0xca8   :  { %v3750_v60 = vsub.f32 %v3748_v58, %v3749_v59  ;;  %4295 = vmatpush1.bf16.msra.mxu0 %v10201_v21  ;;  %v10233_v58 = vld [vmem:[#allocation8 + $0x3d4] ss:$8 sps:$4 sm:$0xff]   ;;  %v10231_v59 = vld [vmem:[#allocation8 + $0x3d0] ss:$8 sps:$4 sm:$0xff]  }
 0xca9   :  { %4296 = vmatprep.subr.bf16.mxu0 %v10206_v23 }
 0xcaa   :  { %v3751_v61 = vmax.f32 %v3750_v60, 0.0  ;;  %v10234_v60 = vld [vmem:[#allocation8 + $0x3c0] ss:$8 sps:$4 sm:$0xff]  }
 0xcac   :  { %v3754_v62 = vadd.f32 1e-05, %v3751_v61  ;;  %4297 = vmatpush1.bf16.msra.mxu0 %v10204_v24  ;;  %v10236_v61 = vld [vmem:[#allocation8 + $0x3c4] ss:$8 sps:$4 sm:$0xff]  }
 0xcae   :  { %10547 = vrsqrt.f32 %v3754_v62  ;;  %v10239_v62 = vld [vmem:[#allocation8 + $0x3b4] ss:$8 sps:$4 sm:$0xff]  }
 0xcbb   :  { %v10548_v6 = vpop.eup %10547 }
 0xcbc   :  { %v3757_v7 = vmul.f32 %v10548_v6, %v3753_v14  ;;  %v3756_v10 = vmul.f32 %v10548_v6, %v3752_v2  ;;  %v10240_v2 = vld [vmem:[#allocation8 + $0x3a0] ss:$8 sps:$4 sm:$0xff]   ;;  %v10245_v14 = vld [vmem:[#allocation8 + $0x394] ss:$8 sps:$4 sm:$0xff]  }
 0xcbd   :  { %v10246_v6 = vld [vmem:[#allocation8 + $0x380] ss:$8 sps:$4 sm:$0xff]  }
 0xcbe   :  { %v3770_v11 = vmul.f32 %v3766_v4, %v3757_v7  ;;  %v3769_v42 = vmul.f32 %v3762_v3, %v3756_v10  ;;  %v10243_v3 = vld [vmem:[#allocation8 + $0x390] ss:$8 sps:$4 sm:$0xff]   ;;  %v10248_v4 = vld [vmem:[#allocation8 + $0x384] ss:$8 sps:$4 sm:$0xff]  }
 0xcc0   :  { %v3783_v12 = vadd.f32 %v3779_v9, %v3770_v11  ;;  %v3782_v13 = vadd.f32 %v3775_v8, %v3769_v42 }
 0xcc2   :  { %v3785_v15 = vmax.f32 %v3783_v12, 0.0  ;;  %v3784_v16 = vmax.f32 %v3782_v13, 0.0 }
 0xcc4   :  { %v11071_v17 = vadd.f32 %v3785_v15, %v11046_v31  ;;  %v11074_v18 = vadd.f32 %v3784_v16, %v11044_v47  ;;  %v10209_v31 = vld [vmem:[#allocation8 + $0x354] ss:$8 sps:$4 sm:$0xff]   ;;  %v10212_v47 = vld [vmem:[#allocation8 + $0x344] ss:$8 sps:$4 sm:$0xff]  }
 0xcc5   :  { %4298 = vmatprep.subr.bf16.mxu0 %v10209_v31  ;;  %v4038_v15 = vld [vmem:[#allocation17 + $0x7] ss:$8 sm:$0x3]  ;;  %v4040_v16 = vld [vmem:[#allocation17 + $0x10] ss:$8 sm:$0x3] }
 0xcc6   :  { %v3822_v19 = vpack.c.bf16 %v11071_v17, %v11071_v17  ;;  %v3821_v20 = vpack.c.bf16 %v11074_v18, %v11074_v18  ;;  %4299 = vmatpush1.bf16.msra.mxu0 %v10207_v25  ;;  %v4064_v21 = vrot.slane %v4038_v15, %v11037_v38  ;;  %v4068_v22 = vrot.slane %v4038_v15, %v11040_v40  ;;  %v10288_v15 = vld [vmem:[#allocation11 + $0xa0] ss:$8 sps:$4 sm:$0xff]  }
 0xcc7   :  { %4300 = vmatprep.subr.bf16.mxu0 %v10212_v47  ;;  %v4077_v31 = vrot.slane %v4040_v16, %v11037_v38  ;;  %v4081_v25 = vrot.slane %v4040_v16, %v11040_v40  ;;  %v10293_v16 = vld [vmem:[#allocation11 + $0x94] ss:$8 sps:$4 sm:$0xff]  }
 0xcc8   :  { %4028 = vmatprep.mubr.bf16.mxu1 %v3822_v19 }
 0xcc9   :  { %4029 = vmatmul.mubr.bf16.vlgmr.msra.gmra.mxu1 %v3821_v20 }
 0xcca   :  { %4301 = vmatpush1.bf16.msra.mxu0 %v10210_v27 }
 0xccb   :  { %4302 = vmatprep.subr.bf16.mxu0 %v10215_v28 }
 0xcce   :  { %4303 = vmatpush1.bf16.msra.mxu0 %v10213_v29 }
 0xccf   :  { %4304 = vmatprep.subr.bf16.mxu0 %v10218_v30 }
 0xcd2   :  { %4305 = vmatpush1.bf16.msra.mxu0 %v10216_v32 }
 0xcd3   :  { %4306 = vmatprep.subr.bf16.mxu0 %v10221_v33 }
 0xcd6   :  { %4307 = vmatpush1.bf16.msra.mxu0 %v10219_v34  ;;  %v10249_v34 = vld [vmem:[#allocation11 + $0x70] ss:$8 sps:$4 sm:$0xff]  }
 0xcd7   :  { %4308 = vmatprep.subr.bf16.mxu0 %v10224_v5  ;;  %v10251_v5 = vld [vmem:[#allocation11 + $0x74] ss:$8 sps:$4 sm:$0xff]  }
 0xcd8   :  { %4595 = vmatprep.subr.bf16.mxu1 %v10251_v5  ;;  %v10315_v5 = vld [vmem:[#allocation8 + $0x410] ss:$8 sps:$4 sm:$0xff]  }
 0xcd9   :  { %4596 = vmatpush1.bf16.msra.mxu1 %v10249_v34  ;;  %v10317_v34 = vld [vmem:[#allocation8 + $0x414] ss:$8 sps:$4 sm:$0xff]  }
 0xcda   :  { %4309 = vmatpush1.bf16.msra.mxu0 %v10222_v35  ;;  %v10254_v35 = vld [vmem:[#allocation11 + $0x64] ss:$8 sps:$4 sm:$0xff]  }
 0xcdb   :  { %4310 = vmatprep.subr.bf16.mxu0 %v10227_v53  ;;  %4597 = vmatprep.subr.bf16.mxu1 %v10254_v35  ;;  %v10320_v35 = vld [vmem:[#allocation8 + $0x404] ss:$8 sps:$4 sm:$0xff]  }
 0xcdd   :  { %4598 = vmatpush1.bf16.msra.mxu1 %v10252_v36  ;;  %v10318_v36 = vld [vmem:[#allocation8 + $0x400] ss:$8 sps:$4 sm:$0xff]  }
 0xcde   :  { %4311 = vmatpush2.bf16.msra.mxu0 %v10225_v55 }
 0xcdf   :  { %4312 = vmatprep.subr.bf16.mxu0 %v10230_v56 }
 0xce2   :  { %4313 = vmatpush2.bf16.msra.mxu0 %v10228_v57 }
 0xce3   :  { %4314 = vmatprep.subr.bf16.mxu0 %v10233_v58 }
 0xce6   :  { %4315 = vmatpush2.bf16.msra.mxu0 %v10231_v59 }
 0xce7   :  { %4316 = vmatprep.subr.bf16.mxu0 %v10236_v61 }
 0xcea   :  { %4317 = vmatpush2.bf16.msra.mxu0 %v10234_v60 }
 0xceb   :  { %4318 = vmatprep.subr.bf16.mxu0 %v10239_v62 }
 0xcee   :  { %4319 = vmatpush2.bf16.msra.mxu0 %v10237_v63 }
 0xcef   :  { %4320 = vmatprep.subr.bf16.mxu0 %v10242_v51 }
 0xcf2   :  { %4321 = vmatpush2.bf16.msra.mxu0 %v10240_v2  ;;  %v10272_v2 = vld [vmem:[#allocation11 + $0x4] ss:$8 sps:$4 sm:$0xff]  }
 0xcf3   :  { %4322 = vmatprep.subr.bf16.mxu0 %v10245_v14  ;;  %v10270_v14 = vld [vmem:[#allocation11] ss:$8 sps:$4 sm:$0xff]  }
 0xcf6   :  { %4323 = vmatpush2.bf16.msra.mxu0 %v10243_v3  ;;  %v10275_v3 = vld [vmem:[#allocation11 + $0xf4] ss:$8 sps:$4 sm:$0xff]  }
 0xcf7   :  { %4324 = vmatprep.subr.bf16.mxu0 %v10248_v4  ;;  %v10273_v4 = vld [vmem:[#allocation11 + $0xf0] ss:$8 sps:$4 sm:$0xff]  }
 0xcfa   :  { %4325 = vmatpush2.bf16.msra.mxu0 %v10246_v6  ;;  %v10278_v6 = vld [vmem:[#allocation11 + $0xe4] ss:$8 sps:$4 sm:$0xff]  }
 0xd89   :  { %v4030_v54 = vpop.f32.mrf.mxu1 }
 0xd8a   :  { %v11082_v41 = vadd.f32 %v4030_v54, %v3829_v26  ;;  %v10257_v26 = vld [vmem:[#allocation11 + $0x54] ss:$8 sps:$4 sm:$0xff]   ;;  %v10260_v54 = vld [vmem:[#allocation11 + $0x44] ss:$8 sps:$4 sm:$0xff]  }
 0xd8b   :  { %v4032_v43 = vpop.f32.mrf.mxu1  ;;  %4599 = vmatprep.subr.bf16.mxu1 %v10257_v26  ;;  %v10323_v26 = vld [vmem:[#allocation8 + $0x4f4] ss:$8 sps:$4 sm:$0xff]  }
 0xd8c   :  { %v4033_v44 = vadd.f32 %v4032_v43, %v3833_v39  ;;  %v4045_v48 = vmul.f32 %v11082_v41, %v11082_v41  ;;  %v10255_v39 = vld [vmem:[#allocation11 + $0x50] ss:$8 sps:$4 sm:$0xff]   ;;  %v10263_v43 = vld [vmem:[#allocation11 + $0x34] ss:$8 sps:$4 sm:$0xff]  }
 0xd8d   :  { %v4034_v45 = vpop.f32.mrf.mxu1  ;;  %4600 = vmatpush1.bf16.msra.mxu1 %v10255_v39  ;;  %v10321_v39 = vld [vmem:[#allocation8 + $0x4f0] ss:$8 sps:$4 sm:$0xff]  }
 0xd8e   :  { %v4041_v46 = vadd.f32 %v4033_v44, %v11082_v41  ;;  %v4046_v49 = vmul.f32 %v4033_v44, %v4033_v44  ;;  %4601 = vmatprep.subr.bf16.mxu1 %v10260_v54  ;;  %v10266_v45 = vld [vmem:[#allocation11 + $0x24] ss:$8 sps:$4 sm:$0xff]  }
 0xd8f   :  { %v4035_v50 = vpop.f32.mrf.mxu1  ;;  %v10326_v54 = vld [vmem:[#allocation8 + $0x4e4] ss:$8 sps:$4 sm:$0xff]  }
 0xd90   :  { %4042 = vadd.xlane.f32.xlu0 %v4041_v46  ;;  %v4047_v52 = vadd.f32 %v4046_v49, %v4045_v48  ;;  %v10264_v46 = vld [vmem:[#allocation11 + $0x20] ss:$8 sps:$4 sm:$0xff]   ;;  %v10269_v48 = vld [vmem:[#allocation11 + $0x14] ss:$8 sps:$4 sm:$0xff]   ;;  %v10267_v49 = vld [vmem:[#allocation11 + $0x10] ss:$8 sps:$4 sm:$0xff]  }
 0xd91   :  { %v4122_v50 = vld [vmem:[#allocation17 + $0x11] ss:$8 sm:$0x3] }
 0xd92   :  { %4048 = vadd.xlane.f32.xlu1 %v4047_v52  ;;  %v4127_v52 = vrot.slane %v4122_v50, %v11037_v38  ;;  %v4131_v53 = vrot.slane %v4122_v50, %v11040_v40  ;;  %v10338_v50 = vld [vmem:[#allocation8 + $0x4a4] ss:$8 sps:$4 sm:$0xff]  }
 0xe19   :  { %v4043_v7 = vpop.xlane.xlu0 %4042 }
 0xe1a   :  { %v4044_v8 = vmul.f32 0.00390625, %v4043_v7  ;;  %v10276_v7 = vld [vmem:[#allocation11 + $0xe0] ss:$8 sps:$4 sm:$0xff]  }
 0xe1b   :  { %v4049_v9 = vpop.xlane.xlu1 %4048 }
 0xe1c   :  { %v4050_v10 = vmul.f32 0.00390625, %v4049_v9  ;;  %v4051_v11 = vmul.f32 %v4044_v8, %v4044_v8  ;;  %v4054_v19 = vsub.f32 %v11082_v41, %v4044_v8  ;;  %v4055_v20 = vsub.f32 %v4033_v44, %v4044_v8  ;;  %v10258_v41 = vld [vmem:[#allocation11 + $0x40] ss:$8 sps:$4 sm:$0xff]   ;;  %v10261_v44 = vld [vmem:[#allocation11 + $0x30] ss:$8 sps:$4 sm:$0xff]  }
 0xe1d   :  { %4602 = vmatpush1.bf16.msra.mxu1 %v10258_v41  ;;  %v10279_v8 = vld [vmem:[#allocation11 + $0xd0] ss:$8 sps:$4 sm:$0xff]   ;;  %v10281_v9 = vld [vmem:[#allocation11 + $0xd4] ss:$8 sps:$4 sm:$0xff]   ;;  %v10324_v41 = vld [vmem:[#allocation8 + $0x4e0] ss:$8 sps:$4 sm:$0xff]  }
 0xe1e   :  { %v4052_v42 = vsub.f32 %v4050_v10, %v4051_v11  ;;  %4603 = vmatprep.subr.bf16.mxu1 %v10263_v43  ;;  %v10284_v10 = vld [vmem:[#allocation11 + $0xc4] ss:$8 sps:$4 sm:$0xff]   ;;  %v10282_v11 = vld [vmem:[#allocation11 + $0xc0] ss:$8 sps:$4 sm:$0xff]   ;;  %v10329_v43 = vld [vmem:[#allocation8 + $0x4d4] ss:$8 sps:$4 sm:$0xff]  }
 0xe20   :  { %v4053_v12 = vmax.f32 %v4052_v42, 0.0  ;;  %v10287_v42 = vld [vmem:[#allocation11 + $0xb4] ss:$8 sps:$4 sm:$0xff]  }
 0xe21   :  { %4604 = vmatpush1.bf16.msra.mxu1 %v10261_v44  ;;  %v10327_v44 = vld [vmem:[#allocation8 + $0x4d0] ss:$8 sps:$4 sm:$0xff]  }
 0xe22   :  { %v4056_v13 = vadd.f32 1e-05, %v4053_v12  ;;  %4605 = vmatprep.subr.bf16.mxu1 %v10266_v45  ;;  %v10285_v12 = vld [vmem:[#allocation11 + $0xb0] ss:$8 sps:$4 sm:$0xff]   ;;  %v10332_v45 = vld [vmem:[#allocation8 + $0x4c4] ss:$8 sps:$4 sm:$0xff]  }
 0xe24   :  { %10549 = vrsqrt.f32 %v4056_v13  ;;  %v10290_v13 = vld [vmem:[#allocation11 + $0xa4] ss:$8 sps:$4 sm:$0xff]  }
 0xe25   :  { %4606 = vmatpush1.bf16.msra.mxu1 %v10264_v46  ;;  %v10330_v46 = vld [vmem:[#allocation8 + $0x4c0] ss:$8 sps:$4 sm:$0xff]  }
 0xe26   :  { %4607 = vmatprep.subr.bf16.mxu1 %v10269_v48  ;;  %v10335_v48 = vld [vmem:[#allocation8 + $0x4b4] ss:$8 sps:$4 sm:$0xff]  }
 0xe29   :  { %4608 = vmatpush1.bf16.msra.mxu1 %v10267_v49  ;;  %v10333_v49 = vld [vmem:[#allocation8 + $0x4b0] ss:$8 sps:$4 sm:$0xff]  }
 0xe2a   :  { %4609 = vmatprep.subr.bf16.mxu1 %v10272_v2  ;;  %v4338_v2 = vld [vmem:[#allocation17 + $0x13] ss:$8 sm:$0x3] }
 0xe2d   :  { %4610 = vmatpush1.bf16.msra.mxu1 %v10270_v14 }
 0xe2e   :  { %4611 = vmatprep.subr.bf16.mxu1 %v10275_v3 }
 0xe31   :  { %v10550_v23 = vpop.eup %10549  ;;  %4612 = vmatpush2.bf16.msra.mxu1 %v10273_v4 }
 0xe32   :  { %v4059_v24 = vmul.f32 %v10550_v23, %v4055_v20  ;;  %v4058_v47 = vmul.f32 %v10550_v23, %v4054_v19  ;;  %4613 = vmatprep.subr.bf16.mxu1 %v10278_v6  ;;  %v10291_v19 = vld [vmem:[#allocation11 + $0x90] ss:$8 sps:$4 sm:$0xff]   ;;  %v10296_v20 = vld [vmem:[#allocation11 + $0x84] ss:$8 sps:$4 sm:$0xff]   ;;  %v10299_v23 = vld [vmem:[#allocation8 + $0x474] ss:$8 sps:$4 sm:$0xff]  }
 0xe33   :  { %4846 = vmatprep.subr.bf16.mxu0 %v10299_v23  ;;  %v10339_v23 = vld [vmem:[#allocation8 + $0x490] ss:$8 sps:$4 sm:$0xff]  }
 0xe34   :  { %v4072_v27 = vmul.f32 %v4068_v22, %v4059_v24  ;;  %v4071_v28 = vmul.f32 %v4064_v21, %v4058_v47  ;;  %v10294_v21 = vld [vmem:[#allocation11 + $0x80] ss:$8 sps:$4 sm:$0xff]   ;;  %v10297_v22 = vld [vmem:[#allocation8 + $0x470] ss:$8 sps:$4 sm:$0xff]   ;;  %v10302_v24 = vld [vmem:[#allocation8 + $0x464] ss:$8 sps:$4 sm:$0xff]  }
 0xe35   :  { %4614 = vmatpush2.bf16.msra.mxu1 %v10276_v7  ;;  %v10303_v47 = vld [vmem:[#allocation8 + $0x450] ss:$8 sps:$4 sm:$0xff]  }
 0xe36   :  { %v4085_v29 = vadd.f32 %v4081_v25, %v4072_v27  ;;  %v4084_v30 = vadd.f32 %v4077_v31, %v4071_v28  ;;  %4615 = vmatprep.subr.bf16.mxu1 %v10281_v9  ;;  %v10300_v31 = vld [vmem:[#allocation8 + $0x460] ss:$8 sps:$4 sm:$0xff]   ;;  %v10305_v25 = vld [vmem:[#allocation8 + $0x454] ss:$8 sps:$4 sm:$0xff]   ;;  %v10308_v27 = vld [vmem:[#allocation8 + $0x444] ss:$8 sps:$4 sm:$0xff]   ;;  %v4375_v9 = vrot.slane %v4338_v2, %v11037_v38 }
 0xe37   :  { %v10306_v28 = vld [vmem:[#allocation8 + $0x440] ss:$8 sps:$4 sm:$0xff]  }
 0xe38   :  { %v4120_v32 = vpack.c.bf16 %v4085_v29, %v4085_v29  ;;  %v4119_v33 = vpack.c.bf16 %v4084_v30, %v4084_v30  ;;  %v10311_v29 = vld [vmem:[#allocation8 + $0x434] ss:$8 sps:$4 sm:$0xff]   ;;  %v10309_v30 = vld [vmem:[#allocation8 + $0x430] ss:$8 sps:$4 sm:$0xff]  }
 0xe39   :  { %4616 = vmatpush2.bf16.msra.mxu1 %v10279_v8 }
 0xe3a   :  { %4326 = vmatprep.mubr.bf16.mxu0 %v4120_v32  ;;  %4617 = vmatprep.subr.bf16.mxu1 %v10284_v10  ;;  %v10314_v32 = vld [vmem:[#allocation8 + $0x424] ss:$8 sps:$4 sm:$0xff]   ;;  %v4379_v10 = vrot.slane %v4338_v2, %v11040_v40 }
 0xe3b   :  { %4327 = vmatmul.mubr.bf16.vlgmr.msra.gmra.mxu0 %v4119_v33  ;;  %v10312_v33 = vld [vmem:[#allocation8 + $0x420] ss:$8 sps:$4 sm:$0xff]  }
 0xe3c   :  { %4847 = vmatpush1.bf16.msra.mxu0 %v10297_v22  ;;  %v10341_v22 = vld [vmem:[#allocation8 + $0x494] ss:$8 sps:$4 sm:$0xff]  }
 0xe3d   :  { %4618 = vmatpush2.bf16.msra.mxu1 %v10282_v11  ;;  %4848 = vmatprep.subr.bf16.mxu0 %v10302_v24  ;;  %v10344_v24 = vld [vmem:[#allocation8 + $0x484] ss:$8 sps:$4 sm:$0xff]  }
 0xe3e   :  { %4619 = vmatprep.subr.bf16.mxu1 %v10287_v42 }
 0xe40   :  { %4849 = vmatpush1.bf16.msra.mxu0 %v10300_v31  ;;  %v10342_v31 = vld [vmem:[#allocation8 + $0x480] ss:$8 sps:$4 sm:$0xff]  }
 0xe41   :  { %4620 = vmatpush2.bf16.msra.mxu1 %v10285_v12  ;;  %4850 = vmatprep.subr.bf16.mxu0 %v10305_v25  ;;  %v4423_v25 = vld [vmem:[#allocation17 + $0x31] ss:$8 sm:$0x3] }
 0xe42   :  { %4621 = vmatprep.subr.bf16.mxu1 %v10290_v13 }
 0xe44   :  { %4851 = vmatpush1.bf16.msra.mxu0 %v10303_v47  ;;  %v4428_v47 = vrot.slane %v4423_v25, %v11037_v38 }
 0xe45   :  { %4622 = vmatpush2.bf16.msra.mxu1 %v10288_v15  ;;  %4852 = vmatprep.subr.bf16.mxu0 %v10308_v27  ;;  %v4432_v27 = vrot.slane %v4423_v25, %v11040_v40 }
 0xe46   :  { %4623 = vmatprep.subr.bf16.mxu1 %v10293_v16 }
 0xe48   :  { %4853 = vmatpush1.bf16.msra.mxu0 %v10306_v28 }
 0xe49   :  { %4624 = vmatpush2.bf16.msra.mxu1 %v10291_v19  ;;  %4854 = vmatprep.subr.bf16.mxu0 %v10311_v29 }
 0xe4a   :  { %4625 = vmatprep.subr.bf16.mxu1 %v10296_v20 }
 0xe4c   :  { %4855 = vmatpush1.bf16.msra.mxu0 %v10309_v30 }
 0xe4d   :  { %4626 = vmatpush2.bf16.msra.mxu1 %v10294_v21  ;;  %4856 = vmatprep.subr.bf16.mxu0 %v10314_v32 }
 0xe50   :  { %4857 = vmatpush1.bf16.msra.mxu0 %v10312_v33 }
 0xe51   :  { %4858 = vmatprep.subr.bf16.mxu0 %v10317_v34 }
 0xe54   :  { %4859 = vmatpush1.bf16.msra.mxu0 %v10315_v5 }
 0xe55   :  { %4860 = vmatprep.subr.bf16.mxu0 %v10320_v35 }
 0xe58   :  { %4861 = vmatpush1.bf16.msra.mxu0 %v10318_v36  ;;  %v10345_v36 = vld [vmem:[#allocation8 + $0x570] ss:$8 sps:$4 sm:$0xff]  }
 0xe59   :  { %4862 = vmatprep.subr.bf16.mxu0 %v10323_v26  ;;  %v10347_v26 = vld [vmem:[#allocation8 + $0x574] ss:$8 sps:$4 sm:$0xff]  }
 0xe5a   :  { %5144 = vmatprep.subr.bf16.mxu1 %v10347_v26 }
 0xe5c   :  { %4863 = vmatpush2.bf16.msra.mxu0 %v10321_v39  ;;  %v10350_v39 = vld [vmem:[#allocation8 + $0x564] ss:$8 sps:$4 sm:$0xff]  }
 0xe5d   :  { %4864 = vmatprep.subr.bf16.mxu0 %v10326_v54  ;;  %v10348_v54 = vld [vmem:[#allocation8 + $0x560] ss:$8 sps:$4 sm:$0xff]  }
 0xe60   :  { %4865 = vmatpush2.bf16.msra.mxu0 %v10324_v41  ;;  %v10353_v41 = vld [vmem:[#allocation8 + $0x554] ss:$8 sps:$4 sm:$0xff]  }
 0xe61   :  { %4866 = vmatprep.subr.bf16.mxu0 %v10329_v43  ;;  %v10351_v43 = vld [vmem:[#allocation8 + $0x550] ss:$8 sps:$4 sm:$0xff]  }
 0xe64   :  { %4867 = vmatpush2.bf16.msra.mxu0 %v10327_v44  ;;  %v10356_v44 = vld [vmem:[#allocation8 + $0x544] ss:$8 sps:$4 sm:$0xff]  }
 0xe65   :  { %4868 = vmatprep.subr.bf16.mxu0 %v10332_v45  ;;  %v10354_v45 = vld [vmem:[#allocation8 + $0x540] ss:$8 sps:$4 sm:$0xff]  }
 0xe68   :  { %4869 = vmatpush2.bf16.msra.mxu0 %v10330_v46  ;;  %v10359_v46 = vld [vmem:[#allocation8 + $0x534] ss:$8 sps:$4 sm:$0xff]  }
 0xe69   :  { %4870 = vmatprep.subr.bf16.mxu0 %v10335_v48  ;;  %v10357_v48 = vld [vmem:[#allocation8 + $0x530] ss:$8 sps:$4 sm:$0xff]  }
 0xe6c   :  { %4871 = vmatpush2.bf16.msra.mxu0 %v10333_v49  ;;  %v10362_v49 = vld [vmem:[#allocation8 + $0x524] ss:$8 sps:$4 sm:$0xff]  }
 0xe6d   :  { %4872 = vmatprep.subr.bf16.mxu0 %v10338_v50  ;;  %v10360_v50 = vld [vmem:[#allocation8 + $0x520] ss:$8 sps:$4 sm:$0xff]  }
 0xefb   :  { %v4328_v55 = vpop.f32.mrf.mxu0 }
 0xefc   :  { %v11094_v56 = vadd.f32 %v4328_v55, %v4127_v52  ;;  %v10336_v52 = vld [vmem:[#allocation8 + $0x4a0] ss:$8 sps:$4 sm:$0xff]  }
 0xefd   :  { %v4330_v57 = vpop.f32.mrf.mxu0  ;;  %4873 = vmatpush2.bf16.msra.mxu0 %v10336_v52  ;;  %v10365_v52 = vld [vmem:[#allocation8 + $0x514] ss:$8 sps:$4 sm:$0xff]  }
 0xefe   :  { %v11096_v58 = vadd.f32 %v4330_v57, %v4131_v53  ;;  %v4343_v61 = vmul.f32 %v11094_v56, %v11094_v56  ;;  %4874 = vmatprep.subr.bf16.mxu0 %v10341_v22  ;;  %v10387_v22 = vld [vmem:[#allocation8 + $0x590] ss:$8 sps:$4 sm:$0xff]  }
 0xeff   :  { %v4332_v59 = vpop.f32.mrf.mxu0 }
 0xf00   :  { %v4339_v60 = vadd.f32 %v11096_v58, %v11094_v56  ;;  %v4344_v62 = vmul.f32 %v11096_v58, %v11096_v58 }
 0xf01   :  { %v4333_v63 = vpop.f32.mrf.mxu0  ;;  %4875 = vmatpush2.bf16.msra.mxu0 %v10339_v23  ;;  %v10392_v23 = vld [vmem:[#allocation8 + $0x584] ss:$8 sps:$4 sm:$0xff]  }
 0xf02   :  { %4340 = vadd.xlane.f32.xlu0 %v4339_v60  ;;  %v4345_v51 = vadd.f32 %v4344_v62, %v4343_v61  ;;  %4876 = vmatprep.subr.bf16.mxu0 %v10344_v24  ;;  %v10390_v24 = vld [vmem:[#allocation8 + $0x580] ss:$8 sps:$4 sm:$0xff]  }
 0xf04   :  { %4346 = vadd.xlane.f32.xlu1 %v4345_v51  ;;  %v4336_v51 = vld [vmem:[#allocation17 + $0x12] ss:$8 sm:$0x3] }
 0xf05   :  { %v4362_v4 = vrot.slane %v4336_v51, %v11037_v38  ;;  %v4366_v6 = vrot.slane %v4336_v51, %v11040_v40  ;;  %4877 = vmatpush2.bf16.msra.mxu0 %v10342_v31 }
 0xf8b   :  { %v4341_v53 = vpop.xlane.xlu0 %4340 }
 0xf8c   :  { %v4342_v55 = vmul.f32 0.00390625, %v4341_v53  ;;  %v10363_v53 = vld [vmem:[#allocation8 + $0x510] ss:$8 sps:$4 sm:$0xff]  }
 0xf8d   :  { %v4347_v57 = vpop.xlane.xlu1 %4346 }
 0xf8e   :  { %v4348_v59 = vmul.f32 0.00390625, %v4347_v57  ;;  %v4349_v60 = vmul.f32 %v4342_v55, %v4342_v55  ;;  %v4352_v14 = vsub.f32 %v11094_v56, %v4342_v55  ;;  %v4353_v3 = vsub.f32 %v11096_v58, %v4342_v55  ;;  %v10368_v55 = vld [vmem:[#allocation8 + $0x504] ss:$8 sps:$4 sm:$0xff]   ;;  %v10366_v57 = vld [vmem:[#allocation8 + $0x500] ss:$8 sps:$4 sm:$0xff]  }
 0xf90   :  { %v4350_v61 = vsub.f32 %v4348_v59, %v4349_v60  ;;  %v4674_v59 = vld [vmem:[#allocation17 + $0x14] ss:$8 sm:$0x3] }
 0xf91   :  { %v4679_v60 = vrot.slane %v4674_v59, %v11037_v38 }
 0xf92   :  { %v4351_v62 = vmax.f32 %v4350_v61, 0.0  ;;  %v4683_v61 = vrot.slane %v4674_v59, %v11040_v40  ;;  %v10396_v59 = vld [vmem:[#allocation8 + $0x660] ss:$8 sps:$4 sm:$0xff]  }
 0xf94   :  { %v4354_v63 = vadd.f32 1e-05, %v4351_v62 }
 0xf96   :  { %10551 = vrsqrt.f32 %v4354_v63 }
 0xfa3   :  { %v10552_v7 = vpop.eup %10551 }
 0xfa4   :  { %v4357_v8 = vmul.f32 %v10552_v7, %v4353_v3  ;;  %v4356_v11 = vmul.f32 %v10552_v7, %v4352_v14 }
 0xfa6   :  { %v4370_v42 = vmul.f32 %v4366_v6, %v4357_v8  ;;  %v4369_v12 = vmul.f32 %v4362_v4, %v4356_v11  ;;  %v10374_v11 = vld [vmem:[#allocation8 + $0x5e4] ss:$8 sps:$4 sm:$0xff]  }
 0xfa8   :  { %v4383_v13 = vadd.f32 %v4379_v10, %v4370_v42  ;;  %v4382_v15 = vadd.f32 %v4375_v9, %v4369_v12  ;;  %v10371_v9 = vld [vmem:[#allocation8 + $0x5f4] ss:$8 sps:$4 sm:$0xff]   ;;  %v10369_v10 = vld [vmem:[#allocation8 + $0x5f0] ss:$8 sps:$4 sm:$0xff]   ;;  %v10372_v42 = vld [vmem:[#allocation8 + $0x5e0] ss:$8 sps:$4 sm:$0xff]  }
 0xfa9   :  { %v10377_v12 = vld [vmem:[#allocation8 + $0x5d4] ss:$8 sps:$4 sm:$0xff]  }
 0xfaa   :  { %v4385_v16 = vmax.f32 %v4383_v13, 0.0  ;;  %v4384_v19 = vmax.f32 %v4382_v15, 0.0  ;;  %v10375_v13 = vld [vmem:[#allocation8 + $0x5d0] ss:$8 sps:$4 sm:$0xff]   ;;  %v10378_v15 = vld [vmem:[#allocation8 + $0x5c0] ss:$8 sps:$4 sm:$0xff]  }
 0xfac   :  { %v4387_v56 = vadd.f32 %v4385_v16, %v11071_v17  ;;  %v4386_v58 = vadd.f32 %v4384_v19, %v11074_v18  ;;  %v10380_v16 = vld [vmem:[#allocation8 + $0x5c4] ss:$8 sps:$4 sm:$0xff]   ;;  %v10383_v19 = vld [vmem:[#allocation8 + $0x5b4] ss:$8 sps:$4 sm:$0xff]  }
 0xfae   :  { %v4421_v20 = vpack.c.bf16 %v4387_v56, %v4387_v56  ;;  %v4420_v21 = vpack.c.bf16 %v4386_v58, %v4386_v58  ;;  %v10381_v56 = vld [vmem:[#allocation8 + $0x5b0] ss:$8 sps:$4 sm:$0xff]   ;;  %v10386_v58 = vld [vmem:[#allocation8 + $0x5a4] ss:$8 sps:$4 sm:$0xff]  }
 0xfb0   :  { %4627 = vmatprep.mubr.bf16.mxu1 %v4421_v20  ;;  %v10384_v20 = vld [vmem:[#allocation8 + $0x5a0] ss:$8 sps:$4 sm:$0xff]  }
 0xfb1   :  { %4628 = vmatmul.mubr.bf16.vlgmr.msra.gmra.mxu1 %v4420_v21  ;;  %v10389_v21 = vld [vmem:[#allocation8 + $0x594] ss:$8 sps:$4 sm:$0xff]  }
 0xfb2   :  { %5145 = vmatpush1.bf16.msra.mxu1 %v10345_v36 }
 0xfb3   :  { %5146 = vmatprep.subr.bf16.mxu1 %v10350_v39 }
 0xfb6   :  { %5147 = vmatpush1.bf16.msra.mxu1 %v10348_v54 }
 0xfb7   :  { %5148 = vmatprep.subr.bf16.mxu1 %v10353_v41 }
 0xfba   :  { %5149 = vmatpush1.bf16.msra.mxu1 %v10351_v43 }
 0xfbb   :  { %5150 = vmatprep.subr.bf16.mxu1 %v10356_v44 }
 0xfbe   :  { %5151 = vmatpush1.bf16.msra.mxu1 %v10354_v45 }
 0xfbf   :  { %5152 = vmatprep.subr.bf16.mxu1 %v10359_v46 }
 0xfc2   :  { %5153 = vmatpush1.bf16.msra.mxu1 %v10357_v48 }
 0xfc3   :  { %5154 = vmatprep.subr.bf16.mxu1 %v10362_v49 }
 0xfc6   :  { %5155 = vmatpush1.bf16.msra.mxu1 %v10360_v50 }
 0xfc7   :  { %5156 = vmatprep.subr.bf16.mxu1 %v10365_v52 }
 0xfca   :  { %5157 = vmatpush1.bf16.msra.mxu1 %v10363_v53  ;;  %v10393_v53 = vld [vmem:[#allocation8 + $0x670] ss:$8 sps:$4 sm:$0xff]  }
 0xfcb   :  { %5158 = vmatprep.subr.bf16.mxu1 %v10368_v55  ;;  %v10395_v55 = vld [vmem:[#allocation8 + $0x674] ss:$8 sps:$4 sm:$0xff]  }
 0xfcc   :  { %5446 = vmatprep.subr.bf16.mxu0 %v10395_v55 }
 0xfce   :  { %5159 = vmatpush1.bf16.msra.mxu1 %v10366_v57  ;;  %v10398_v57 = vld [vmem:[#allocation8 + $0x664] ss:$8 sps:$4 sm:$0xff]  }
 0xfcf   :  { %5160 = vmatprep.subr.bf16.mxu1 %v10371_v9 }
 0xfd2   :  { %5161 = vmatpush2.bf16.msra.mxu1 %v10369_v10 }
 0xfd3   :  { %5162 = vmatprep.subr.bf16.mxu1 %v10374_v11 }
 0xfd6   :  { %5163 = vmatpush2.bf16.msra.mxu1 %v10372_v42 }
 0xfd7   :  { %5164 = vmatprep.subr.bf16.mxu1 %v10377_v12 }
 0xfda   :  { %5165 = vmatpush2.bf16.msra.mxu1 %v10375_v13 }
 0xfdb   :  { %5166 = vmatprep.subr.bf16.mxu1 %v10380_v16 }
 0xfde   :  { %5167 = vmatpush2.bf16.msra.mxu1 %v10378_v15 }
 0xfdf   :  { %5168 = vmatprep.subr.bf16.mxu1 %v10383_v19 }
 0xfe2   :  { %5169 = vmatpush2.bf16.msra.mxu1 %v10381_v56 }
 0xfe3   :  { %5170 = vmatprep.subr.bf16.mxu1 %v10386_v58 }
 0xfe6   :  { %5171 = vmatpush2.bf16.msra.mxu1 %v10384_v20  ;;  %v10416_v20 = vld [vmem:[#allocation8 + $0x604] ss:$8 sps:$4 sm:$0xff]  }
 0xfe7   :  { %5172 = vmatprep.subr.bf16.mxu1 %v10389_v21  ;;  %v10414_v21 = vld [vmem:[#allocation8 + $0x600] ss:$8 sps:$4 sm:$0xff]  }
 0xfea   :  { %5173 = vmatpush2.bf16.msra.mxu1 %v10387_v22  ;;  %v10419_v22 = vld [vmem:[#allocation8 + $0x6f4] ss:$8 sps:$4 sm:$0xff]  }
 0xfeb   :  { %5174 = vmatprep.subr.bf16.mxu1 %v10392_v23  ;;  %v10417_v23 = vld [vmem:[#allocation8 + $0x6f0] ss:$8 sps:$4 sm:$0xff]  }
 0xfee   :  { %5175 = vmatpush2.bf16.msra.mxu1 %v10390_v24  ;;  %v10422_v24 = vld [vmem:[#allocation8 + $0x6e4] ss:$8 sps:$4 sm:$0xff]  }
0x1071   :  { %v4629_v17 = vpop.f32.mrf.mxu1 }
0x1072   :  { %v4630_v28 = vadd.f32 %v4629_v17, %v4428_v47 }
0x1073   :  { %v4631_v18 = vpop.f32.mrf.mxu1 }
0x1074   :  { %v4632_v29 = vadd.f32 %v4631_v18, %v4432_v27  ;;  %v11114_v30 = vmax.f32 %v4630_v28, 0.0 }
0x1075   :  { %v4633_v32 = vpop.f32.mrf.mxu1 }
0x1076   :  { %v11116_v33 = vmax.f32 %v4632_v29, 0.0  ;;  %v4671_v35 = vpack.c.bf16 %v11114_v30, %v11114_v30  ;;  %v4888_v32 = vld [vmem:[#allocation17 + $0x15] ss:$8 sm:$0x3] }
0x1077   :  { %v4634_v34 = vpop.f32.mrf.mxu1  ;;  %v4914_v36 = vrot.slane %v4888_v32, %v11037_v38  ;;  %v4918_v26 = vrot.slane %v4888_v32, %v11040_v40  ;;  %v10432_v32 = vld [vmem:[#allocation8 + $0x6a0] ss:$8 sps:$4 sm:$0xff]  }
0x1078   :  { %v4672_v5 = vpack.c.bf16 %v11116_v33, %v11116_v33  ;;  %v4890_v34 = vld [vmem:[#allocation17 + $0x16] ss:$8 sm:$0x3] }
0x1079   :  { %v4927_v41 = vrot.slane %v4890_v34, %v11037_v38  ;;  %v4931_v43 = vrot.slane %v4890_v34, %v11040_v40  ;;  %v10437_v34 = vld [vmem:[#allocation8 + $0x694] ss:$8 sps:$4 sm:$0xff]  }
0x107a   :  { %4878 = vmatprep.mubr.bf16.mxu0 %v4672_v5 }
0x107b   :  { %4879 = vmatmul.mubr.bf16.vlgmr.msra.gmra.mxu0 %v4671_v35 }
0x107c   :  { %5447 = vmatpush1.bf16.msra.mxu0 %v10393_v53 }
0x107d   :  { %5448 = vmatprep.subr.bf16.mxu0 %v10398_v57 }
0x1080   :  { %5449 = vmatpush1.bf16.msra.mxu0 %v10396_v59 }
0x113b   :  { %v4880_v62 = vpop.f32.mrf.mxu0 }
0x113c   :  { %v11124_v63 = vadd.f32 %v4880_v62, %v4679_v60  ;;  %v10401_v60 = vld [vmem:[#allocation8 + $0x654] ss:$8 sps:$4 sm:$0xff]   ;;  %v10404_v62 = vld [vmem:[#allocation8 + $0x644] ss:$8 sps:$4 sm:$0xff]  }
0x113d   :  { %v4882_v51 = vpop.f32.mrf.mxu0  ;;  %5450 = vmatprep.subr.bf16.mxu0 %v10401_v60 }
0x113e   :  { %v4883_v2 = vadd.f32 %v4882_v51, %v4683_v61  ;;  %v4895_v4 = vmul.f32 %v11124_v63, %v11124_v63  ;;  %v10399_v61 = vld [vmem:[#allocation8 + $0x650] ss:$8 sps:$4 sm:$0xff]   ;;  %v10407_v51 = vld [vmem:[#allocation8 + $0x634] ss:$8 sps:$4 sm:$0xff]  }
0x113f   :  { %v4884_v14 = vpop.f32.mrf.mxu0  ;;  %5451 = vmatpush1.bf16.msra.mxu0 %v10399_v61 }
0x1140   :  { %v4891_v3 = vadd.f32 %v4883_v2, %v11124_v63  ;;  %v4896_v6 = vmul.f32 %v4883_v2, %v4883_v2  ;;  %5452 = vmatprep.subr.bf16.mxu0 %v10404_v62  ;;  %v10410_v14 = vld [vmem:[#allocation8 + $0x624] ss:$8 sps:$4 sm:$0xff]  }
0x1141   :  { %v4885_v7 = vpop.f32.mrf.mxu0 }
0x1142   :  { %4892 = vadd.xlane.f32.xlu0 %v4891_v3  ;;  %v4897_v8 = vadd.f32 %v4896_v6, %v4895_v4  ;;  %v10408_v3 = vld [vmem:[#allocation8 + $0x620] ss:$8 sps:$4 sm:$0xff]   ;;  %v10413_v4 = vld [vmem:[#allocation8 + $0x614] ss:$8 sps:$4 sm:$0xff]   ;;  %v10411_v6 = vld [vmem:[#allocation8 + $0x610] ss:$8 sps:$4 sm:$0xff]  }
0x1143   :  { %v4972_v7 = vld [vmem:[#allocation17 + $0x17] ss:$8 sm:$0x3] }
0x1144   :  { %4898 = vadd.xlane.f32.xlu1 %v4897_v8  ;;  %v4977_v8 = vrot.slane %v4972_v7, %v11037_v38  ;;  %v4981_v9 = vrot.slane %v4972_v7, %v11040_v40 }
0x11cb   :  { %v4893_v31 = vpop.xlane.xlu0 %4892 }
0x11cc   :  { %v4894_v25 = vmul.f32 0.00390625, %v4893_v31  ;;  %v10420_v31 = vld [vmem:[#allocation8 + $0x6e0] ss:$8 sps:$4 sm:$0xff]  }
0x11cd   :  { %v4899_v47 = vpop.xlane.xlu1 %4898 }
0x11ce   :  { %v4900_v27 = vmul.f32 0.00390625, %v4899_v47  ;;  %v4901_v17 = vmul.f32 %v4894_v25, %v4894_v25  ;;  %v4904_v5 = vsub.f32 %v11124_v63, %v4894_v25  ;;  %v4905_v35 = vsub.f32 %v4883_v2, %v4894_v25  ;;  %v10402_v63 = vld [vmem:[#allocation8 + $0x640] ss:$8 sps:$4 sm:$0xff]   ;;  %v10405_v2 = vld [vmem:[#allocation8 + $0x630] ss:$8 sps:$4 sm:$0xff]  }
0x11cf   :  { %5453 = vmatpush1.bf16.msra.mxu0 %v10402_v63  ;;  %v10423_v25 = vld [vmem:[#allocation8 + $0x6d0] ss:$8 sps:$4 sm:$0xff]   ;;  %v10425_v47 = vld [vmem:[#allocation8 + $0x6d4] ss:$8 sps:$4 sm:$0xff]  }
0x11d0   :  { %v4902_v28 = vsub.f32 %v4900_v27, %v4901_v17  ;;  %5454 = vmatprep.subr.bf16.mxu0 %v10407_v51  ;;  %v10428_v27 = vld [vmem:[#allocation8 + $0x6c4] ss:$8 sps:$4 sm:$0xff]   ;;  %v10426_v17 = vld [vmem:[#allocation8 + $0x6c0] ss:$8 sps:$4 sm:$0xff]  }
0x11d2   :  { %v4903_v18 = vmax.f32 %v4902_v28, 0.0  ;;  %v10431_v28 = vld [vmem:[#allocation8 + $0x6b4] ss:$8 sps:$4 sm:$0xff]  }
0x11d3   :  { %5455 = vmatpush1.bf16.msra.mxu0 %v10405_v2 }
0x11d4   :  { %v4906_v29 = vadd.f32 1e-05, %v4903_v18  ;;  %5456 = vmatprep.subr.bf16.mxu0 %v10410_v14  ;;  %v10429_v18 = vld [vmem:[#allocation8 + $0x6b0] ss:$8 sps:$4 sm:$0xff]  }
0x11d6   :  { %10553 = vrsqrt.f32 %v4906_v29  ;;  %v10434_v29 = vld [vmem:[#allocation8 + $0x6a4] ss:$8 sps:$4 sm:$0xff]  }
0x11d7   :  { %5457 = vmatpush1.bf16.msra.mxu0 %v10408_v3 }
0x11d8   :  { %5458 = vmatprep.subr.bf16.mxu0 %v10413_v4 }
0x11db   :  { %5459 = vmatpush1.bf16.msra.mxu0 %v10411_v6 }
0x11dc   :  { %5460 = vmatprep.subr.bf16.mxu0 %v10416_v20  ;;  %v10461_v20 = vld [vmem:[#allocation8 + $0x714] ss:$8 sps:$4 sm:$0xff]  }
0x11df   :  { %5461 = vmatpush1.bf16.msra.mxu0 %v10414_v21  ;;  %v10459_v21 = vld [vmem:[#allocation8 + $0x710] ss:$8 sps:$4 sm:$0xff]  }
0x11e0   :  { %5462 = vmatprep.subr.bf16.mxu0 %v10419_v22  ;;  %v10464_v22 = vld [vmem:[#allocation8 + $0x704] ss:$8 sps:$4 sm:$0xff]  }
0x11e3   :  { %v10554_v39 = vpop.eup %10553  ;;  %5463 = vmatpush2.bf16.msra.mxu0 %v10417_v23  ;;  %v10462_v23 = vld [vmem:[#allocation8 + $0x700] ss:$8 sps:$4 sm:$0xff]  }
0x11e4   :  { %v4909_v54 = vmul.f32 %v10554_v39, %v4905_v35  ;;  %v4908_v44 = vmul.f32 %v10554_v39, %v4904_v5  ;;  %5464 = vmatprep.subr.bf16.mxu0 %v10422_v24  ;;  %v10435_v5 = vld [vmem:[#allocation8 + $0x690] ss:$8 sps:$4 sm:$0xff]   ;;  %v10440_v35 = vld [vmem:[#allocation8 + $0x684] ss:$8 sps:$4 sm:$0xff]  }
0x11e5   :  { %v5274_v24 = vld [vmem:[#allocation17 + $0x22] ss:$8 sm:$0x3] }
0x11e6   :  { %v4922_v45 = vmul.f32 %v4918_v26, %v4909_v54  ;;  %v4921_v46 = vmul.f32 %v4914_v36, %v4908_v44  ;;  %v10438_v36 = vld [vmem:[#allocation8 + $0x680] ss:$8 sps:$4 sm:$0xff]  }
0x11e7   :  { %5465 = vmatpush2.bf16.msra.mxu0 %v10420_v31  ;;  %v5279_v31 = vrot.slane %v5274_v24, %v11037_v38 }
0x11e8   :  { %v4935_v48 = vadd.f32 %v4931_v43, %v4922_v45  ;;  %v4934_v49 = vadd.f32 %v4927_v41, %v4921_v46  ;;  %5466 = vmatprep.subr.bf16.mxu0 %v10425_v47 }
0x11ea   :  { %v4970_v50 = vpack.c.bf16 %v4935_v48, %v4935_v48  ;;  %v4969_v52 = vpack.c.bf16 %v4934_v49, %v4934_v49  ;;  %v5186_v48 = vld [vmem:[#allocation17 + $0x20] ss:$8 sm:$0x3]  ;;  %v5188_v49 = vld [vmem:[#allocation17 + $0x21] ss:$8 sm:$0x3] }
0x11eb   :  { %5467 = vmatpush2.bf16.msra.mxu0 %v10423_v25  ;;  %v5212_v53 = vrot.slane %v5186_v48, %v11037_v38  ;;  %v5216_v55 = vrot.slane %v5186_v48, %v11040_v40  ;;  %v5225_v60 = vrot.slane %v5188_v49, %v11037_v38  ;;  %v5229_v61 = vrot.slane %v5188_v49, %v11040_v40  ;;  %v10477_v48 = vld [vmem:[#allocation8 + $0x7b0] ss:$8 sps:$4 sm:$0xff]   ;;  %v10482_v49 = vld [vmem:[#allocation8 + $0x7a4] ss:$8 sps:$4 sm:$0xff]  }
0x11ec   :  { %5176 = vmatprep.mubr.bf16.mxu1 %v4970_v50  ;;  %5468 = vmatprep.subr.bf16.mxu0 %v10428_v27  ;;  %v5283_v25 = vrot.slane %v5274_v24, %v11040_v40 }
0x11ed   :  { %5177 = vmatmul.mubr.bf16.vlgmr.msra.gmra.mxu1 %v4969_v52 }
0x11ef   :  { %5469 = vmatpush2.bf16.msra.mxu0 %v10426_v17 }
0x11f0   :  { %5470 = vmatprep.subr.bf16.mxu0 %v10431_v28 }
0x11f3   :  { %5471 = vmatpush2.bf16.msra.mxu0 %v10429_v18 }
0x11f4   :  { %5472 = vmatprep.subr.bf16.mxu0 %v10434_v29 }
0x11f7   :  { %5473 = vmatpush2.bf16.msra.mxu0 %v10432_v32 }
0x11f8   :  { %5474 = vmatprep.subr.bf16.mxu0 %v10437_v34 }
0x11fb   :  { %5475 = vmatpush2.bf16.msra.mxu0 %v10435_v5 }
0x11fc   :  { %5476 = vmatprep.subr.bf16.mxu0 %v10440_v35 }
0x11ff   :  { %5477 = vmatpush2.bf16.msra.mxu0 %v10438_v36  ;;  %v10467_v36 = vld [vmem:[#allocation8 + $0x7f4] ss:$8 sps:$4 sm:$0xff]  }
0x12ad   :  { %v5178_v10 = vpop.f32.mrf.mxu1 }
0x12ae   :  { %v11136_v11 = vadd.f32 %v5178_v10, %v4977_v8  ;;  %v10441_v10 = vld [vmem:[#allocation8 + $0x770] ss:$8 sps:$4 sm:$0xff]  }
0x12af   :  { %v5180_v42 = vpop.f32.mrf.mxu1 }
0x12b0   :  { %v5181_v12 = vadd.f32 %v5180_v42, %v4981_v9  ;;  %v5193_v16 = vmul.f32 %v11136_v11, %v11136_v11  ;;  %v10446_v42 = vld [vmem:[#allocation8 + $0x764] ss:$8 sps:$4 sm:$0xff]  }
0x12b1   :  { %v5182_v13 = vpop.f32.mrf.mxu1 }
0x12b2   :  { %v5189_v15 = vadd.f32 %v5181_v12, %v11136_v11  ;;  %v5194_v19 = vmul.f32 %v5181_v12, %v5181_v12  ;;  %v10447_v13 = vld [vmem:[#allocation8 + $0x750] ss:$8 sps:$4 sm:$0xff]  }
0x12b3   :  { %v5183_v56 = vpop.f32.mrf.mxu1 }
0x12b4   :  { %5190 = vadd.xlane.f32.xlu0 %v5189_v15  ;;  %v5195_v58 = vadd.f32 %v5194_v19, %v5193_v16  ;;  %v10450_v15 = vld [vmem:[#allocation8 + $0x740] ss:$8 sps:$4 sm:$0xff]   ;;  %v10455_v16 = vld [vmem:[#allocation8 + $0x734] ss:$8 sps:$4 sm:$0xff]   ;;  %v10453_v19 = vld [vmem:[#allocation8 + $0x730] ss:$8 sps:$4 sm:$0xff]  }
0x12b5   :  { %v10458_v56 = vld [vmem:[#allocation8 + $0x724] ss:$8 sps:$4 sm:$0xff]  }
0x12b6   :  { %5196 = vadd.xlane.f32.xlu1 %v5195_v58  ;;  %v10456_v58 = vld [vmem:[#allocation8 + $0x720] ss:$8 sps:$4 sm:$0xff]  }
0x133d   :  { %v5191_v26 = vpop.xlane.xlu0 %5190 }
0x133e   :  { %v5192_v39 = vmul.f32 0.00390625, %v5191_v26  ;;  %v10465_v26 = vld [vmem:[#allocation8 + $0x7f0] ss:$8 sps:$4 sm:$0xff]  }
0x133f   :  { %v5197_v54 = vpop.xlane.xlu1 %5196 }
0x1340   :  { %v5198_v41 = vmul.f32 0.00390625, %v5197_v54  ;;  %v5199_v43 = vmul.f32 %v5192_v39, %v5192_v39  ;;  %v5202_v50 = vsub.f32 %v11136_v11, %v5192_v39  ;;  %v5203_v52 = vsub.f32 %v5181_v12, %v5192_v39  ;;  %v10443_v11 = vld [vmem:[#allocation8 + $0x774] ss:$8 sps:$4 sm:$0xff]   ;;  %v10444_v12 = vld [vmem:[#allocation8 + $0x760] ss:$8 sps:$4 sm:$0xff]  }
0x1341   :  { %5744 = vmatprep.subr.bf16.mxu1 %v10443_v11  ;;  %v10470_v39 = vld [vmem:[#allocation8 + $0x7e4] ss:$8 sps:$4 sm:$0xff]   ;;  %v10468_v54 = vld [vmem:[#allocation8 + $0x7e0] ss:$8 sps:$4 sm:$0xff]  }
0x1342   :  { %v5200_v44 = vsub.f32 %v5198_v41, %v5199_v43  ;;  %5745 = vmatpush1.bf16.msra.mxu1 %v10441_v10  ;;  %v10473_v41 = vld [vmem:[#allocation8 + $0x7d4] ss:$8 sps:$4 sm:$0xff]   ;;  %v10471_v43 = vld [vmem:[#allocation8 + $0x7d0] ss:$8 sps:$4 sm:$0xff]  }
0x1343   :  { %5746 = vmatprep.subr.bf16.mxu1 %v10446_v42 }
0x1344   :  { %v5201_v45 = vmax.f32 %v5200_v44, 0.0  ;;  %v10474_v44 = vld [vmem:[#allocation8 + $0x7c0] ss:$8 sps:$4 sm:$0xff]  }
0x1346   :  { %v5204_v46 = vadd.f32 1e-05, %v5201_v45  ;;  %5747 = vmatpush1.bf16.msra.mxu1 %v10444_v12  ;;  %v10476_v45 = vld [vmem:[#allocation8 + $0x7c4] ss:$8 sps:$4 sm:$0xff]  }
0x1348   :  { %10555 = vrsqrt.f32 %v5204_v46  ;;  %v10479_v46 = vld [vmem:[#allocation8 + $0x7b4] ss:$8 sps:$4 sm:$0xff]  }
0x1355   :  { %v10556_v57 = vpop.eup %10555 }
0x1356   :  { %v5207_v59 = vmul.f32 %v10556_v57, %v5203_v52  ;;  %v5206_v62 = vmul.f32 %v10556_v57, %v5202_v50  ;;  %v10480_v50 = vld [vmem:[#allocation8 + $0x7a0] ss:$8 sps:$4 sm:$0xff]   ;;  %v10485_v52 = vld [vmem:[#allocation8 + $0x794] ss:$8 sps:$4 sm:$0xff]  }
0x1357   :  { %v10486_v57 = vld [vmem:[#allocation8 + $0x780] ss:$8 sps:$4 sm:$0xff]  }
0x1358   :  { %v5220_v63 = vmul.f32 %v5216_v55, %v5207_v59  ;;  %v5219_v51 = vmul.f32 %v5212_v53, %v5206_v62  ;;  %v10483_v53 = vld [vmem:[#allocation8 + $0x790] ss:$8 sps:$4 sm:$0xff]   ;;  %v10488_v55 = vld [vmem:[#allocation8 + $0x784] ss:$8 sps:$4 sm:$0xff]  }
0x135a   :  { %v5233_v2 = vadd.f32 %v5229_v61, %v5220_v63  ;;  %v5232_v14 = vadd.f32 %v5225_v60, %v5219_v51 }
0x135c   :  { %v5235_v3 = vmax.f32 %v5233_v2, 0.0  ;;  %v5234_v4 = vmax.f32 %v5232_v14, 0.0 }
0x135e   :  { %v11147_v6 = vadd.f32 %v5235_v3, %v11116_v33  ;;  %v11150_v7 = vadd.f32 %v5234_v4, %v11114_v30  ;;  %v10449_v33 = vld [vmem:[#allocation8 + $0x754] ss:$8 sps:$4 sm:$0xff]   ;;  %v10452_v30 = vld [vmem:[#allocation8 + $0x744] ss:$8 sps:$4 sm:$0xff]  }
0x135f   :  { %5748 = vmatprep.subr.bf16.mxu1 %v10449_v33  ;;  %v5488_v3 = vld [vmem:[#allocation17 + $0x23] ss:$8 sm:$0x3]  ;;  %v5490_v4 = vld [vmem:[#allocation17 + $0x24] ss:$8 sm:$0x3] }
0x1360   :  { %v5272_v8 = vpack.c.bf16 %v11147_v6, %v11147_v6  ;;  %v5271_v9 = vpack.c.bf16 %v11150_v7, %v11150_v7  ;;  %5749 = vmatpush1.bf16.msra.mxu1 %v10447_v13  ;;  %v5514_v10 = vrot.slane %v5488_v3, %v11037_v38  ;;  %v5518_v11 = vrot.slane %v5488_v3, %v11040_v40 }
0x1361   :  { %5750 = vmatprep.subr.bf16.mxu1 %v10452_v30  ;;  %v5527_v33 = vrot.slane %v5490_v4, %v11037_v38  ;;  %v5531_v13 = vrot.slane %v5490_v4, %v11040_v40 }
0x1362   :  { %5478 = vmatprep.mubr.bf16.mxu0 %v5272_v8 }
0x1363   :  { %5479 = vmatmul.mubr.bf16.vlgmr.msra.gmra.mxu0 %v5271_v9 }
0x1364   :  { %5751 = vmatpush1.bf16.msra.mxu1 %v10450_v15 }
0x1365   :  { %5752 = vmatprep.subr.bf16.mxu1 %v10455_v16 }
0x1368   :  { %5753 = vmatpush1.bf16.msra.mxu1 %v10453_v19 }
0x1369   :  { %5754 = vmatprep.subr.bf16.mxu1 %v10458_v56 }
0x136c   :  { %5755 = vmatpush1.bf16.msra.mxu1 %v10456_v58 }
0x136d   :  { %5756 = vmatprep.subr.bf16.mxu1 %v10461_v20 }
0x1370   :  { %5757 = vmatpush1.bf16.msra.mxu1 %v10459_v21  ;;  %v5572_v21 = vld [vmem:[#allocation17 + $0x25] ss:$8 sm:$0x3] }
0x1371   :  { %5758 = vmatprep.subr.bf16.mxu1 %v10464_v22  ;;  %v5577_v22 = vrot.slane %v5572_v21, %v11037_v38 }
0x1374   :  { %5759 = vmatpush1.bf16.msra.mxu1 %v10462_v23  ;;  %v5581_v23 = vrot.slane %v5572_v21, %v11040_v40 }
0x1375   :  { %5760 = vmatprep.subr.bf16.mxu1 %v10467_v36  ;;  %v10492_v36 = vld [vmem:[#allocation13 + $0x30] sm:$0xff]  }
0x1378   :  { %5761 = vmatpush2.bf16.msra.mxu1 %v10465_v26  ;;  %v10493_v26 = vld [vmem:[#allocation13 + $0x68] sm:$0xff]  }
0x1379   :  { %5762 = vmatprep.subr.bf16.mxu1 %v10470_v39  ;;  %v10494_v39 = vld [vmem:[#allocation13 + $0x28] sm:$0xff]  }
0x137c   :  { %5763 = vmatpush2.bf16.msra.mxu1 %v10468_v54  ;;  %v10495_v54 = vld [vmem:[#allocation13 + $0x60] sm:$0xff]  }
0x137d   :  { %5764 = vmatprep.subr.bf16.mxu1 %v10473_v41  ;;  %v10496_v41 = vld [vmem:[#allocation13 + $0x20] sm:$0xff]  }
0x1380   :  { %5765 = vmatpush2.bf16.msra.mxu1 %v10471_v43  ;;  %v10497_v43 = vld [vmem:[#allocation13 + $0x58] sm:$0xff]  }
0x1381   :  { %5766 = vmatprep.subr.bf16.mxu1 %v10476_v45  ;;  %v10499_v45 = vld [vmem:[#allocation13 + $0x50] sm:$0xff]  }
0x1384   :  { %5767 = vmatpush2.bf16.msra.mxu1 %v10474_v44  ;;  %v10498_v44 = vld [vmem:[#allocation13 + $0x18] sm:$0xff]  }
0x1385   :  { %5768 = vmatprep.subr.bf16.mxu1 %v10479_v46  ;;  %v10500_v46 = vld [vmem:[#allocation13 + $0x10] sm:$0xff]  }
0x1388   :  { %5769 = vmatpush2.bf16.msra.mxu1 %v10477_v48  ;;  %v10501_v48 = vld [vmem:[#allocation13 + $0x48] sm:$0xff]  }
0x1389   :  { %5770 = vmatprep.subr.bf16.mxu1 %v10482_v49  ;;  %v10502_v49 = vld [vmem:[#allocation13 + $0x8] sm:$0xff]  }
0x138c   :  { %5771 = vmatpush2.bf16.msra.mxu1 %v10480_v50  ;;  %v10503_v50 = vld [vmem:[#allocation13 + $0x40] sm:$0xff]  }
0x138d   :  { %5772 = vmatprep.subr.bf16.mxu1 %v10485_v52  ;;  %v10504_v52 = vld [vmem:[#allocation13] sm:$0xff]  }
0x1390   :  { %5773 = vmatpush2.bf16.msra.mxu1 %v10483_v53 }
0x1391   :  { %5774 = vmatprep.subr.bf16.mxu1 %v10488_v55 }
0x1394   :  { %5775 = vmatpush2.bf16.msra.mxu1 %v10486_v57 }
0x1395   :  { %9710 = vmatprep.subr.bf16.mxu1 %v10822_v1 }
0x1423   :  { %v5480_v47 = vpop.f32.mrf.mxu0 }
0x1424   :  { %v11158_v27 = vadd.f32 %v5480_v47, %v5279_v31 }
0x1425   :  { %v5482_v17 = vpop.f32.mrf.mxu0 }
0x1426   :  { %v5483_v28 = vadd.f32 %v5482_v17, %v5283_v25  ;;  %v5495_v32 = vmul.f32 %v11158_v27, %v11158_v27 }
0x1427   :  { %v5484_v18 = vpop.f32.mrf.mxu0 }
0x1428   :  { %v5491_v29 = vadd.f32 %v5483_v28, %v11158_v27  ;;  %v5496_v34 = vmul.f32 %v5483_v28, %v5483_v28 }
0x1429   :  { %v5485_v5 = vpop.f32.mrf.mxu0 }
0x142a   :  { %5492 = vadd.xlane.f32.xlu0 %v5491_v29  ;;  %v5497_v35 = vadd.f32 %v5496_v34, %v5495_v32  ;;  %v10489_v34 = vld [vmem:[#allocation13 + $0x78] sm:$0xff]  }
0x142b   :  { %v10490_v5 = vld [vmem:[#allocation13 + $0x38] sm:$0xff]   ;;  %9512 = vmatprep.subr.bf16.mxu0 %v10489_v34 }
0x142c   :  { %5498 = vadd.xlane.f32.xlu1 %v5497_v35  ;;  %9513 = vmatpush3.bf16.msra.mxu0 %v10490_v5  ;;  %v10491_v35 = vld [vmem:[#allocation13 + $0x70] sm:$0xff]  }
0x142d   :  { %9514 = vmatprep.subr.bf16.mxu0 %v10491_v35 }
0x1430   :  { %9515 = vmatpush3.bf16.msra.mxu0 %v10492_v36  ;;  %v8958_v36 = vld [vmem:[#allocation16 + $0x10] ss:$0 sm:$0xff] }
0x1431   :  { %9516 = vmatprep.subr.bf16.mxu0 %v10493_v26 }
0x1434   :  { %9517 = vmatpush3.bf16.msra.mxu0 %v10494_v39 }
0x1435   :  { %9518 = vmatprep.subr.bf16.mxu0 %v10495_v54 }
0x1438   :  { %9519 = vmatpush3.bf16.msra.mxu0 %v10496_v41 }
0x1439   :  { %9520 = vmatprep.subr.bf16.mxu0 %v10497_v43 }
0x143c   :  { %9521 = vmatpush3.bf16.msra.mxu0 %v10498_v44 }
0x143d   :  { %9522 = vmatprep.subr.bf16.mxu0 %v10499_v45  ;;  %v10513_v45 = vld [vmem:[#allocation7 + $0x1f8] sm:$0xff]  }
0x1440   :  { %9523 = vmatpush3.bf16.msra.mxu0 %v10500_v46  ;;  %v10514_v46 = vld [vmem:[#allocation7 + $0x1f0] sm:$0xff]  }
0x1441   :  { %9524 = vmatprep.subr.bf16.mxu0 %v10501_v48  ;;  %v10515_v48 = vld [vmem:[#allocation7 + $0x1e8] sm:$0xff]  }
0x1444   :  { %9525 = vmatpush3.bf16.msra.mxu0 %v10502_v49  ;;  %v10516_v49 = vld [vmem:[#allocation7 + $0x1e0] sm:$0xff]  }
0x1445   :  { %9526 = vmatprep.subr.bf16.mxu0 %v10503_v50  ;;  %v10517_v50 = vld [vmem:[#allocation7 + $0x1d8] sm:$0xff]  }
0x1448   :  { %9527 = vmatpush3.bf16.msra.mxu0 %v10504_v52  ;;  %v10518_v52 = vld [vmem:[#allocation7 + $0x1d0] sm:$0xff]  }
0x1449   :  { %9690 = vmatprep.subr.bf16.mxu0 %v10822_v1 }
0x14b3   :  { %v5493_v59 = vpop.xlane.xlu0 %5492 }
0x14b4   :  { %v5494_v60 = vmul.f32 0.00390625, %v5493_v59 }
0x14b5   :  { %v5499_v61 = vpop.xlane.xlu1 %5498 }
0x14b6   :  { %v5500_v62 = vmul.f32 0.00390625, %v5499_v61  ;;  %v5501_v63 = vmul.f32 %v5494_v60, %v5494_v60  ;;  %v5504_v8 = vsub.f32 %v11158_v27, %v5494_v60  ;;  %v5505_v9 = vsub.f32 %v5483_v28, %v5494_v60 }
0x14b8   :  { %v5502_v51 = vsub.f32 %v5500_v62, %v5501_v63 }
0x14ba   :  { %v5503_v2 = vmax.f32 %v5502_v51, 0.0  ;;  %v5786_v51 = vld [vmem:[#allocation17 + $0x26] ss:$8 sm:$0x3] }
0x14bb   :  { %v5812_v4 = vrot.slane %v5786_v51, %v11037_v38 }
0x14bc   :  { %v5506_v14 = vadd.f32 1e-05, %v5503_v2  ;;  %v5788_v2 = vld [vmem:[#allocation17 + $0x27] ss:$8 sm:$0x3] }
0x14be   :  { %10557 = vrsqrt.f32 %v5506_v14 }
0x14cb   :  { %v10558_v42 = vpop.eup %10557 }
0x14cc   :  { %v5509_v12 = vmul.f32 %v10558_v42, %v5505_v9  ;;  %v5508_v30 = vmul.f32 %v10558_v42, %v5504_v8  ;;  %v5816_v8 = vrot.slane %v5786_v51, %v11040_v40  ;;  %v5829_v42 = vrot.slane %v5788_v2, %v11040_v40 }
0x14ce   :  { %v5522_v15 = vmul.f32 %v5518_v11, %v5509_v12  ;;  %v5521_v16 = vmul.f32 %v5514_v10, %v5508_v30  ;;  %v5825_v11 = vrot.slane %v5788_v2, %v11037_v38 }
0x14d0   :  { %v5535_v19 = vadd.f32 %v5531_v13, %v5522_v15  ;;  %v5534_v56 = vadd.f32 %v5527_v33, %v5521_v16 }
0x14d2   :  { %v5570_v58 = vpack.c.bf16 %v5535_v19, %v5535_v19  ;;  %v5569_v20 = vpack.c.bf16 %v5534_v56, %v5534_v56 }
0x14d4   :  { %5776 = vmatprep.mubr.bf16.mxu1 %v5570_v58 }
0x14d5   :  { %5777 = vmatmul.mubr.bf16.vlgmr.msra.gmra.mxu1 %v5569_v20 }
0x14d6   :  { %9726 = vmatprep.mubr.msk.bf16.mxu1 %vm10823_vm0, %v10822_v1  ;;  %9711 = vmatpush3.bf16.msra.mxu1 %v10513_v45 }
0x14d7   :  { %9712 = vmatprep.subr.bf16.mxu1 %v10822_v1 }
0x14da   :  { %9713 = vmatpush3.bf16.msra.mxu1 %v10514_v46 }
0x14db   :  { %9714 = vmatprep.subr.bf16.mxu1 %v10822_v1 }
0x14de   :  { %9715 = vmatpush3.bf16.msra.mxu1 %v10515_v48 }
0x14df   :  { %9716 = vmatprep.subr.bf16.mxu1 %v10822_v1 }
0x14e2   :  { %9717 = vmatpush3.bf16.msra.mxu1 %v10516_v49 }
0x14e3   :  { %9718 = vmatprep.subr.bf16.mxu1 %v10822_v1 }
0x14e6   :  { %9719 = vmatpush3.bf16.msra.mxu1 %v10517_v50 }
0x14e7   :  { %9720 = vmatprep.subr.bf16.mxu1 %v10822_v1 }
0x14ea   :  { %9721 = vmatpush3.bf16.msra.mxu1 %v10518_v52 }
0x14eb   :  { %9722 = vmatprep.subr.bf16.mxu1 %v10822_v1 }
0x1595   :  { %v5778_v24 = vpop.f32.mrf.mxu1 }
0x1596   :  { %v11173_v31 = vadd.f32 %v5778_v24, %v5577_v22  ;;  %v10505_v22 = vld [vmem:[#allocation7 + $0x1b8] sm:$0xff]   ;;  %v10507_v24 = vld [vmem:[#allocation7 + $0x1a8] sm:$0xff]  }
0x1597   :  { %v5780_v25 = vpop.f32.mrf.mxu1 }
0x1598   :  { %v5781_v47 = vadd.f32 %v5780_v25, %v5581_v23  ;;  %v5793_v28 = vmul.f32 %v11173_v31, %v11173_v31  ;;  %v10506_v23 = vld [vmem:[#allocation7 + $0x1b0] sm:$0xff]   ;;  %v10511_v25 = vld [vmem:[#allocation7 + $0x188] sm:$0xff]  }
0x1599   :  { %v5782_v27 = vpop.f32.mrf.mxu1 }
0x159a   :  { %v5789_v17 = vadd.f32 %v5781_v47, %v11173_v31  ;;  %v5794_v18 = vmul.f32 %v5781_v47, %v5781_v47 }
0x159b   :  { %v5783_v29 = vpop.f32.mrf.mxu1 }
0x159c   :  { %5790 = vadd.xlane.f32.xlu0 %v5789_v17  ;;  %v5795_v32 = vadd.f32 %v5794_v18, %v5793_v28  ;;  %v8941_v17 = vld [vmem:[#allocation16 + $0x1c] ss:$0 sm:$0xff] }
0x159e   :  { %5796 = vadd.xlane.f32.xlu1 %v5795_v32 }
0x1625   :  { %v5791_v53 = vpop.xlane.xlu0 %5790 }
0x1626   :  { %v5792_v55 = vmul.f32 0.00390625, %v5791_v53  ;;  %v10519_v53 = vld [vmem:[#allocation7 + $0x1c8] sm:$0xff]  }
0x1627   :  { %v5797_v57 = vpop.xlane.xlu1 %5796  ;;  %9723 = vmatpush3.bf16.msra.mxu1 %v10519_v53  ;;  %v10529_v53 = vld [vmem:[#allocation7 + $0x278] sm:$0xff]  }
0x1628   :  { %v5798_v59 = vmul.f32 0.00390625, %v5797_v57  ;;  %v5799_v60 = vmul.f32 %v5792_v55, %v5792_v55  ;;  %v5802_v14 = vsub.f32 %v11173_v31, %v5792_v55  ;;  %v5803_v3 = vsub.f32 %v5781_v47, %v5792_v55  ;;  %v10510_v31 = vld [vmem:[#allocation7 + $0x190] sm:$0xff]   ;;  %v10512_v47 = vld [vmem:[#allocation7 + $0x180] sm:$0xff]   ;;  %9724 = vmatprep.subr.bf16.mxu1 %v10822_v1 }
0x1629   :  { %v10520_v55 = vld [vmem:[#allocation7 + $0x1c0] sm:$0xff]  }
0x162a   :  { %v5800_v61 = vsub.f32 %v5798_v59, %v5799_v60 }
0x162b   :  { %9725 = vmatpush3.bf16.msra.mxu1 %v10520_v55  ;;  %v10531_v55 = vld [vmem:[#allocation7 + $0x268] sm:$0xff]  }
0x162c   :  { %v5801_v62 = vmax.f32 %v5800_v61, 0.0  ;;  %9750 = vmatprep.subr.bf16.mxu1 %v10822_v1 }
0x162e   :  { %v5804_v63 = vadd.f32 1e-05, %v5801_v62 }
0x1630   :  { %10559 = vrsqrt.f32 %v5804_v63 }
0x163d   :  { %v10560_v9 = vpop.eup %10559 }
0x163e   :  { %v5807_v10 = vmul.f32 %v10560_v9, %v5803_v3  ;;  %v5806_v12 = vmul.f32 %v10560_v9, %v5802_v14  ;;  %v8968_v9 = vld [vmem:[#allocation16 + $0x12] ss:$0 sm:$0xff] }
0x1640   :  { %v5820_v33 = vmul.f32 %v5816_v8, %v5807_v10  ;;  %v5819_v13 = vmul.f32 %v5812_v4, %v5806_v12  ;;  %v8967_v4 = vld [vmem:[#allocation16 + $0x11] ss:$0 sm:$0xff]  ;;  %v8969_v12 = vld [vmem:[#allocation16 + $0x13] ss:$0 sm:$0xff] }
0x1642   :  { %v5833_v30 = vadd.f32 %v5829_v42, %v5820_v33  ;;  %v5832_v15 = vadd.f32 %v5825_v11, %v5819_v13 }
0x1644   :  { %v5835_v16 = vmax.f32 %v5833_v30, 0.0  ;;  %v5834_v19 = vmax.f32 %v5832_v15, 0.0 }
0x1646   :  { %v5837_v56 = vadd.f32 %v5835_v16, %v11147_v6  ;;  %v5836_v58 = vadd.f32 %v5834_v19, %v11150_v7  ;;  %v10508_v6 = vld [vmem:[#allocation7 + $0x1a0] sm:$0xff]   ;;  %v10509_v7 = vld [vmem:[#allocation7 + $0x198] sm:$0xff]  }
0x1648   :  { %v5871_v20 = vpack.c.bf16 %v5837_v56, %v5837_v56  ;;  %v5870_v21 = vpack.c.bf16 %v5836_v58, %v5836_v58  ;;  %v10521_v56 = vld [vmem:[#allocation7 + $0x238] sm:$0xff]   ;;  %v10522_v58 = vld [vmem:[#allocation7 + $0x230] sm:$0xff]  }
0x164a   :  { %6005 = vmatprep.mubr.bf16.mxu0 %v5871_v20  ;;  %v10523_v20 = vld [vmem:[#allocation7 + $0x228] sm:$0xff]  }
0x164b   :  { %6006 = vmatmul.mubr.bf16.vlgmr.msra.gmra.mxu0 %v5870_v21  ;;  %v10524_v21 = vld [vmem:[#allocation7 + $0x220] sm:$0xff]  }
0x164c   :  { %9691 = vmatpush3.bf16.msra.mxu0 %v10505_v22  ;;  %9706 = vmatprep.mubr.msk.bf16.mxu0 %vm10823_vm0, %v10822_v1  ;;  %v10525_v22 = vld [vmem:[#allocation7 + $0x218] sm:$0xff]  }
0x164d   :  { %9692 = vmatprep.subr.bf16.mxu0 %v10822_v1 }
0x1650   :  { %9693 = vmatpush3.bf16.msra.mxu0 %v10506_v23  ;;  %v10526_v23 = vld [vmem:[#allocation7 + $0x210] sm:$0xff]  }
0x1651   :  { %9694 = vmatprep.subr.bf16.mxu0 %v10822_v1 }
0x1654   :  { %9695 = vmatpush3.bf16.msra.mxu0 %v10507_v24  ;;  %v10527_v24 = vld [vmem:[#allocation7 + $0x208] sm:$0xff]  }
0x1655   :  { %9696 = vmatprep.subr.bf16.mxu0 %v10822_v1 }
0x1658   :  { %9697 = vmatpush3.bf16.msra.mxu0 %v10508_v6  ;;  %v10528_v6 = vld [vmem:[#allocation7 + $0x200] sm:$0xff]  }
0x1659   :  { %9698 = vmatprep.subr.bf16.mxu0 %v10822_v1 }
0x165c   :  { %9699 = vmatpush3.bf16.msra.mxu0 %v10509_v7 }
0x165d   :  { %9700 = vmatprep.subr.bf16.mxu0 %v10822_v1 }
0x1660   :  { %9701 = vmatpush3.bf16.msra.mxu0 %v10510_v31 }
0x1661   :  { %9702 = vmatprep.subr.bf16.mxu0 %v10822_v1 }
0x1664   :  { %9703 = vmatpush3.bf16.msra.mxu0 %v10511_v25 }
0x1665   :  { %9704 = vmatprep.subr.bf16.mxu0 %v10822_v1 }
0x1668   :  { %9705 = vmatpush3.bf16.msra.mxu0 %v10512_v47 }
0x1669   :  { %9730 = vmatprep.subr.bf16.mxu0 %v10822_v1 }
0x170b   :  { %v9528_v27 = vpop.f32.mrf.mxu0 }
0x170d   :  { %v9529_v28 = vpop.f32.mrf.mxu0 }
0x170e   :  { %v9530_v18 = vadd.f32 %v9529_v28, %v9528_v27 }
0x170f   :  { %v9531_v29 = vpop.f32.mrf.mxu0 }
0x1710   :  { %v6008_v32 = vadd.f32 %v9530_v18, %v8941_v17 }
0x1711   :  { %v9532_v34 = vpop.f32.mrf.mxu0 }
0x1712   :  { %v11196_v5 = vmax.f32 %v6008_v32, 0.0  ;;  %v8978_v34 = vld [vmem:[#allocation16 + $0x14] ss:$0 sm:$0xff] }
0x1714   :  { %v6031_v35 = vpack.c.bf16 %v11196_v5, %v11196_v5 }
0x1716   :  { %9707 = vmatmul.mubr.bf16.vlgmr.msra.gmra.mxu0 %v6031_v35 }
0x1717   :  { %9746 = vmatprep.mubr.msk.bf16.mxu0 %vm10823_vm0, %v10822_v1  ;;  %9731 = vmatpush3.bf16.msra.mxu0 %v10521_v56 }
0x1718   :  { %9732 = vmatprep.subr.bf16.mxu0 %v10822_v1 }
0x171b   :  { %9733 = vmatpush3.bf16.msra.mxu0 %v10522_v58 }
0x171c   :  { %9734 = vmatprep.subr.bf16.mxu0 %v10822_v1 }
0x171f   :  { %9735 = vmatpush3.bf16.msra.mxu0 %v10523_v20 }
0x1720   :  { %9736 = vmatprep.subr.bf16.mxu0 %v10822_v1 }
0x1723   :  { %9737 = vmatpush3.bf16.msra.mxu0 %v10524_v21 }
0x1724   :  { %9738 = vmatprep.subr.bf16.mxu0 %v10822_v1 }
0x1727   :  { %9739 = vmatpush3.bf16.msra.mxu0 %v10525_v22  ;;  %v6734_v22 = vld [vmem:[#allocation14 + $0x540] sm:$0xff] }
0x1728   :  { %9740 = vmatprep.subr.bf16.mxu0 %v10822_v1 }
0x172b   :  { %9741 = vmatpush3.bf16.msra.mxu0 %v10526_v23  ;;  %v6746_v23 = vld [vmem:[#allocation14 + $0x5a0] sm:$0xff] }
0x172c   :  { %9742 = vmatprep.subr.bf16.mxu0 %v10822_v1 }
0x172f   :  { %9743 = vmatpush3.bf16.msra.mxu0 %v10527_v24  ;;  %v6735_v24 = vld [vmem:[#allocation14 + $0x548] sm:$0xff] }
0x1730   :  { %9744 = vmatprep.subr.bf16.mxu0 %v10822_v1 }
0x1733   :  { %9745 = vmatpush3.bf16.msra.mxu0 %v10528_v6  ;;  %v9171_v6 = vcombine.high %v6734_v22, %v6746_v23 }
0x1735   :  { %7845 = vmatprep.subr.bf16.mxu0 %v9171_v6 }
0x17d6   :  { %v6119_v26 = vpop.f32.mrf.mxu0 }
0x17d7   :  { %v6120_v39 = vadd.f32 %v8958_v36, %v6119_v26  ;;  %v8979_v36 = vld [vmem:[#allocation16 + $0x15] ss:$0 sm:$0xff] }
0x17d8   :  { %v9708_v54 = vpop.f32.mrf.mxu0 }
0x17d9   :  { %6127 = vadd.xlane.f32.xlu0 %v6120_v39  ;;  %v6130_v41 = vmul.f32 %v6120_v39, %v6120_v39 }
0x17da   :  { %v6122_v43 = vpop.f32.mrf.mxu0 }
0x17db   :  { %6131 = vadd.xlane.f32.xlu1 %v6130_v41 }
0x17dc   :  { %v9709_v44 = vpop.f32.mrf.mxu0 }
0x17dd   :  { %v8980_v44 = vld [vmem:[#allocation16 + $0x16] ss:$0 sm:$0xff] }
0x1862   :  { %v6128_v57 = vpop.xlane.xlu0 %6127 }
0x1863   :  { %v6129_v59 = vmul.f32 0.0078125, %v6128_v57  ;;  %v10532_v57 = vld [vmem:[#allocation7 + $0x260] sm:$0xff]  }
0x1864   :  { %v6132_v60 = vpop.xlane.xlu1 %6131 }
0x1865   :  { %v6134_v61 = vmul.f32 %v6129_v59, %v6129_v59  ;;  %v6133_v62 = vmul.f32 0.0078125, %v6132_v60  ;;  %v6137_v14 = vsub.f32 %v6120_v39, %v6129_v59  ;;  %v10533_v59 = vld [vmem:[#allocation7 + $0x258] sm:$0xff]   ;;  %v10534_v60 = vld [vmem:[#allocation7 + $0x250] sm:$0xff]  }
0x1867   :  { %v6135_v63 = vsub.f32 %v6133_v62, %v6134_v61  ;;  %v10535_v61 = vld [vmem:[#allocation7 + $0x248] sm:$0xff]   ;;  %v10536_v62 = vld [vmem:[#allocation7 + $0x240] sm:$0xff]  }
0x1869   :  { %v6136_v51 = vmax.f32 %v6135_v63, 0.0 }
0x186b   :  { %v6138_v2 = vadd.f32 1e-05, %v6136_v51 }
0x186d   :  { %10561 = vrsqrt.f32 %v6138_v2 }
0x187a   :  { %v10562_v3 = vpop.eup %10561 }
0x187b   :  { %v6140_v8 = vmul.f32 %v10562_v3, %v6137_v14 }
0x187d   :  { %v6145_v10 = vmul.f32 %v8967_v4, %v6140_v8 }
0x187f   :  { %v6150_v11 = vadd.f32 %v8968_v9, %v6145_v10 }
0x1881   :  { %v6168_v42 = vpack.c.bf16 %v6150_v11, %v6150_v11 }
0x1883   :  { %9727 = vmatmul.mubr.bf16.vlgmr.msra.gmra.mxu1 %v6168_v42  ;;  %v8989_v42 = vld [vmem:[#allocation16 + $0x17] ss:$0 sm:$0xff] }
0x1884   :  { %9766 = vmatprep.mubr.msk.bf16.mxu1 %vm10823_vm0, %v10822_v1  ;;  %9751 = vmatpush3.bf16.msra.mxu1 %v10529_v53  ;;  %v6675_v53 = vld [vmem:[#allocation14 + $0x368] sm:$0xff] }
0x1885   :  { %9752 = vmatprep.subr.bf16.mxu1 %v10822_v1 }
0x1943   :  { %v6256_v33 = vpop.f32.mrf.mxu1 }
0x1944   :  { %v6257_v13 = vadd.f32 %v8969_v12, %v6256_v33  ;;  %v8990_v33 = vld [vmem:[#allocation16 + $0x18] ss:$0 sm:$0xff] }
0x1945   :  { %v9728_v30 = vpop.f32.mrf.mxu1 }
0x1946   :  { %6264 = vadd.xlane.f32.xlu0 %v6257_v13  ;;  %v6267_v15 = vmul.f32 %v6257_v13, %v6257_v13 }
0x1947   :  { %v6259_v16 = vpop.f32.mrf.mxu1 }
0x1948   :  { %6268 = vadd.xlane.f32.xlu1 %v6267_v15 }
0x1949   :  { %v9729_v19 = vpop.f32.mrf.mxu1 }
0x19cf   :  { %v6265_v7 = vpop.xlane.xlu0 %6264 }
0x19d0   :  { %v6266_v31 = vmul.f32 0.0078125, %v6265_v7  ;;  %v6747_v7 = vld [vmem:[#allocation14 + $0x5a8] sm:$0xff] }
0x19d1   :  { %v6269_v25 = vpop.xlane.xlu1 %6268 }
0x19d2   :  { %v6271_v47 = vmul.f32 %v6266_v31, %v6266_v31  ;;  %v6270_v27 = vmul.f32 0.0078125, %v6269_v25  ;;  %v6274_v29 = vsub.f32 %v6257_v13, %v6266_v31  ;;  %v9170_v31 = vcombine.low %v6734_v22, %v6746_v23  ;;  %v6567_v22 = vld [vmem:[#allocation14 + $0x8] sm:$0xff] }
0x19d3   :  { %v9172_v25 = vcombine.low %v6735_v24, %v6747_v7 }
0x19d4   :  { %v6272_v17 = vsub.f32 %v6270_v27, %v6271_v47  ;;  %v9173_v47 = vcombine.high %v6735_v24, %v6747_v7  ;;  %v6710_v27 = vld [vmem:[#allocation14 + $0x480] sm:$0xff]  ;;  %v6579_v24 = vld [vmem:[#allocation14 + $0x68] sm:$0xff] }
0x19d5   :  { %v9004_v7 = vcombine.low %v6567_v22, %v6579_v24 }
0x19d6   :  { %v6273_v28 = vmax.f32 %v6272_v17, 0.0  ;;  %v6722_v17 = vld [vmem:[#allocation14 + $0x4e0] sm:$0xff] }
0x19d8   :  { %v6275_v18 = vadd.f32 1e-05, %v6273_v28  ;;  %v6711_v28 = vld [vmem:[#allocation14 + $0x488] sm:$0xff] }
0x19da   :  { %10563 = vrsqrt.f32 %v6275_v18  ;;  %v9147_v18 = vcombine.high %v6710_v27, %v6722_v17 }
0x19e7   :  { %v10564_v32 = vpop.eup %10563 }
0x19e8   :  { %v6277_v35 = vmul.f32 %v10564_v32, %v6274_v29  ;;  %v6723_v29 = vld [vmem:[#allocation14 + $0x4e8] sm:$0xff]  ;;  %v9146_v32 = vcombine.low %v6710_v27, %v6722_v17  ;;  %v6737_v27 = vld [vmem:[#allocation14 + $0x558] sm:$0xff] }
0x19ea   :  { %v6282_v26 = vmul.f32 %v8978_v34, %v6277_v35  ;;  %v9148_v34 = vcombine.low %v6711_v28, %v6723_v29  ;;  %v9149_v35 = vcombine.high %v6711_v28, %v6723_v29  ;;  %v6749_v28 = vld [vmem:[#allocation14 + $0x5b8] sm:$0xff] }
0x19eb   :  { %v9176_v29 = vcombine.low %v6737_v27, %v6749_v28 }
0x19ec   :  { %v6287_v39 = vadd.f32 %v8979_v36, %v6282_v26  ;;  %v6686_v36 = vld [vmem:[#allocation14 + $0x3c0] sm:$0xff] }
0x19ed   :  { %v6698_v26 = vld [vmem:[#allocation14 + $0x420] sm:$0xff] }
0x19ee   :  { %v6288_v54 = vmax.f32 %v6287_v39, 0.0  ;;  %v6687_v39 = vld [vmem:[#allocation14 + $0x3c8] sm:$0xff] }
0x19f0   :  { %v11220_v41 = vadd.f32 %v6288_v54, %v11196_v5  ;;  %v10530_v5 = vld [vmem:[#allocation7 + $0x270] sm:$0xff]   ;;  %v9123_v54 = vcombine.high %v6686_v36, %v6698_v26 }
0x19f1   :  { %9753 = vmatpush3.bf16.msra.mxu1 %v10530_v5 }
0x19f2   :  { %v6307_v43 = vpack.c.bf16 %v11220_v41, %v11220_v41  ;;  %9754 = vmatprep.subr.bf16.mxu1 %v10822_v1 }
0x19f4   :  { %9747 = vmatmul.mubr.bf16.vlgmr.msra.gmra.mxu0 %v6307_v43  ;;  %v6699_v43 = vld [vmem:[#allocation14 + $0x428] sm:$0xff] }
0x19f5   :  { %7877 = vmatprep.mubr.bf16.mxu0 %v10821_v0  ;;  %9755 = vmatpush3.bf16.msra.mxu1 %v10531_v55 }
0x19f6   :  { %9756 = vmatprep.subr.bf16.mxu1 %v10822_v1  ;;  %7846 = vmatpush1.bf16.msra.mxu0 %v9170_v31  ;;  %v9005_v31 = vcombine.high %v6567_v22, %v6579_v24  ;;  %v6616_v24 = vld [vmem:[#allocation14 + $0x190] sm:$0xff] }
0x19f7   :  { %7847 = vmatprep.subr.bf16.mxu0 %v9147_v18 }
0x19f9   :  { %9757 = vmatpush3.bf16.msra.mxu1 %v10532_v57 }
0x19fa   :  { %9758 = vmatprep.subr.bf16.mxu1 %v10822_v1  ;;  %7848 = vmatpush1.bf16.msra.mxu0 %v9146_v32  ;;  %v9177_v32 = vcombine.high %v6737_v27, %v6749_v28  ;;  %v6592_v28 = vld [vmem:[#allocation14 + $0xd0] sm:$0xff] }
0x19fb   :  { %7849 = vmatprep.subr.bf16.mxu0 %v9123_v54 }
0x19fd   :  { %9759 = vmatpush3.bf16.msra.mxu1 %v10533_v59  ;;  %v6638_v59 = vld [vmem:[#allocation14 + $0x240] sm:$0xff] }
0x19fe   :  { %9760 = vmatprep.subr.bf16.mxu1 %v10822_v1 }
0x1a01   :  { %9761 = vmatpush3.bf16.msra.mxu1 %v10534_v60  ;;  %v6650_v60 = vld [vmem:[#allocation14 + $0x2a0] sm:$0xff] }
0x1a02   :  { %9762 = vmatprep.subr.bf16.mxu1 %v10822_v1 }
0x1a05   :  { %9763 = vmatpush3.bf16.msra.mxu1 %v10535_v61  ;;  %v6639_v61 = vld [vmem:[#allocation14 + $0x248] sm:$0xff] }
0x1a06   :  { %9764 = vmatprep.subr.bf16.mxu1 %v10822_v1  ;;  %v8991_v1 = vld [vmem:[#allocation16 + $0x19] ss:$0 sm:$0xff] }
0x1a09   :  { %9765 = vmatpush3.bf16.msra.mxu1 %v10536_v62  ;;  %v9075_v62 = vcombine.high %v6638_v59, %v6650_v60 }
0x1a0a   :  { %7886 = vmatprep.subr.bf16.mxu1 %v9173_v47  ;;  %v6748_v47 = vld [vmem:[#allocation14 + $0x5b0] sm:$0xff] }
0x1ab4   :  { %v6395_v45 = vpop.f32.mrf.mxu0 }
0x1ab5   :  { %v6396_v46 = vadd.f32 %v8980_v44, %v6395_v45  ;;  %v9122_v44 = vcombine.low %v6686_v36, %v6698_v26  ;;  %v9124_v45 = vcombine.low %v6687_v39, %v6699_v43 }
0x1ab6   :  { %v9748_v48 = vpop.f32.mrf.mxu0 }
0x1ab7   :  { %6403 = vadd.xlane.f32.xlu0 %v6396_v46  ;;  %v6406_v49 = vmul.f32 %v6396_v46, %v6396_v46  ;;  %7850 = vmatpush1.bf16.msra.mxu0 %v9122_v44  ;;  %v6662_v48 = vld [vmem:[#allocation14 + $0x300] sm:$0xff] }
0x1ab8   :  { %v6398_v50 = vpop.f32.mrf.mxu0 }
0x1ab9   :  { %6407 = vadd.xlane.f32.xlu1 %v6406_v49  ;;  %v6674_v49 = vld [vmem:[#allocation14 + $0x360] sm:$0xff]  ;;  %v6663_v50 = vld [vmem:[#allocation14 + $0x308] sm:$0xff] }
0x1aba   :  { %v9749_v52 = vpop.f32.mrf.mxu0  ;;  %v9098_v5 = vcombine.low %v6662_v48, %v6674_v49  ;;  %v9100_v55 = vcombine.low %v6663_v50, %v6675_v53  ;;  %v9101_v57 = vcombine.high %v6663_v50, %v6675_v53  ;;  %v9001_v50 = vld [vmem:[#allocation16 + $0x1b] ss:$0 sm:$0xff] }
0x1abb   :  { %v9099_v52 = vcombine.high %v6662_v48, %v6674_v49  ;;  %v9000_v48 = vld [vmem:[#allocation16 + $0x1a] ss:$0 sm:$0xff] }
0x1abd   :  { %7851 = vmatprep.subr.bf16.mxu0 %v9099_v52 }
0x1abe   :  { %7852 = vmatpush1.bf16.msra.mxu0 %v9098_v5 }
0x1abf   :  { %7853 = vmatprep.subr.bf16.mxu0 %v9075_v62 }
0x1b40   :  { %v6404_v63 = vpop.xlane.xlu0 %6403 }
0x1b41   :  { %v6405_v51 = vmul.f32 0.0078125, %v6404_v63  ;;  %v6651_v63 = vld [vmem:[#allocation14 + $0x2a8] sm:$0xff] }
0x1b42   :  { %v6408_v2 = vpop.xlane.xlu1 %6407 }
0x1b43   :  { %v6410_v14 = vmul.f32 %v6405_v51, %v6405_v51  ;;  %v6409_v3 = vmul.f32 0.0078125, %v6408_v2  ;;  %v6413_v10 = vsub.f32 %v6396_v46, %v6405_v51  ;;  %v9125_v46 = vcombine.high %v6687_v39, %v6699_v43 }
0x1b44   :  { %v9074_v51 = vcombine.low %v6638_v59, %v6650_v60  ;;  %v9076_v2 = vcombine.low %v6639_v61, %v6651_v63  ;;  %v6713_v59 = vld [vmem:[#allocation14 + $0x498] sm:$0xff] }
0x1b45   :  { %v6411_v4 = vsub.f32 %v6409_v3, %v6410_v14  ;;  %v9077_v14 = vcombine.high %v6639_v61, %v6651_v63  ;;  %v6614_v3 = vld [vmem:[#allocation14 + $0x180] sm:$0xff]  ;;  %v6725_v60 = vld [vmem:[#allocation14 + $0x4f8] sm:$0xff] }
0x1b46   :  { %7854 = vmatpush1.bf16.msra.mxu0 %v9074_v51  ;;  %v9153_v51 = vcombine.high %v6713_v59, %v6725_v60 }
0x1b47   :  { %v6412_v8 = vmax.f32 %v6411_v4, 0.0  ;;  %v6626_v4 = vld [vmem:[#allocation14 + $0x1e0] sm:$0xff] }
0x1b49   :  { %v6414_v9 = vadd.f32 1e-05, %v6412_v8  ;;  %v6615_v8 = vld [vmem:[#allocation14 + $0x188] sm:$0xff] }
0x1b4b   :  { %10565 = vrsqrt.f32 %v6414_v9  ;;  %v9051_v9 = vcombine.high %v6614_v3, %v6626_v4 }
0x1b4d   :  { %7855 = vmatprep.subr.bf16.mxu0 %v9051_v9 }
0x1b58   :  { %v10566_v11 = vpop.eup %10565 }
0x1b59   :  { %v6416_v12 = vmul.f32 %v10566_v11, %v6413_v10  ;;  %v6627_v10 = vld [vmem:[#allocation14 + $0x1e8] sm:$0xff]  ;;  %v9050_v11 = vcombine.low %v6614_v3, %v6626_v4  ;;  %v6701_v3 = vld [vmem:[#allocation14 + $0x438] sm:$0xff] }
0x1b5b   :  { %v6421_v13 = vmul.f32 %v8989_v42, %v6416_v12  ;;  %v9052_v42 = vcombine.low %v6615_v8, %v6627_v10  ;;  %v9053_v12 = vcombine.high %v6615_v8, %v6627_v10  ;;  %7856 = vmatpush1.bf16.msra.mxu0 %v9050_v11  ;;  %v9152_v8 = vcombine.low %v6713_v59, %v6725_v60  ;;  %v6664_v10 = vld [vmem:[#allocation14 + $0x310] sm:$0xff] }
0x1b5c   :  { %v6676_v11 = vld [vmem:[#allocation14 + $0x370] sm:$0xff] }
0x1b5d   :  { %v6426_v30 = vadd.f32 %v8990_v33, %v6421_v13  ;;  %v6590_v33 = vld [vmem:[#allocation14 + $0xc0] sm:$0xff] }
0x1b5e   :  { %v6602_v13 = vld [vmem:[#allocation14 + $0x120] sm:$0xff] }
0x1b5f   :  { %v6444_v15 = vpack.c.bf16 %v6426_v30, %v6426_v30  ;;  %v6591_v30 = vld [vmem:[#allocation14 + $0xc8] sm:$0xff] }
0x1b61   :  { %9767 = vmatmul.mubr.bf16.vlgmr.msra.gmra.mxu1 %v6444_v15  ;;  %v9027_v15 = vcombine.high %v6590_v33, %v6602_v13 }
0x1b62   :  { %7918 = vmatprep.mubr.bf16.mxu1 %v10821_v0  ;;  %7887 = vmatpush1.bf16.msra.mxu1 %v9172_v25  ;;  %v6736_v25 = vld [vmem:[#allocation14 + $0x550] sm:$0xff] }
0x1b63   :  { %7888 = vmatprep.subr.bf16.mxu1 %v9149_v35  ;;  %7857 = vmatprep.subr.bf16.mxu0 %v9027_v15  ;;  %v9175_v17 = vcombine.high %v6736_v25, %v6748_v47  ;;  %v9174_v18 = vcombine.low %v6736_v25, %v6748_v47 }
0x1b66   :  { %7889 = vmatpush1.bf16.msra.mxu1 %v9148_v34 }
0x1b67   :  { %7890 = vmatprep.subr.bf16.mxu1 %v9125_v46 }
0x1b6a   :  { %7891 = vmatpush1.bf16.msra.mxu1 %v9124_v45 }
0x1b6b   :  { %7892 = vmatprep.subr.bf16.mxu1 %v9101_v57  ;;  %v6724_v57 = vld [vmem:[#allocation14 + $0x4f0] sm:$0xff] }
0x1b6e   :  { %7893 = vmatpush1.bf16.msra.mxu1 %v9100_v55  ;;  %v6712_v55 = vld [vmem:[#allocation14 + $0x490] sm:$0xff] }
0x1b6f   :  { %7894 = vmatprep.subr.bf16.mxu1 %v9077_v14  ;;  %v9151_v63 = vcombine.high %v6712_v55, %v6724_v57  ;;  %v6700_v14 = vld [vmem:[#allocation14 + $0x430] sm:$0xff]  ;;  %v9150_v4 = vcombine.low %v6712_v55, %v6724_v57 }
0x1b72   :  { %7895 = vmatpush1.bf16.msra.mxu1 %v9076_v2  ;;  %v6688_v2 = vld [vmem:[#allocation14 + $0x3d0] sm:$0xff] }
0x1b73   :  { %7896 = vmatprep.subr.bf16.mxu1 %v9053_v12  ;;  %v9127_v9 = vcombine.high %v6688_v2, %v6700_v14  ;;  %v6677_v12 = vld [vmem:[#allocation14 + $0x378] sm:$0xff] }
0x1b76   :  { %7897 = vmatpush1.bf16.msra.mxu1 %v9052_v42  ;;  %v6665_v42 = vld [vmem:[#allocation14 + $0x318] sm:$0xff] }
0x1b77   :  { %v9105_v15 = vcombine.high %v6665_v42, %v6677_v12 }
0x1c21   :  { %v6532_v16 = vpop.f32.mrf.mxu1 }
0x1c22   :  { %v11233_v19 = vadd.f32 %v8991_v1, %v6532_v16  ;;  %v6603_v1 = vld [vmem:[#allocation14 + $0x128] sm:$0xff]  ;;  %v9026_v16 = vcombine.low %v6590_v33, %v6602_v13  ;;  %v9126_v33 = vcombine.low %v6688_v2, %v6700_v14 }
0x1c23   :  { %v9768_v56 = vpop.f32.mrf.mxu1  ;;  %v6727_v2 = vld [vmem:[#allocation14 + $0x508] sm:$0xff] }
0x1c24   :  { %6540 = vadd.xlane.f32.xlu0 %v11233_v19  ;;  %v6543_v58 = vmul.f32 %v11233_v19, %v11233_v19  ;;  %v9028_v56 = vcombine.low %v6591_v30, %v6603_v1  ;;  %7858 = vmatpush1.bf16.msra.mxu0 %v9026_v16  ;;  %v6652_v16 = vld [vmem:[#allocation14 + $0x2b0] sm:$0xff] }
0x1c25   :  { %v6535_v20 = vpop.f32.mrf.mxu1 }
0x1c26   :  { %6544 = vadd.xlane.f32.xlu1 %v6543_v58  ;;  %v9029_v58 = vcombine.high %v6591_v30, %v6603_v1  ;;  %v6566_v20 = vld [vmem:[#allocation14] sm:$0xff]  ;;  %v9103_v30 = vcombine.high %v6664_v10, %v6676_v11  ;;  %v6640_v1 = vld [vmem:[#allocation14 + $0x250] sm:$0xff] }
0x1c27   :  { %v9769_v21 = vpop.f32.mrf.mxu1  ;;  %v9079_v22 = vcombine.high %v6640_v1, %v6652_v16  ;;  %v9078_v25 = vcombine.low %v6640_v1, %v6652_v16  ;;  %v6679_v1 = vld [vmem:[#allocation14 + $0x388] sm:$0xff] }
0x1c28   :  { %7898 = vmatprep.subr.bf16.mxu1 %v9029_v58  ;;  %v6578_v21 = vld [vmem:[#allocation14 + $0x60] sm:$0xff]  ;;  %v6653_v58 = vld [vmem:[#allocation14 + $0x2b8] sm:$0xff] }
0x1c29   :  { %7899 = vmatpush1.bf16.msra.mxu1 %v9028_v56  ;;  %v9003_v23 = vcombine.high %v6566_v20, %v6578_v21  ;;  %v9002_v6 = vcombine.low %v6566_v20, %v6578_v21  ;;  %v6641_v56 = vld [vmem:[#allocation14 + $0x258] sm:$0xff]  ;;  %v9102_v20 = vcombine.low %v6664_v10, %v6676_v11  ;;  %v9104_v21 = vcombine.low %v6665_v42, %v6677_v12  ;;  %v6703_v10 = vld [vmem:[#allocation14 + $0x448] sm:$0xff] }
0x1c2a   :  { %7900 = vmatprep.subr.bf16.mxu1 %v9005_v31  ;;  %v6629_v31 = vld [vmem:[#allocation14 + $0x1f8] sm:$0xff]  ;;  %v9080_v47 = vcombine.low %v6641_v56, %v6653_v58 }
0x1c2b   :  { %7859 = vmatprep.subr.bf16.mxu0 %v9003_v23  ;;  %v9081_v23 = vcombine.high %v6641_v56, %v6653_v58 }
0x1c2c   :  { %7860 = vmatpush1.bf16.msra.mxu0 %v9002_v6  ;;  %v6628_v6 = vld [vmem:[#allocation14 + $0x1f0] sm:$0xff] }
0x1c2d   :  { %7901 = vmatpush1.bf16.msra.mxu1 %v9004_v7  ;;  %7927 = vmatprep.subr.bf16.mxu0 %v9175_v17  ;;  %v6617_v7 = vld [vmem:[#allocation14 + $0x198] sm:$0xff]  ;;  %v9055_v27 = vcombine.high %v6616_v24, %v6628_v6 }
0x1c2e   :  { %7968 = vmatprep.subr.bf16.mxu1 %v9177_v32  ;;  %v9057_v17 = vcombine.high %v6617_v7, %v6629_v31  ;;  %v6605_v32 = vld [vmem:[#allocation14 + $0x138] sm:$0xff] }
0x1cad   :  { %v6541_v34 = vpop.xlane.xlu0 %6540 }
0x1cae   :  { %v6542_v35 = vmul.f32 0.0078125, %v6541_v34  ;;  %v9054_v34 = vcombine.low %v6616_v24, %v6628_v6  ;;  %v6655_v24 = vld [vmem:[#allocation14 + $0x2c8] sm:$0xff] }
0x1caf   :  { %v6545_v36 = vpop.xlane.xlu1 %6544 }
0x1cb0   :  { %v6547_v26 = vmul.f32 %v6542_v35, %v6542_v35  ;;  %v6546_v39 = vmul.f32 0.0078125, %v6545_v36  ;;  %v6550_v45 = vsub.f32 %v11233_v19, %v6542_v35  ;;  %v6689_v19 = vld [vmem:[#allocation14 + $0x3d8] sm:$0xff]  ;;  %v9056_v35 = vcombine.low %v6617_v7, %v6629_v31 }
0x1cb1   :  { %v9128_v13 = vcombine.low %v6689_v19, %v6701_v3 }
0x1cb2   :  { %v6548_v54 = vsub.f32 %v6546_v39, %v6547_v26  ;;  %v6568_v39 = vld [vmem:[#allocation14 + $0x10] sm:$0xff] }
0x1cb4   :  { %v6549_v43 = vmax.f32 %v6548_v54, 0.0  ;;  %v6580_v54 = vld [vmem:[#allocation14 + $0x70] sm:$0xff] }
0x1cb5   :  { %v9006_v55 = vcombine.low %v6568_v39, %v6580_v54 }
0x1cb6   :  { %v6551_v44 = vadd.f32 1e-05, %v6549_v43  ;;  %v6569_v43 = vld [vmem:[#allocation14 + $0x18] sm:$0xff] }
0x1cb8   :  { %10567 = vrsqrt.f32 %v6551_v44  ;;  %v6581_v44 = vld [vmem:[#allocation14 + $0x78] sm:$0xff] }
0x1cb9   :  { %v9008_v57 = vcombine.low %v6569_v43, %v6581_v44 }
0x1cc5   :  { %v10568_v46 = vpop.eup %10567 }
0x1cc6   :  { %v6553_v49 = vmul.f32 %v10568_v46, %v6550_v45 }
0x1cc8   :  { %v6558_v52 = vmul.f32 %v9000_v48, %v6553_v49  ;;  %v9007_v48 = vcombine.high %v6568_v39, %v6580_v54  ;;  %v9009_v49 = vcombine.high %v6569_v43, %v6581_v44  ;;  %v6607_v39 = vld [vmem:[#allocation14 + $0x148] sm:$0xff] }
0x1cca   :  { %v6563_v53 = vadd.f32 %v9001_v50, %v6558_v52  ;;  %v6738_v50 = vld [vmem:[#allocation14 + $0x560] sm:$0xff] }
0x1ccb   :  { %v6750_v52 = vld [vmem:[#allocation14 + $0x5c0] sm:$0xff] }
0x1ccc   :  { %v6564_v5 = vmax.f32 %v6563_v53, 0.0  ;;  %v6739_v53 = vld [vmem:[#allocation14 + $0x568] sm:$0xff]  ;;  %v9179_v59 = vcombine.high %v6738_v50, %v6750_v52  ;;  %v9178_v14 = vcombine.low %v6738_v50, %v6750_v52 }
0x1ccd   :  { %v6583_v50 = vld [vmem:[#allocation14 + $0x88] sm:$0xff] }
0x1cce   :  { %v6565_v61 = vadd.f32 %v6564_v5, %v11220_v41  ;;  %v9129_v41 = vcombine.high %v6689_v19, %v6701_v3  ;;  %v6751_v5 = vld [vmem:[#allocation14 + $0x5c8] sm:$0xff] }
0x1ccf   :  { %v9181_v60 = vcombine.high %v6739_v53, %v6751_v5  ;;  %v9180_v19 = vcombine.low %v6739_v53, %v6751_v5 }
0x1cd0   :  { %v11240_v62 = vpack.c.bf16 %v6565_v61, %v6565_v61  ;;  %v6714_v61 = vld [vmem:[#allocation14 + $0x4a0] sm:$0xff] }
0x1cd2   :  { %7878 = vmatmul.mubr.bf16.vlgmr.msra.gmra.mxu0 %v11240_v62  ;;  %7919 = vmatmul.mubr.bf16.vlgmr.msra.gmra.mxu1 %v11240_v62 }
0x1cd3   :  { %7928 = vmatpush1.bf16.msra.mxu0 %v9174_v18  ;;  %7969 = vmatpush1.bf16.msra.mxu1 %v9176_v29  ;;  %v6604_v18 = vld [vmem:[#allocation14 + $0x130] sm:$0xff]  ;;  %v6593_v29 = vld [vmem:[#allocation14 + $0xd8] sm:$0xff] }
0x1cd4   :  { %7929 = vmatprep.subr.bf16.mxu0 %v9151_v63  ;;  %7970 = vmatprep.subr.bf16.mxu1 %v9153_v51  ;;  %v9031_v36 = vcombine.high %v6592_v28, %v6604_v18  ;;  %v9033_v26 = vcombine.high %v6593_v29, %v6605_v32  ;;  %v9030_v45 = vcombine.low %v6592_v28, %v6604_v18  ;;  %v6726_v63 = vld [vmem:[#allocation14 + $0x500] sm:$0xff]  ;;  %v6715_v51 = vld [vmem:[#allocation14 + $0x4a8] sm:$0xff] }
0x1cd5   :  { %7959 = vmatprep.mubr.bf16.mxu0 %v10821_v0  ;;  %8000 = vmatprep.mubr.bf16.mxu1 %v10821_v0  ;;  %v9032_v46 = vcombine.low %v6593_v29, %v6605_v32  ;;  %v9155_v3 = vcombine.high %v6714_v61, %v6726_v63  ;;  %v9154_v11 = vcombine.low %v6714_v61, %v6726_v63  ;;  %v6631_v28 = vld [vmem:[#allocation14 + $0x208] sm:$0xff]  ;;  %v6753_v61 = vld [vmem:[#allocation14 + $0x5d8] sm:$0xff] }
0x1cd6   :  { %v9156_v42 = vcombine.low %v6715_v51, %v6727_v2 }
0x1cd7   :  { %7930 = vmatpush1.bf16.msra.mxu0 %v9150_v4  ;;  %7971 = vmatpush1.bf16.msra.mxu1 %v9152_v8  ;;  %v9157_v4 = vcombine.high %v6715_v51, %v6727_v2  ;;  %v6690_v8 = vld [vmem:[#allocation14 + $0x3e0] sm:$0xff] }
0x1cd8   :  { %7931 = vmatprep.subr.bf16.mxu0 %v9127_v9  ;;  %7972 = vmatprep.subr.bf16.mxu1 %v9129_v41  ;;  %v6702_v9 = vld [vmem:[#allocation14 + $0x440] sm:$0xff]  ;;  %v6691_v41 = vld [vmem:[#allocation14 + $0x3e8] sm:$0xff] }
0x1cd9   :  { %v9131_v12 = vcombine.high %v6690_v8, %v6702_v9  ;;  %v9130_v16 = vcombine.low %v6690_v8, %v6702_v9  ;;  %v9132_v56 = vcombine.low %v6691_v41, %v6703_v10  ;;  %v6729_v8 = vld [vmem:[#allocation14 + $0x518] sm:$0xff] }
0x1cdb   :  { %7932 = vmatpush1.bf16.msra.mxu0 %v9126_v33  ;;  %7973 = vmatpush1.bf16.msra.mxu1 %v9128_v13  ;;  %v9133_v33 = vcombine.high %v6691_v41, %v6703_v10  ;;  %v6666_v13 = vld [vmem:[#allocation14 + $0x320] sm:$0xff] }
0x1cdc   :  { %7933 = vmatprep.subr.bf16.mxu0 %v9103_v30  ;;  %7974 = vmatprep.subr.bf16.mxu1 %v9105_v15  ;;  %v6678_v30 = vld [vmem:[#allocation14 + $0x380] sm:$0xff]  ;;  %v6667_v15 = vld [vmem:[#allocation14 + $0x328] sm:$0xff] }
0x1cdd   :  { %v9107_v58 = vcombine.high %v6666_v13, %v6678_v30  ;;  %v9106_v6 = vcombine.low %v6666_v13, %v6678_v30  ;;  %v9108_v7 = vcombine.low %v6667_v15, %v6679_v1  ;;  %v6705_v13 = vld [vmem:[#allocation14 + $0x458] sm:$0xff] }
0x1cdf   :  { %7934 = vmatpush1.bf16.msra.mxu0 %v9102_v20  ;;  %7975 = vmatpush1.bf16.msra.mxu1 %v9104_v21  ;;  %v9109_v20 = vcombine.high %v6667_v15, %v6679_v1  ;;  %v6642_v21 = vld [vmem:[#allocation14 + $0x260] sm:$0xff] }
0x1ce0   :  { %7935 = vmatprep.subr.bf16.mxu0 %v9079_v22  ;;  %7976 = vmatprep.subr.bf16.mxu1 %v9081_v23  ;;  %v6654_v22 = vld [vmem:[#allocation14 + $0x2c0] sm:$0xff]  ;;  %v6643_v23 = vld [vmem:[#allocation14 + $0x268] sm:$0xff] }
0x1ce1   :  { %v9083_v31 = vcombine.high %v6642_v21, %v6654_v22  ;;  %v9082_v18 = vcombine.low %v6642_v21, %v6654_v22  ;;  %v9084_v29 = vcombine.low %v6643_v23, %v6655_v24  ;;  %v6681_v21 = vld [vmem:[#allocation14 + $0x398] sm:$0xff] }
0x1ce3   :  { %7936 = vmatpush1.bf16.msra.mxu0 %v9078_v25  ;;  %7977 = vmatpush1.bf16.msra.mxu1 %v9080_v47  ;;  %v9085_v25 = vcombine.high %v6643_v23, %v6655_v24  ;;  %v6618_v47 = vld [vmem:[#allocation14 + $0x1a0] sm:$0xff] }
0x1ce4   :  { %7937 = vmatprep.subr.bf16.mxu0 %v9055_v27  ;;  %7978 = vmatprep.subr.bf16.mxu1 %v9057_v17  ;;  %v6630_v27 = vld [vmem:[#allocation14 + $0x200] sm:$0xff]  ;;  %v6619_v17 = vld [vmem:[#allocation14 + $0x1a8] sm:$0xff] }
0x1ce5   :  { %v9059_v32 = vcombine.high %v6618_v47, %v6630_v27  ;;  %v9058_v54 = vcombine.low %v6618_v47, %v6630_v27  ;;  %v9060_v43 = vcombine.low %v6619_v17, %v6631_v28  ;;  %v6657_v47 = vld [vmem:[#allocation14 + $0x2d8] sm:$0xff] }
0x1ce7   :  { %7938 = vmatpush1.bf16.msra.mxu0 %v9054_v34  ;;  %7979 = vmatpush1.bf16.msra.mxu1 %v9056_v35  ;;  %v9061_v34 = vcombine.high %v6619_v17, %v6631_v28  ;;  %v6594_v35 = vld [vmem:[#allocation14 + $0xe0] sm:$0xff] }
0x1ce8   :  { %7939 = vmatprep.subr.bf16.mxu0 %v9031_v36  ;;  %7980 = vmatprep.subr.bf16.mxu1 %v9033_v26  ;;  %v6606_v36 = vld [vmem:[#allocation14 + $0x140] sm:$0xff]  ;;  %v6595_v26 = vld [vmem:[#allocation14 + $0xe8] sm:$0xff] }
0x1ce9   :  { %v9035_v44 = vcombine.high %v6594_v35, %v6606_v36  ;;  %v9034_v52 = vcombine.low %v6594_v35, %v6606_v36  ;;  %v9036_v53 = vcombine.low %v6595_v26, %v6607_v39  ;;  %v6633_v35 = vld [vmem:[#allocation14 + $0x218] sm:$0xff] }
0x1ceb   :  { %7940 = vmatpush1.bf16.msra.mxu0 %v9030_v45  ;;  %7981 = vmatpush1.bf16.msra.mxu1 %v9032_v46  ;;  %v9037_v45 = vcombine.high %v6595_v26, %v6607_v39  ;;  %v6570_v46 = vld [vmem:[#allocation14 + $0x20] sm:$0xff] }
0x1cec   :  { %7941 = vmatprep.subr.bf16.mxu0 %v9007_v48  ;;  %7982 = vmatprep.subr.bf16.mxu1 %v9009_v49  ;;  %v6582_v48 = vld [vmem:[#allocation14 + $0x80] sm:$0xff]  ;;  %v6571_v49 = vld [vmem:[#allocation14 + $0x28] sm:$0xff] }
0x1ced   :  { %v9011_v5 = vcombine.high %v6570_v46, %v6582_v48  ;;  %v9010_v63 = vcombine.low %v6570_v46, %v6582_v48  ;;  %v9012_v51 = vcombine.low %v6571_v49, %v6583_v50  ;;  %v6609_v46 = vld [vmem:[#allocation14 + $0x158] sm:$0xff] }
0x1cef   :  { %7942 = vmatpush1.bf16.msra.mxu0 %v9006_v55  ;;  %7983 = vmatpush1.bf16.msra.mxu1 %v9008_v57  ;;  %v9013_v55 = vcombine.high %v6571_v49, %v6583_v50  ;;  %v6740_v57 = vld [vmem:[#allocation14 + $0x570] sm:$0xff] }
0x1cf0   :  { %8009 = vmatprep.subr.bf16.mxu0 %v9179_v59  ;;  %8050 = vmatprep.subr.bf16.mxu1 %v9181_v60  ;;  %v6752_v59 = vld [vmem:[#allocation14 + $0x5d0] sm:$0xff]  ;;  %v6741_v60 = vld [vmem:[#allocation14 + $0x578] sm:$0xff] }
0x1cf1   :  { %v9183_v2 = vcombine.high %v6740_v57, %v6752_v59  ;;  %v9182_v9 = vcombine.low %v6740_v57, %v6752_v59  ;;  %v9184_v41 = vcombine.low %v6741_v60, %v6753_v61  ;;  %v6585_v57 = vld [vmem:[#allocation14 + $0x98] sm:$0xff] }
0x1cf2   :  { %7960 = vmatmul.mubr.bf16.vlgmr.msra.gmra.mxu0 %v11240_v62  ;;  %8001 = vmatmul.mubr.bf16.vlgmr.msra.gmra.mxu1 %v11240_v62 }
0x1cf3   :  { %8010 = vmatpush1.bf16.msra.mxu0 %v9178_v14  ;;  %8051 = vmatpush1.bf16.msra.mxu1 %v9180_v19  ;;  %v9185_v14 = vcombine.high %v6741_v60, %v6753_v61  ;;  %v6716_v19 = vld [vmem:[#allocation14 + $0x4b0] sm:$0xff] }
0x1cf4   :  { %8011 = vmatprep.subr.bf16.mxu0 %v9155_v3  ;;  %8052 = vmatprep.subr.bf16.mxu1 %v9157_v4  ;;  %v6728_v3 = vld [vmem:[#allocation14 + $0x510] sm:$0xff]  ;;  %v6717_v4 = vld [vmem:[#allocation14 + $0x4b8] sm:$0xff] }
0x1cf5   :  { %8041 = vmatprep.mubr.bf16.mxu0 %v10821_v0  ;;  %8082 = vmatprep.mubr.bf16.mxu1 %v10821_v0  ;;  %v9159_v10 = vcombine.high %v6716_v19, %v6728_v3  ;;  %v9158_v30 = vcombine.low %v6716_v19, %v6728_v3  ;;  %v9160_v15 = vcombine.low %v6717_v4, %v6729_v8  ;;  %v6755_v19 = vld [vmem:[#allocation14 + $0x5e8] sm:$0xff] }
0x1cf7   :  { %8012 = vmatpush1.bf16.msra.mxu0 %v9154_v11  ;;  %8053 = vmatpush1.bf16.msra.mxu1 %v9156_v42  ;;  %v9161_v11 = vcombine.high %v6717_v4, %v6729_v8  ;;  %v6692_v42 = vld [vmem:[#allocation14 + $0x3f0] sm:$0xff] }
0x1cf8   :  { %8013 = vmatprep.subr.bf16.mxu0 %v9131_v12  ;;  %8054 = vmatprep.subr.bf16.mxu1 %v9133_v33  ;;  %v6704_v12 = vld [vmem:[#allocation14 + $0x450] sm:$0xff]  ;;  %v6693_v33 = vld [vmem:[#allocation14 + $0x3f8] sm:$0xff] }
0x1cf9   :  { %v9135_v1 = vcombine.high %v6692_v42, %v6704_v12  ;;  %v9134_v22 = vcombine.low %v6692_v42, %v6704_v12  ;;  %v9136_v23 = vcombine.low %v6693_v33, %v6705_v13  ;;  %v6731_v42 = vld [vmem:[#allocation14 + $0x528] sm:$0xff] }
0x1cfb   :  { %8014 = vmatpush1.bf16.msra.mxu0 %v9130_v16  ;;  %8055 = vmatpush1.bf16.msra.mxu1 %v9132_v56  ;;  %v9137_v16 = vcombine.high %v6693_v33, %v6705_v13  ;;  %v6668_v56 = vld [vmem:[#allocation14 + $0x330] sm:$0xff] }
0x1cfc   :  { %8015 = vmatprep.subr.bf16.mxu0 %v9107_v58  ;;  %8056 = vmatprep.subr.bf16.mxu1 %v9109_v20  ;;  %v6680_v58 = vld [vmem:[#allocation14 + $0x390] sm:$0xff]  ;;  %v6669_v20 = vld [vmem:[#allocation14 + $0x338] sm:$0xff] }
0x1cfd   :  { %v9111_v24 = vcombine.high %v6668_v56, %v6680_v58  ;;  %v9110_v27 = vcombine.low %v6668_v56, %v6680_v58  ;;  %v9112_v17 = vcombine.low %v6669_v20, %v6681_v21  ;;  %v6707_v56 = vld [vmem:[#allocation14 + $0x468] sm:$0xff] }
0x1cff   :  { %8016 = vmatpush1.bf16.msra.mxu0 %v9106_v6  ;;  %8057 = vmatpush1.bf16.msra.mxu1 %v9108_v7  ;;  %v9113_v6 = vcombine.high %v6669_v20, %v6681_v21  ;;  %v6644_v7 = vld [vmem:[#allocation14 + $0x270] sm:$0xff] }
0x1d00   :  { %8017 = vmatprep.subr.bf16.mxu0 %v9083_v31  ;;  %8058 = vmatprep.subr.bf16.mxu1 %v9085_v25  ;;  %v6656_v31 = vld [vmem:[#allocation14 + $0x2d0] sm:$0xff]  ;;  %v6645_v25 = vld [vmem:[#allocation14 + $0x278] sm:$0xff] }
0x1d01   :  { %v9087_v28 = vcombine.high %v6644_v7, %v6656_v31  ;;  %v9086_v36 = vcombine.low %v6644_v7, %v6656_v31  ;;  %v9088_v26 = vcombine.low %v6645_v25, %v6657_v47  ;;  %v6683_v7 = vld [vmem:[#allocation14 + $0x3a8] sm:$0xff] }
0x1d03   :  { %8018 = vmatpush1.bf16.msra.mxu0 %v9082_v18  ;;  %8059 = vmatpush1.bf16.msra.mxu1 %v9084_v29  ;;  %v9089_v18 = vcombine.high %v6645_v25, %v6657_v47  ;;  %v6620_v29 = vld [vmem:[#allocation14 + $0x1b0] sm:$0xff] }
0x1d04   :  { %8019 = vmatprep.subr.bf16.mxu0 %v9059_v32  ;;  %8060 = vmatprep.subr.bf16.mxu1 %v9061_v34  ;;  %v6632_v32 = vld [vmem:[#allocation14 + $0x210] sm:$0xff]  ;;  %v6621_v34 = vld [vmem:[#allocation14 + $0x1b8] sm:$0xff] }
0x1d05   :  { %v9063_v39 = vcombine.high %v6620_v29, %v6632_v32  ;;  %v9062_v48 = vcombine.low %v6620_v29, %v6632_v32  ;;  %v9064_v49 = vcombine.low %v6621_v34, %v6633_v35  ;;  %v6659_v29 = vld [vmem:[#allocation14 + $0x2e8] sm:$0xff] }
0x1d07   :  { %8020 = vmatpush1.bf16.msra.mxu0 %v9058_v54  ;;  %8061 = vmatpush1.bf16.msra.mxu1 %v9060_v43  ;;  %v9065_v54 = vcombine.high %v6621_v34, %v6633_v35  ;;  %v6596_v43 = vld [vmem:[#allocation14 + $0xf0] sm:$0xff] }
0x1d08   :  { %8021 = vmatprep.subr.bf16.mxu0 %v9035_v44  ;;  %8062 = vmatprep.subr.bf16.mxu1 %v9037_v45  ;;  %v6608_v44 = vld [vmem:[#allocation14 + $0x150] sm:$0xff]  ;;  %v6597_v45 = vld [vmem:[#allocation14 + $0xf8] sm:$0xff] }
0x1d09   :  { %v9039_v50 = vcombine.high %v6596_v43, %v6608_v44  ;;  %v9038_v59 = vcombine.low %v6596_v43, %v6608_v44  ;;  %v9040_v60 = vcombine.low %v6597_v45, %v6609_v46  ;;  %v6635_v43 = vld [vmem:[#allocation14 + $0x228] sm:$0xff] }
0x1d0b   :  { %8022 = vmatpush1.bf16.msra.mxu0 %v9034_v52  ;;  %8063 = vmatpush1.bf16.msra.mxu1 %v9036_v53  ;;  %v9041_v52 = vcombine.high %v6597_v45, %v6609_v46  ;;  %v6572_v53 = vld [vmem:[#allocation14 + $0x30] sm:$0xff] }
0x1d0c   :  { %8023 = vmatprep.subr.bf16.mxu0 %v9011_v5  ;;  %8064 = vmatprep.subr.bf16.mxu1 %v9013_v55  ;;  %v6584_v5 = vld [vmem:[#allocation14 + $0x90] sm:$0xff]  ;;  %v6573_v55 = vld [vmem:[#allocation14 + $0x38] sm:$0xff] }
0x1d0d   :  { %v9015_v61 = vcombine.high %v6572_v53, %v6584_v5  ;;  %v9014_v3 = vcombine.low %v6572_v53, %v6584_v5  ;;  %v9016_v4 = vcombine.low %v6573_v55, %v6585_v57  ;;  %v6611_v53 = vld [vmem:[#allocation14 + $0x168] sm:$0xff] }
0x1d0f   :  { %8024 = vmatpush1.bf16.msra.mxu0 %v9010_v63  ;;  %8065 = vmatpush1.bf16.msra.mxu1 %v9012_v51  ;;  %v9017_v63 = vcombine.high %v6573_v55, %v6585_v57  ;;  %v6742_v51 = vld [vmem:[#allocation14 + $0x580] sm:$0xff] }
0x1d10   :  { %8091 = vmatprep.subr.bf16.mxu0 %v9183_v2  ;;  %8132 = vmatprep.subr.bf16.mxu1 %v9185_v14  ;;  %v6754_v2 = vld [vmem:[#allocation14 + $0x5e0] sm:$0xff]  ;;  %v6743_v14 = vld [vmem:[#allocation14 + $0x588] sm:$0xff] }
0x1d11   :  { %v9187_v8 = vcombine.high %v6742_v51, %v6754_v2  ;;  %v9186_v12 = vcombine.low %v6742_v51, %v6754_v2  ;;  %v9188_v33 = vcombine.low %v6743_v14, %v6755_v19  ;;  %v6587_v51 = vld [vmem:[#allocation14 + $0xa8] sm:$0xff] }
0x1d12   :  { %8042 = vmatmul.mubr.bf16.vlgmr.msra.gmra.mxu0 %v11240_v62  ;;  %8083 = vmatmul.mubr.bf16.vlgmr.msra.gmra.mxu1 %v11240_v62 }
0x1d13   :  { %8092 = vmatpush1.bf16.msra.mxu0 %v9182_v9  ;;  %8133 = vmatpush1.bf16.msra.mxu1 %v9184_v41  ;;  %v9189_v9 = vcombine.high %v6743_v14, %v6755_v19  ;;  %v6718_v41 = vld [vmem:[#allocation14 + $0x4c0] sm:$0xff] }
0x1d14   :  { %8093 = vmatprep.subr.bf16.mxu0 %v9159_v10  ;;  %8134 = vmatprep.subr.bf16.mxu1 %v9161_v11  ;;  %v6730_v10 = vld [vmem:[#allocation14 + $0x520] sm:$0xff]  ;;  %v6719_v11 = vld [vmem:[#allocation14 + $0x4c8] sm:$0xff] }
0x1d15   :  { %8123 = vmatprep.mubr.bf16.mxu0 %v10821_v0  ;;  %8164 = vmatprep.mubr.bf16.mxu1 %v10821_v0  ;;  %v9163_v13 = vcombine.high %v6718_v41, %v6730_v10  ;;  %v9162_v58 = vcombine.low %v6718_v41, %v6730_v10  ;;  %v9164_v20 = vcombine.low %v6719_v11, %v6731_v42  ;;  %v6757_v41 = vld [vmem:[#allocation14 + $0x5f8] sm:$0xff] }
0x1d17   :  { %8094 = vmatpush1.bf16.msra.mxu0 %v9158_v30  ;;  %8135 = vmatpush1.bf16.msra.mxu1 %v9160_v15  ;;  %v9165_v30 = vcombine.high %v6719_v11, %v6731_v42  ;;  %v6694_v15 = vld [vmem:[#allocation14 + $0x400] sm:$0xff] }
0x1d18   :  { %8095 = vmatprep.subr.bf16.mxu0 %v9135_v1  ;;  %8136 = vmatprep.subr.bf16.mxu1 %v9137_v16  ;;  %v6706_v1 = vld [vmem:[#allocation14 + $0x460] sm:$0xff]  ;;  %v6695_v16 = vld [vmem:[#allocation14 + $0x408] sm:$0xff] }
0x1d19   :  { %v9139_v21 = vcombine.high %v6694_v15, %v6706_v1  ;;  %v9138_v31 = vcombine.low %v6694_v15, %v6706_v1  ;;  %v9140_v25 = vcombine.low %v6695_v16, %v6707_v56  ;;  %v6733_v15 = vld [vmem:[#allocation14 + $0x538] sm:$0xff] }
0x1d1b   :  { %8096 = vmatpush1.bf16.msra.mxu0 %v9134_v22  ;;  %8137 = vmatpush1.bf16.msra.mxu1 %v9136_v23  ;;  %v9141_v22 = vcombine.high %v6695_v16, %v6707_v56  ;;  %v6670_v23 = vld [vmem:[#allocation14 + $0x340] sm:$0xff] }
0x1d1c   :  { %8097 = vmatprep.subr.bf16.mxu0 %v9111_v24  ;;  %8138 = vmatprep.subr.bf16.mxu1 %v9113_v6  ;;  %v6682_v24 = vld [vmem:[#allocation14 + $0x3a0] sm:$0xff]  ;;  %v6671_v6 = vld [vmem:[#allocation14 + $0x348] sm:$0xff] }
0x1d1d   :  { %v9115_v47 = vcombine.high %v6670_v23, %v6682_v24  ;;  %v9114_v32 = vcombine.low %v6670_v23, %v6682_v24  ;;  %v9116_v34 = vcombine.low %v6671_v6, %v6683_v7  ;;  %v6709_v23 = vld [vmem:[#allocation14 + $0x478] sm:$0xff] }
0x1d1f   :  { %8098 = vmatpush1.bf16.msra.mxu0 %v9110_v27  ;;  %8139 = vmatpush1.bf16.msra.mxu1 %v9112_v17  ;;  %v9117_v27 = vcombine.high %v6671_v6, %v6683_v7  ;;  %v6646_v17 = vld [vmem:[#allocation14 + $0x280] sm:$0xff] }
0x1d20   :  { %8099 = vmatprep.subr.bf16.mxu0 %v9087_v28  ;;  %8140 = vmatprep.subr.bf16.mxu1 %v9089_v18  ;;  %v6658_v28 = vld [vmem:[#allocation14 + $0x2e0] sm:$0xff]  ;;  %v6647_v18 = vld [vmem:[#allocation14 + $0x288] sm:$0xff] }
0x1d21   :  { %v9091_v35 = vcombine.high %v6646_v17, %v6658_v28  ;;  %v9090_v44 = vcombine.low %v6646_v17, %v6658_v28  ;;  %v9092_v45 = vcombine.low %v6647_v18, %v6659_v29  ;;  %v6685_v17 = vld [vmem:[#allocation14 + $0x3b8] sm:$0xff] }
0x1d23   :  { %8100 = vmatpush1.bf16.msra.mxu0 %v9086_v36  ;;  %8141 = vmatpush1.bf16.msra.mxu1 %v9088_v26  ;;  %v9093_v36 = vcombine.high %v6647_v18, %v6659_v29  ;;  %v6622_v26 = vld [vmem:[#allocation14 + $0x1c0] sm:$0xff] }
0x1d24   :  { %8101 = vmatprep.subr.bf16.mxu0 %v9063_v39  ;;  %8142 = vmatprep.subr.bf16.mxu1 %v9065_v54  ;;  %v6634_v39 = vld [vmem:[#allocation14 + $0x220] sm:$0xff]  ;;  %v6623_v54 = vld [vmem:[#allocation14 + $0x1c8] sm:$0xff] }
0x1d25   :  { %v9067_v46 = vcombine.high %v6622_v26, %v6634_v39  ;;  %v9066_v5 = vcombine.low %v6622_v26, %v6634_v39  ;;  %v9068_v55 = vcombine.low %v6623_v54, %v6635_v43  ;;  %v6661_v26 = vld [vmem:[#allocation14 + $0x2f8] sm:$0xff] }
0x1d27   :  { %8102 = vmatpush1.bf16.msra.mxu0 %v9062_v48  ;;  %8143 = vmatpush1.bf16.msra.mxu1 %v9064_v49  ;;  %v9069_v48 = vcombine.high %v6623_v54, %v6635_v43  ;;  %v6598_v49 = vld [vmem:[#allocation14 + $0x100] sm:$0xff] }
0x1d28   :  { %8103 = vmatprep.subr.bf16.mxu0 %v9039_v50  ;;  %8144 = vmatprep.subr.bf16.mxu1 %v9041_v52  ;;  %v6610_v50 = vld [vmem:[#allocation14 + $0x160] sm:$0xff]  ;;  %v6599_v52 = vld [vmem:[#allocation14 + $0x108] sm:$0xff] }
0x1d29   :  { %v9043_v57 = vcombine.high %v6598_v49, %v6610_v50  ;;  %v9042_v2 = vcombine.low %v6598_v49, %v6610_v50  ;;  %v9044_v14 = vcombine.low %v6599_v52, %v6611_v53 }
0x1d2b   :  { %8104 = vmatpush1.bf16.msra.mxu0 %v9038_v59  ;;  %8145 = vmatpush1.bf16.msra.mxu1 %v9040_v60  ;;  %v9045_v59 = vcombine.high %v6599_v52, %v6611_v53  ;;  %v6574_v60 = vld [vmem:[#allocation14 + $0x40] sm:$0xff] }
0x1d2c   :  { %8105 = vmatprep.subr.bf16.mxu0 %v9015_v61  ;;  %8146 = vmatprep.subr.bf16.mxu1 %v9017_v63  ;;  %v6586_v61 = vld [vmem:[#allocation14 + $0xa0] sm:$0xff]  ;;  %v6575_v63 = vld [vmem:[#allocation14 + $0x48] sm:$0xff] }
0x1d2d   :  { %v9019_v19 = vcombine.high %v6574_v60, %v6586_v61  ;;  %v9018_v10 = vcombine.low %v6574_v60, %v6586_v61  ;;  %v9020_v11 = vcombine.low %v6575_v63, %v6587_v51 }
0x1d2f   :  { %8106 = vmatpush1.bf16.msra.mxu0 %v9014_v3  ;;  %8147 = vmatpush1.bf16.msra.mxu1 %v9016_v4  ;;  %v9021_v3 = vcombine.high %v6575_v63, %v6587_v51  ;;  %v6744_v4 = vld [vmem:[#allocation14 + $0x590] sm:$0xff] }
0x1d30   :  { %8173 = vmatprep.subr.bf16.mxu0 %v9187_v8  ;;  %8214 = vmatprep.subr.bf16.mxu1 %v9189_v9  ;;  %v6756_v8 = vld [vmem:[#allocation14 + $0x5f0] sm:$0xff]  ;;  %v6745_v9 = vld [vmem:[#allocation14 + $0x598] sm:$0xff] }
0x1d31   :  { %v9191_v42 = vcombine.high %v6744_v4, %v6756_v8  ;;  %v9190_v1 = vcombine.low %v6744_v4, %v6756_v8  ;;  %v9192_v16 = vcombine.low %v6745_v9, %v6757_v41 }
0x1d32   :  { %8124 = vmatmul.mubr.bf16.vlgmr.msra.gmra.mxu0 %v11240_v62  ;;  %8165 = vmatmul.mubr.bf16.vlgmr.msra.gmra.mxu1 %v11240_v62 }
0x1d33   :  { %8174 = vmatpush1.bf16.msra.mxu0 %v9186_v12  ;;  %8215 = vmatpush1.bf16.msra.mxu1 %v9188_v33  ;;  %v9193_v12 = vcombine.high %v6745_v9, %v6757_v41  ;;  %v6720_v33 = vld [vmem:[#allocation14 + $0x4d0] sm:$0xff] }
0x1d34   :  { %8175 = vmatprep.subr.bf16.mxu0 %v9163_v13  ;;  %8216 = vmatprep.subr.bf16.mxu1 %v9165_v30  ;;  %v6732_v13 = vld [vmem:[#allocation14 + $0x530] sm:$0xff]  ;;  %v6721_v30 = vld [vmem:[#allocation14 + $0x4d8] sm:$0xff] }
0x1d35   :  { %8205 = vmatprep.mubr.bf16.mxu0 %v10821_v0  ;;  %8246 = vmatprep.mubr.bf16.mxu1 %v10821_v0  ;;  %v9167_v56 = vcombine.high %v6720_v33, %v6732_v13  ;;  %v9166_v24 = vcombine.low %v6720_v33, %v6732_v13  ;;  %v9168_v6 = vcombine.low %v6721_v30, %v6733_v15  ;;  %v11271_v33 = vsub.s32 3, %v11034_v37 }
0x1d37   :  { %8176 = vmatpush1.bf16.msra.mxu0 %v9162_v58  ;;  %8217 = vmatpush1.bf16.msra.mxu1 %v9164_v20  ;;  %v9169_v58 = vcombine.high %v6721_v30, %v6733_v15  ;;  %v6696_v20 = vld [vmem:[#allocation14 + $0x410] sm:$0xff] }
0x1d38   :  { %8177 = vmatprep.subr.bf16.mxu0 %v9139_v21  ;;  %8218 = vmatprep.subr.bf16.mxu1 %v9141_v22  ;;  %v6708_v21 = vld [vmem:[#allocation14 + $0x470] sm:$0xff]  ;;  %v6697_v22 = vld [vmem:[#allocation14 + $0x418] sm:$0xff] }
0x1d39   :  { %v9143_v7 = vcombine.high %v6696_v20, %v6708_v21  ;;  %v9142_v28 = vcombine.low %v6696_v20, %v6708_v21  ;;  %v9144_v18 = vcombine.low %v6697_v22, %v6709_v23 }
0x1d3b   :  { %8178 = vmatpush1.bf16.msra.mxu0 %v9138_v31  ;;  %8219 = vmatpush1.bf16.msra.mxu1 %v9140_v25  ;;  %v9145_v31 = vcombine.high %v6697_v22, %v6709_v23  ;;  %v6672_v25 = vld [vmem:[#allocation14 + $0x350] sm:$0xff] }
0x1d3c   :  { %8179 = vmatprep.subr.bf16.mxu0 %v9115_v47  ;;  %8220 = vmatprep.subr.bf16.mxu1 %v9117_v27  ;;  %v6684_v47 = vld [vmem:[#allocation14 + $0x3b0] sm:$0xff]  ;;  %v6673_v27 = vld [vmem:[#allocation14 + $0x358] sm:$0xff] }
0x1d3d   :  { %v9119_v29 = vcombine.high %v6672_v25, %v6684_v47  ;;  %v9118_v39 = vcombine.low %v6672_v25, %v6684_v47  ;;  %v9120_v54 = vcombine.low %v6673_v27, %v6685_v17  ;;  %v11278_v25 = vsub.s32 4, %v11034_v37 }
0x1d3e   :  { %v11281_v47 = vsub.s32 6, %v11034_v37 }
0x1d3f   :  { %8180 = vmatpush1.bf16.msra.mxu0 %v9114_v32  ;;  %8221 = vmatpush1.bf16.msra.mxu1 %v9116_v34  ;;  %v9121_v32 = vcombine.high %v6673_v27, %v6685_v17  ;;  %v6648_v34 = vld [vmem:[#allocation14 + $0x290] sm:$0xff]  ;;  %v11284_v27 = vsub.s32 5, %v11034_v37  ;;  %v11287_v17 = vsub.s32 7, %v11034_v37 }
0x1d40   :  { %8181 = vmatprep.subr.bf16.mxu0 %v9091_v35  ;;  %8222 = vmatprep.subr.bf16.mxu1 %v9093_v36  ;;  %v6660_v35 = vld [vmem:[#allocation14 + $0x2f0] sm:$0xff]  ;;  %v6649_v36 = vld [vmem:[#allocation14 + $0x298] sm:$0xff] }
0x1d41   :  { %v9095_v43 = vcombine.high %v6648_v34, %v6660_v35  ;;  %v9094_v49 = vcombine.low %v6648_v34, %v6660_v35  ;;  %v9096_v50 = vcombine.low %v6649_v36, %v6661_v26 }
0x1d43   :  { %8182 = vmatpush1.bf16.msra.mxu0 %v9090_v44  ;;  %8223 = vmatpush1.bf16.msra.mxu1 %v9092_v45  ;;  %v6624_v44 = vld [vmem:[#allocation14 + $0x1d0] sm:$0xff] }
0x1d44   :  { %8183 = vmatprep.subr.bf16.mxu0 %v9067_v46  ;;  %8224 = vmatprep.subr.bf16.mxu1 %v9069_v48  ;;  %v6636_v45 = vld [vmem:[#allocation14 + $0x230] sm:$0xff]  ;;  %v6625_v46 = vld [vmem:[#allocation14 + $0x1d8] sm:$0xff] }
0x1d45   :  { %v6637_v48 = vld [vmem:[#allocation14 + $0x238] sm:$0xff]  ;;  %v9071_v52 = vcombine.high %v6624_v44, %v6636_v45  ;;  %v9070_v60 = vcombine.low %v6624_v44, %v6636_v45 }
0x1d46   :  { %v9073_v53 = vcombine.high %v6625_v46, %v6637_v48  ;;  %v9072_v61 = vcombine.low %v6625_v46, %v6637_v48  ;;  %v6760_v48 = vld [vmem:[%s11329_s11 + $0x8] sm:$0xff] }
0x1d47   :  { %8184 = vmatpush1.bf16.msra.mxu0 %v9066_v5  ;;  %8225 = vmatpush1.bf16.msra.mxu1 %v9068_v55  ;;  %v6600_v5 = vld [vmem:[#allocation14 + $0x110] sm:$0xff] }
0x1d48   :  { %8185 = vmatprep.subr.bf16.mxu0 %v9043_v57  ;;  %8226 = vmatprep.subr.bf16.mxu1 %v9045_v59  ;;  %v6612_v55 = vld [vmem:[#allocation14 + $0x170] sm:$0xff]  ;;  %v6601_v57 = vld [vmem:[#allocation14 + $0x118] sm:$0xff] }
0x1d49   :  { %v6613_v59 = vld [vmem:[#allocation14 + $0x178] sm:$0xff]  ;;  %v9047_v63 = vcombine.high %v6600_v5, %v6612_v55  ;;  %v9046_v4 = vcombine.low %v6600_v5, %v6612_v55 }
0x1d4a   :  { %v9049_v51 = vcombine.high %v6601_v57, %v6613_v59  ;;  %v9048_v8 = vcombine.low %v6601_v57, %v6613_v59 }
0x1d4b   :  { %8186 = vmatpush1.bf16.msra.mxu0 %v9042_v2  ;;  %8227 = vmatpush1.bf16.msra.mxu1 %v9044_v14  ;;  %v6576_v2 = vld [vmem:[#allocation14 + $0x50] sm:$0xff] }
0x1d4c   :  { %8187 = vmatprep.subr.bf16.mxu0 %v9019_v19  ;;  %8228 = vmatprep.subr.bf16.mxu1 %v9021_v3  ;;  %v6588_v14 = vld [vmem:[#allocation14 + $0xb0] sm:$0xff]  ;;  %v6577_v19 = vld [vmem:[#allocation14 + $0x58] sm:$0xff] }
0x1d4d   :  { %v6589_v3 = vld [vmem:[#allocation14 + $0xb8] sm:$0xff]  ;;  %v9023_v9 = vcombine.high %v6576_v2, %v6588_v14 }
0x1d4e   :  { %v9025_v41 = vcombine.high %v6577_v19, %v6589_v3 }
0x1d4f   :  { %8188 = vmatpush1.bf16.msra.mxu0 %v9018_v10  ;;  %8229 = vmatpush1.bf16.msra.mxu1 %v9020_v11  ;;  %v9022_v10 = vcombine.low %v6576_v2, %v6588_v14  ;;  %v9024_v11 = vcombine.low %v6577_v19, %v6589_v3 }
0x1d50   :  { %8255 = vmatprep.subr.bf16.mxu0 %v9191_v42  ;;  %8296 = vmatprep.subr.bf16.mxu1 %v9193_v12  ;;  %v11265_v42 = vsub.s32 2, %v11034_v37  ;;  %v6759_v12 = vld [vmem:[%s11329_s11] sm:$0xff] }
0x1d51   :  { %v6768_v13 = vrot.slane %v6759_v12, %v11037_v38  ;;  %v6772_v15 = vrot.slane %v6759_v12, %v11040_v40 }
0x1d52   :  { %8206 = vmatmul.mubr.bf16.vlgmr.msra.gmra.mxu0 %v11240_v62  ;;  %8247 = vmatmul.mubr.bf16.vlgmr.msra.gmra.mxu1 %v11240_v62  ;;  %v6776_v30 = vrot.slane %v6759_v12, %v11265_v42 }
0x1d53   :  { %8256 = vmatpush1.bf16.msra.mxu0 %v9190_v1  ;;  %8297 = vmatpush1.bf16.msra.mxu1 %v9192_v16  ;;  %v6780_v1 = vrot.slane %v6759_v12, %v11271_v33 }
0x1d54   :  { %8257 = vmatprep.subr.bf16.mxu0 %v9167_v56  ;;  %8298 = vmatprep.subr.bf16.mxu1 %v9169_v58 }
0x1d55   :  { %8287 = vmatprep.mubr.bf16.mxu0 %v10821_v0  ;;  %8328 = vmatprep.mubr.bf16.mxu1 %v10821_v0  ;;  %v9097_v0 = vcombine.high %v6649_v36, %v6661_v26 }
0x1d57   :  { %8258 = vmatpush1.bf16.msra.mxu0 %v9166_v24  ;;  %8299 = vmatpush1.bf16.msra.mxu1 %v9168_v6 }
0x1d58   :  { %8259 = vmatprep.subr.bf16.mxu0 %v9143_v7  ;;  %8300 = vmatprep.subr.bf16.mxu1 %v9145_v31 }
0x1d5b   :  { %8260 = vmatpush1.bf16.msra.mxu0 %v9142_v28  ;;  %8301 = vmatpush1.bf16.msra.mxu1 %v9144_v18  ;;  %v6784_v28 = vrot.slane %v6759_v12, %v11278_v25  ;;  %v6792_v18 = vrot.slane %v6759_v12, %v11281_v47 }
0x1d5c   :  { %8261 = vmatprep.subr.bf16.mxu0 %v9119_v29  ;;  %8302 = vmatprep.subr.bf16.mxu1 %v9121_v32  ;;  %v6788_v29 = vrot.slane %v6759_v12, %v11284_v27  ;;  %v6796_v32 = vrot.slane %v6759_v12, %v11287_v17 }
0x1d5f   :  { %8262 = vmatpush1.bf16.msra.mxu0 %v9118_v39  ;;  %8303 = vmatpush1.bf16.msra.mxu1 %v9120_v54 }
0x1d60   :  { %8263 = vmatprep.subr.bf16.mxu0 %v9095_v43  ;;  %8304 = vmatprep.subr.bf16.mxu1 %v9097_v0 }
0x1d63   :  { %8264 = vmatpush1.bf16.msra.mxu0 %v9094_v49  ;;  %8305 = vmatpush1.bf16.msra.mxu1 %v9096_v50  ;;  %v6800_v49 = vrot.slane %v6760_v48, %v11037_v38  ;;  %v6808_v50 = vrot.slane %v6760_v48, %v11265_v42 }
0x1d64   :  { %8265 = vmatprep.subr.bf16.mxu0 %v9071_v52  ;;  %8306 = vmatprep.subr.bf16.mxu1 %v9073_v53  ;;  %v6804_v52 = vrot.slane %v6760_v48, %v11040_v40  ;;  %v6812_v53 = vrot.slane %v6760_v48, %v11271_v33 }
0x1d67   :  { %8266 = vmatpush1.bf16.msra.mxu0 %v9070_v60  ;;  %8307 = vmatpush1.bf16.msra.mxu1 %v9072_v61 }
0x1d68   :  { %8267 = vmatprep.subr.bf16.mxu0 %v9047_v63  ;;  %8308 = vmatprep.subr.bf16.mxu1 %v9049_v51 }
0x1d6b   :  { %8268 = vmatpush1.bf16.msra.mxu0 %v9046_v4  ;;  %8309 = vmatpush1.bf16.msra.mxu1 %v9048_v8  ;;  %v6816_v4 = vrot.slane %v6760_v48, %v11278_v25  ;;  %v6824_v8 = vrot.slane %v6760_v48, %v11281_v47 }
0x1d6c   :  { %8269 = vmatprep.subr.bf16.mxu0 %v9023_v9  ;;  %8310 = vmatprep.subr.bf16.mxu1 %v9025_v41  ;;  %v6820_v9 = vrot.slane %v6760_v48, %v11284_v27  ;;  %v6828_v41 = vrot.slane %v6760_v48, %v11287_v17 }
0x1d6f   :  { %8270 = vmatpush1.bf16.msra.mxu0 %v9022_v10  ;;  %8311 = vmatpush1.bf16.msra.mxu1 %v9024_v11 }
0x1d72   :  { %8288 = vmatmul.mubr.bf16.vlgmr.msra.gmra.mxu0 %v11240_v62  ;;  %8329 = vmatmul.mubr.bf16.vlgmr.msra.gmra.mxu1 %v11240_v62 }
0x1d92   :  { %v7879_v16 = vpop.f32.mrf.mxu0  ;;  %v7920_v62 = vpop.f32.mrf.mxu1 }
0x1d93   :  { %v7880_v56 = vadd.f32 %v7879_v16, %v6768_v13  ;;  %v7921_v58 = vadd.f32 %v7920_v62, %v6776_v30 }
0x1d94   :  { %v7881_v20 = vpop.f32.mrf.mxu0  ;;  %v7922_v21 = vpop.f32.mrf.mxu1 }
0x1d95   :  { %8337 = vst [vmem:[#allocation19] sm:$0xff] %v7880_v56  ;;  %8339 = vst [vmem:[#allocation19 + $0x10] sm:$0xff] %v7921_v58  ;;  %v7882_v22 = vadd.f32 %v7881_v20, %v6772_v15  ;;  %v7923_v23 = vadd.f32 %v7922_v21, %v6780_v1  ;;  %v6761_v21 = vld [vmem:[%s11329_s11 + $0x10] sm:$0xff]  ;;  %s10824_s11 = smov [#allocation19]  }
0x1d96   :  { %v7883_v24 = vpop.f32.mrf.mxu0  ;;  %v7924_v6 = vpop.f32.mrf.mxu1  ;;  %s8367_s21 = sshll.u32 %s10824_s11, 4  ;;  %s8368_s21 = int_to_ptr.vmem [resolvable:$true] %s8367_s21 }
0x1d97   :  { %8338 = vst [vmem:[#allocation19 + $0x8] sm:$0xff] %v7882_v22  ;;  %8340 = vst [vmem:[#allocation19 + $0x18] sm:$0xff] %v7923_v23  ;;  %v6832_v22 = vrot.slane %v6761_v21, %v11037_v38  ;;  %v6840_v23 = vrot.slane %v6761_v21, %v11265_v42  ;;  %v6836_v24 = vrot.slane %v6761_v21, %v11040_v40  ;;  %s10769_s22 = scalar_lea.vmem %s8368_s21, 3072  ;;  %p10774_p9 = scmp.lt.s32.totalorder %s8368_s21, %s8368_s21 }
0x1d98   :  { %v7884_v7 = vpop.f32.mrf.mxu0  ;;  %v7925_v31 = vpop.f32.mrf.mxu1  ;;  %v6844_v6 = vrot.slane %v6761_v21, %v11271_v33  ;;  %v6848_v40 = vrot.slane %v6761_v21, %v11278_v25  ;;  %v6856_v33 = vrot.slane %v6761_v21, %v11281_v47  ;;  %p10770_p8 = scmp.ne.s32.totalorder %s8368_s21, %s10769_s22  ;;  %p10775_p10 = scmp.lt.s32.totalorder %s10769_s22, %s10769_s22 }
0x1d9a   :  { %p10776_p11 = por %p10775_p10, %p10774_p9 }
0x1d9c   :  { %p10777_p12 = pnand %p10776_p11, %p10770_p8 }
0x1db2   :  { %v7961_v34 = vpop.f32.mrf.mxu0  ;;  %v8002_v35 = vpop.f32.mrf.mxu1 }
0x1db3   :  { %v7962_v36 = vadd.f32 %v7961_v34, %v6784_v28  ;;  %v8003_v26 = vadd.f32 %v8002_v35, %v6792_v18 }
0x1db4   :  { %v7963_v39 = vpop.f32.mrf.mxu0  ;;  %v8004_v54 = vpop.f32.mrf.mxu1 }
0x1db5   :  { %8341 = vst [vmem:[#allocation19 + $0x20] sm:$0xff] %v7962_v36  ;;  %8343 = vst [vmem:[#allocation19 + $0x30] sm:$0xff] %v8003_v26  ;;  %v7964_v43 = vadd.f32 %v7963_v39, %v6788_v29  ;;  %v8005_v0 = vadd.f32 %v8004_v54, %v6796_v32  ;;  %v6852_v39 = vrot.slane %v6761_v21, %v11284_v27 }
0x1db6   :  { %v7965_v37 = vpop.f32.mrf.mxu0  ;;  %v8006_v44 = vpop.f32.mrf.mxu1  ;;  %v6860_v54 = vrot.slane %v6761_v21, %v11287_v17 }
0x1db7   :  { %8342 = vst [vmem:[#allocation19 + $0x28] sm:$0xff] %v7964_v43  ;;  %8344 = vst [vmem:[#allocation19 + $0x38] sm:$0xff] %v8005_v0 }
0x1db8   :  { %v7966_v45 = vpop.f32.mrf.mxu0  ;;  %v8007_v46 = vpop.f32.mrf.mxu1 }
0x1dd2   :  { %v8043_v5 = vpop.f32.mrf.mxu0  ;;  %v8084_v55 = vpop.f32.mrf.mxu1 }
0x1dd3   :  { %v8044_v57 = vadd.f32 %v8043_v5, %v6800_v49  ;;  %v8085_v59 = vadd.f32 %v8084_v55, %v6808_v50 }
0x1dd4   :  { %v8045_v60 = vpop.f32.mrf.mxu0  ;;  %v8086_v61 = vpop.f32.mrf.mxu1 }
0x1dd5   :  { %8345 = vst [vmem:[#allocation19 + $0x40] sm:$0xff] %v8044_v57  ;;  %8347 = vst [vmem:[#allocation19 + $0x50] sm:$0xff] %v8085_v59  ;;  %v8046_v63 = vadd.f32 %v8045_v60, %v6804_v52  ;;  %v8087_v51 = vadd.f32 %v8086_v61, %v6812_v53 }
0x1dd6   :  { %v8047_v2 = vpop.f32.mrf.mxu0  ;;  %v8088_v14 = vpop.f32.mrf.mxu1 }
0x1dd7   :  { %8346 = vst [vmem:[#allocation19 + $0x48] sm:$0xff] %v8046_v63  ;;  %8348 = vst [vmem:[#allocation19 + $0x58] sm:$0xff] %v8087_v51 }
0x1dd8   :  { %v8048_v19 = vpop.f32.mrf.mxu0  ;;  %v8089_v3 = vpop.f32.mrf.mxu1 }
0x1df2   :  { %v8125_v10 = vpop.f32.mrf.mxu0  ;;  %v8166_v11 = vpop.f32.mrf.mxu1 }
0x1df3   :  { %v8126_v12 = vadd.f32 %v8125_v10, %v6816_v4  ;;  %v8167_v13 = vadd.f32 %v8166_v11, %v6824_v8 }
0x1df4   :  { %v8127_v30 = vpop.f32.mrf.mxu0  ;;  %v8168_v15 = vpop.f32.mrf.mxu1 }
0x1df5   :  { %8349 = vst [vmem:[#allocation19 + $0x60] sm:$0xff] %v8126_v12  ;;  %8351 = vst [vmem:[#allocation19 + $0x70] sm:$0xff] %v8167_v13  ;;  %v8128_v1 = vadd.f32 %v8127_v30, %v6820_v9  ;;  %v8169_v16 = vadd.f32 %v8168_v15, %v6828_v41 }
0x1df6   :  { %v8129_v62 = vpop.f32.mrf.mxu0  ;;  %v8170_v56 = vpop.f32.mrf.mxu1 }
0x1df7   :  { %8350 = vst [vmem:[#allocation19 + $0x68] sm:$0xff] %v8128_v1  ;;  %8352 = vst [vmem:[#allocation19 + $0x78] sm:$0xff] %v8169_v16 }
0x1df8   :  { %v8130_v58 = vpop.f32.mrf.mxu0  ;;  %v8171_v20 = vpop.f32.mrf.mxu1 }
0x1e12   :  { %v8207_v7 = vpop.f32.mrf.mxu0  ;;  %v8248_v31 = vpop.f32.mrf.mxu1 }
0x1e13   :  { %v8208_v28 = vadd.f32 %v8207_v7, %v6832_v22  ;;  %v8249_v18 = vadd.f32 %v8248_v31, %v6840_v23 }
0x1e14   :  { %v8209_v29 = vpop.f32.mrf.mxu0  ;;  %v8250_v32 = vpop.f32.mrf.mxu1 }
0x1e15   :  { %8353 = vst [vmem:[#allocation19 + $0x80] sm:$0xff] %v8208_v28  ;;  %8355 = vst [vmem:[#allocation19 + $0x90] sm:$0xff] %v8249_v18  ;;  %v8210_v34 = vadd.f32 %v8209_v29, %v6836_v24  ;;  %v8251_v35 = vadd.f32 %v8250_v32, %v6844_v6 }
0x1e16   :  { %v8211_v36 = vpop.f32.mrf.mxu0  ;;  %v8252_v26 = vpop.f32.mrf.mxu1 }
0x1e17   :  { %8354 = vst [vmem:[#allocation19 + $0x88] sm:$0xff] %v8210_v34  ;;  %8356 = vst [vmem:[#allocation19 + $0x98] sm:$0xff] %v8251_v35 }
0x1e18   :  { %v8212_v38 = vpop.f32.mrf.mxu0  ;;  %v8253_v42 = vpop.f32.mrf.mxu1 }
0x1e32   :  { %v8289_v43 = vpop.f32.mrf.mxu0  ;;  %v8330_v0 = vpop.f32.mrf.mxu1 }
0x1e33   :  { %v8290_v37 = vadd.f32 %v8289_v43, %v6848_v40  ;;  %v8331_v44 = vadd.f32 %v8330_v0, %v6856_v33 }
0x1e34   :  { %v8291_v45 = vpop.f32.mrf.mxu0  ;;  %v8332_v46 = vpop.f32.mrf.mxu1 }
0x1e35   :  { %8357 = vst [vmem:[#allocation19 + $0xa0] sm:$0xff] %v8290_v37  ;;  %8359 = vst [vmem:[#allocation19 + $0xb0] sm:$0xff] %v8331_v44  ;;  %v8292_v48 = vadd.f32 %v8291_v45, %v6852_v39  ;;  %v8333_v49 = vadd.f32 %v8332_v46, %v6860_v54 }
0x1e36   :  { %v8293_v25 = vpop.f32.mrf.mxu0  ;;  %v8334_v50 = vpop.f32.mrf.mxu1 }
0x1e37   :  { %8358 = vst [vmem:[#allocation19 + $0xa8] sm:$0xff] %v8292_v48  ;;  %8360 = vst [vmem:[#allocation19 + $0xb8] sm:$0xff] %v8333_v49 }
0x1e38   :  { %v8294_v47 = vpop.f32.mrf.mxu0  ;;  %v8335_v27 = vpop.f32.mrf.mxu1 }
0x1e39   :  { %10780 = shalt.err (!%p10777_p12)
}
0x1e3a   :  { %8370 = dma.vmem_to_hbm [thread:$0]  %s8368_s21, 3072, %s11330_s12, [#allocation4]  }
0x1e3b   :  { %10801 = dma.done.wait [#allocation4], 3072  }
0x1e3c   :  { %10802 = vsyncadd [#allocation4], 4294964224 }
0x1e3d   :  { %8374 = vsyncpa [#allocation3], 1 }
0x1e3e   :  { %8375 = vsyncpa [#allocation6], 1 }
0x1e3f   :  { %8376 = vsyncpa [#allocation9], 1 }
0x1e40   :  { %8377 = vsyncpa [#allocation12], 1 }
0x1e41   :  { %8378 = vsyncpa [#allocation15], 1 }
0x1e42   :  { %8379 = vsyncpa [#allocation18], 1 }
0x1e43   :  { %8380 = vsyncpa [#allocation4], 1 }

</bundles_post_ra>
